<compile_context>
chip_gen: v6e
topology: v6e:2x2x1
jax: 0.10.0
libtpu: 0.0.40
codegen_flags: <defaults>
</compile_context>

<pallas_src>
import functools

import jax
import jax.numpy as jnp
from jax.experimental import pallas as pl
from jax.experimental.pallas import tpu as pltpu


def _layernorm(y, g, beta, eps):
    mu = jnp.mean(y, axis=-1, keepdims=True)
    var = jnp.mean((y - mu) ** 2, axis=-1, keepdims=True)
    return (y - mu) * jax.lax.rsqrt(var + eps) * g + beta


def _attn_core(qb, kb, vb, bias, s_scr, attn_scr, heads, dh):
    """Multi-head attention for one batch element.

    qb: (T, D) bf16, query already scaled by 1/sqrt(dh) via the folded weights.
    kb, vb: (Tk, D) bf16.  bias: (T, Tk) f32 additive mask.
    s_scr: (H, T, Tk) f32 VMEM scratch.  attn_scr: (T, D) f32 VMEM scratch.
    """
    # Per-head QK^T written into a head-stacked scratch (leading-dim stores).
    for h in range(heads):
        sl = slice(h * dh, (h + 1) * dh)
        s_scr[h] = jax.lax.dot_general(
            qb[:, sl], kb[:, sl], (((1,), (1,)), ((), ())),
            preferred_element_type=jnp.float32)
    # One broadcasted bias add + ONE vectorized softmax over all heads
    # (instead of H duplicated instruction streams / per-head broadcasts).
    s = s_scr[...] + bias[None, :, :]
    m = jnp.max(s, axis=-1, keepdims=True)
    p = jnp.exp(s - m)
    l = jnp.sum(p, axis=-1, keepdims=True)
    p = (p / l).astype(jnp.bfloat16)          # exact division (PyTorch parity)
    # Per-head PV written into a lane-dense (T, D) scratch (no 8-way concat).
    for h in range(heads):
        sl = slice(h * dh, (h + 1) * dh)
        attn_scr[:, sl] = jnp.dot(p[h], vb[:, sl],
                                  preferred_element_type=jnp.float32)
    return attn_scr[...]


def _decoder_layer_kernel(
        x_ref, enc_ref, tmask_ref, tkpm_ref, mkpm_ref,
        w_qkv1_ref, b_qkv1_ref, wo1_ref, bo1_ref, g1_ref, be1_ref,
        wq2_ref, bq2_ref, wkv2_ref, bkv2_ref, wo2_ref, bo2_ref, g2_ref, be2_ref,
        wf1_ref, bf1_ref, wf2_ref, bf2_ref, g3_ref, be3_ref,
        o_ref, s1_scr, s2_scr, attn_scr, *, heads, eps):
    bf = jnp.bfloat16
    D = x_ref.shape[-1]
    dh = D // heads

    x = x_ref[0]            # (T, D) f32 — residual for block 1
    enc = enc_ref[0]        # (S, D) f32
    T = x.shape[0]
    S = enc.shape[0]

    # ---------------- self-attention block ----------------
    # Additive bias built in-kernel from small pieces (no (B,T,T) HBM bias).
    bias1 = tmask_ref[...] + tkpm_ref[0]                      # (T,T) + (1,T) -> (T,T)
    # Folded projection: (q/k/v Linear) o (MHA in_proj) == one x @ (D,3D) matmul.
    qkv1 = jnp.dot(x.astype(bf), w_qkv1_ref[...],
                   preferred_element_type=jnp.float32) + b_qkv1_ref[...]
    attn1 = _attn_core(qkv1[:, :D].astype(bf), qkv1[:, D:2 * D].astype(bf),
                       qkv1[:, 2 * D:].astype(bf), bias1, s1_scr, attn_scr,
                       heads, dh)
    y1 = jnp.dot(attn1.astype(bf), wo1_ref[...],
                 preferred_element_type=jnp.float32) + bo1_ref[...] + x
    h1 = _layernorm(y1, g1_ref[...], be1_ref[...], eps)       # mha1_out (T, D) f32

    # ---------------- cross-attention block ----------------
    bias2 = jnp.broadcast_to(mkpm_ref[0], (T, S))             # hoisted once
    q2 = (jnp.dot(h1.astype(bf), wq2_ref[...],
                  preferred_element_type=jnp.float32) + bq2_ref[...]).astype(bf)
    kv2 = jnp.dot(enc.astype(bf), wkv2_ref[...],
                  preferred_element_type=jnp.float32) + bkv2_ref[...]
    attn2 = _attn_core(q2, kv2[:, :D].astype(bf), kv2[:, D:].astype(bf),
                       bias2, s2_scr, attn_scr, heads, dh)
    y2 = jnp.dot(attn2.astype(bf), wo2_ref[...],
                 preferred_element_type=jnp.float32) + bo2_ref[...] + h1
    h2 = _layernorm(y2, g2_ref[...], be2_ref[...], eps)       # mha2_out (T, D) f32

    # ---------------- FFN block ----------------
    f = jnp.dot(h2.astype(bf), wf1_ref[...],
                preferred_element_type=jnp.float32) + bf1_ref[...]
    f = jnp.maximum(f, 0.0)
    y3 = jnp.dot(f.astype(bf), wf2_ref[...],
                 preferred_element_type=jnp.float32) + bf2_ref[...] + h2
    o_ref[0] = _layernorm(y3, g3_ref[...], be3_ref[...], eps)


def decoder_layer_forward(pp, x, encoder_out, tgt_mask, tgt_kpm, mem_kpm, heads,
                          eps=1e-5):
    """x: (B,T,D) f32, encoder_out: (B,S,D) f32, masks: bool (True == mask out)."""
    B, T, D = x.shape
    S = encoder_out.shape[1]
    H = heads
    F = pp["ffn_w1"].shape[1]
    NEG = -1e9  # large negative, not -inf: fully-masked rows -> uniform softmax (NaN-safe)

    # Small additive mask pieces; the full per-batch bias is assembled in-kernel.
    tmask_bias = jnp.where(tgt_mask, NEG, 0.0).astype(jnp.float32)             # (T, T)
    tkpm_bias = jnp.where(tgt_kpm, NEG, 0.0).astype(jnp.float32)[:, None, :]   # (B, 1, T)
    mkpm_bias = jnp.where(mem_kpm, NEG, 0.0).astype(jnp.float32)[:, None, :]   # (B, 1, S)

    kern = functools.partial(_decoder_layer_kernel, heads=H, eps=eps)

    def per_batch(shape):
        return pl.BlockSpec(shape, lambda b, _n=len(shape): (b,) + (0,) * (_n - 1))

    def const(shape):
        # Constant index map: the tile is fetched once and stays VMEM-resident
        # across the batch grid (weights / static masks).
        return pl.BlockSpec(shape, lambda b, _n=len(shape): (0,) * _n)

    in_specs = [
        per_batch((1, T, D)),                      # x
        per_batch((1, S, D)),                      # encoder_out
        const((T, T)),                             # tgt attn-mask bias
        per_batch((1, 1, T)),                      # tgt key-padding bias row
        per_batch((1, 1, S)),                      # memory key-padding bias row
        const((D, 3 * D)), const((1, 3 * D)),      # blk1 folded qkv projection
        const((D, D)), const((1, D)),              # blk1 out_proj
        const((1, D)), const((1, D)),              # ln1 gamma/beta
        const((D, D)), const((1, D)),              # blk2 folded q projection
        const((D, 2 * D)), const((1, 2 * D)),      # blk2 folded kv projection
        const((D, D)), const((1, D)),              # blk2 out_proj
        const((1, D)), const((1, D)),              # ln2 gamma/beta
        const((D, F)), const((1, F)),              # ffn linear 1
        const((F, D)), const((1, D)),              # ffn linear 2
        const((1, D)), const((1, D)),              # ln3 gamma/beta
    ]

    return pl.pallas_call(
        kern,
        out_shape=jax.ShapeDtypeStruct((B, T, D), jnp.float32),
        grid=(B,),
        in_specs=in_specs,
        out_specs=per_batch((1, T, D)),
        scratch_shapes=[
            pltpu.VMEM((H, T, T), jnp.float32),    # self-attn head-stacked scores
            pltpu.VMEM((H, T, S), jnp.float32),    # cross-attn head-stacked scores
            pltpu.VMEM((T, D), jnp.float32),       # lane-dense attention output
        ],
        compiler_params=pltpu.CompilerParams(
            dimension_semantics=("parallel",),
            vmem_limit_bytes=48 * 1024 * 1024),
    )(x, encoder_out, tmask_bias, tkpm_bias, mkpm_bias,
      pp["blk1_w_qkv"], pp["blk1_b_qkv"], pp["blk1_w_out"], pp["blk1_b_out"],
      pp["blk1_ln_g"], pp["blk1_ln_b"],
      pp["blk2_w_q"], pp["blk2_b_q"], pp["blk2_w_kv"], pp["blk2_b_kv"],
      pp["blk2_w_out"], pp["blk2_b_out"], pp["blk2_ln_g"], pp["blk2_ln_b"],
      pp["ffn_w1"], pp["ffn_b1"], pp["ffn_w2"], pp["ffn_b2"],
      pp["ln3_g"], pp["ln3_b"])


# --------------------------------------------------------------------------
# Parameter init (torch layouts) + one-time offline folding / transpose / bf16 cast
# --------------------------------------------------------------------------
def init_params(key, D, F):
    keys = iter(jax.random.split(key, 40))

    def w(shape):
        return jax.random.normal(next(keys), shape, jnp.float32) * 0.02

    def b(shape):
        return jnp.zeros(shape, jnp.float32)

    p = {}
    for name in ("k1", "q1", "v1", "k2", "q2", "v2"):
        p[f"{name}_w"] = w((D, D))          # torch Linear (out, in)
        p[f"{name}_b"] = b((D,))
    for name in ("mha1", "mha2"):
        p[f"{name}_in_w"] = w((3 * D, D))   # in_proj rows [q; k; v]
        p[f"{name}_in_b"] = b((3 * D,))
        p[f"{name}_out_w"] = w((D, D))
        p[f"{name}_out_b"] = b((D,))
    for name in ("ln1", "ln2", "ln3"):
        p[f"{name}_g"] = jnp.ones((D,), jnp.float32)
        p[f"{name}_b"] = jnp.zeros((D,), jnp.float32)
    p["ffn_w1"] = w((F, D))
    p["ffn_b1"] = b((F,))
    p["ffn_w2"] = w((D, F))
    p["ffn_b2"] = b((D,))
    return p


def prepare_params(p, heads):
    """One-time offline prep:
      * fold the per-block q/k/v Linears into the MHA in_proj slices in f32
        (W_eff = W_pre^T @ W_in_slice^T, b_eff = W_in_slice @ b_pre + b_in_slice),
        then cast to bf16 once,
      * fold the 1/sqrt(head_dim) query scale into the effective q weight/bias,
      * fuse self-attn q/k/v into one (D, 3D) weight and cross-attn k/v into (D, 2D),
      * pre-transpose everything to (in, out); biases / LN params stay f32 rows."""
    bf = jnp.bfloat16
    D = p["q1_w"].shape[0]
    scale = 1.0 / ((D // heads) ** 0.5)

    def row(v):
        return v.reshape(1, -1).astype(jnp.float32)

    q = {}
    for i, (qn, kn, vn, mh, ln) in enumerate(
            (("q1", "k1", "v1", "mha1", "ln1"),
             ("q2", "k2", "v2", "mha2", "ln2")), start=1):
        w_in = p[f"{mh}_in_w"]                              # (3D, D) rows [q; k; v]
        b_in = p[f"{mh}_in_b"]
        wiq, wik, wiv = w_in[:D], w_in[D:2 * D], w_in[2 * D:]
        biq, bik, biv = b_in[:D], b_in[D:2 * D], b_in[2 * D:]
        wq_eff = (p[f"{qn}_w"].T @ wiq.T) * scale           # (D, D) f32 fold
        bq_eff = (p[f"{qn}_b"] @ wiq.T + biq) * scale
        wk_eff = p[f"{kn}_w"].T @ wik.T
        bk_eff = p[f"{kn}_b"] @ wik.T + bik
        wv_eff = p[f"{vn}_w"].T @ wiv.T
        bv_eff = p[f"{vn}_b"] @ wiv.T + biv
        if i == 1:   # self-attention: q/k/v share the same source -> one (D,3D) matmul
            q["blk1_w_qkv"] = jnp.concatenate([wq_eff, wk_eff, wv_eff], axis=1).astype(bf)
            q["blk1_b_qkv"] = row(jnp.concatenate([bq_eff, bk_eff, bv_eff]))
        else:        # cross-attention: q from decoder stream, k/v from encoder_out
            q["blk2_w_q"] = wq_eff.astype(bf)
            q["blk2_b_q"] = row(bq_eff)
            q["blk2_w_kv"] = jnp.concatenate([wk_eff, wv_eff], axis=1).astype(bf)
            q["blk2_b_kv"] = row(jnp.concatenate([bk_eff, bv_eff]))
        q[f"blk{i}_w_out"] = p[f"{mh}_out_w"].T.astype(bf)
        q[f"blk{i}_b_out"] = row(p[f"{mh}_out_b"])
        q[f"blk{i}_ln_g"] = row(p[f"{ln}_g"])
        q[f"blk{i}_ln_b"] = row(p[f"{ln}_b"])
    q["ffn_w1"] = p["ffn_w1"].T.astype(bf)                  # (D, F)
    q["ffn_b1"] = row(p["ffn_b1"])
    q["ffn_w2"] = p["ffn_w2"].T.astype(bf)                  # (F, D)
    q["ffn_b2"] = row(p["ffn_b2"])
    q["ln3_g"] = row(p["ln3_g"])
    q["ln3_b"] = row(p["ln3_b"])
    return q


if __name__ == "__main__":
    # Small shapes consistent with the module (heads=8 -> head_dim=16 at D=128).
    B, T, S, D, F, H = 2, 8, 8, 128, 256, 8

    root = jax.random.PRNGKey(0)
    k_par, k_x, k_enc = jax.random.split(root, 3)
    params = prepare_params(init_params(k_par, D, F), heads=H)

    x = jax.random.normal(k_x, (B, T, D), jnp.float32)
    encoder_out = jax.random.normal(k_enc, (B, S, D), jnp.float32)

    # Causal target mask (True == disallowed) plus some key padding.
    tgt_mask = jnp.triu(jnp.ones((T, T), jnp.bool_), k=1)
    tgt_key_padding_mask = jnp.zeros((B, T), jnp.bool_).at[1, T - 1].set(True)
    memory_key_padding_mask = jnp.zeros((B, S), jnp.bool_).at[1, S - 2:].set(True)

    # TODO(synk): dropout (attention + FFN) is identity in eval mode; training-mode
    # RNG dropout is not implemented.
    fwd = jax.jit(functools.partial(decoder_layer_forward, heads=H))
    out = fwd(params, x, encoder_out, tgt_mask, tgt_key_padding_mask,
              memory_key_padding_mask)
    jax.block_until_ready(out)

    assert out.shape == (B, T, D)
    assert bool(jnp.all(jnp.isfinite(out)))
    print("KERNEL_OK")
</pallas_src>

<mosaic_0001>
module attributes {stable_mosaic.version = 11 : i64} {
  func.func @_decoder_layer_kernel(%arg0: i32, %arg1: memref<1x8x128xf32, #tpu.memory_space<vmem>>, %arg2: memref<1x8x128xf32, #tpu.memory_space<vmem>>, %arg3: memref<8x8xf32, #tpu.memory_space<vmem>>, %arg4: memref<1x1x8xf32, #tpu.memory_space<vmem>>, %arg5: memref<1x1x8xf32, #tpu.memory_space<vmem>>, %arg6: memref<128x384xbf16, #tpu.memory_space<vmem>>, %arg7: memref<1x384xf32, #tpu.memory_space<vmem>>, %arg8: memref<128x128xbf16, #tpu.memory_space<vmem>>, %arg9: memref<1x128xf32, #tpu.memory_space<vmem>>, %arg10: memref<1x128xf32, #tpu.memory_space<vmem>>, %arg11: memref<1x128xf32, #tpu.memory_space<vmem>>, %arg12: memref<128x128xbf16, #tpu.memory_space<vmem>>, %arg13: memref<1x128xf32, #tpu.memory_space<vmem>>, %arg14: memref<128x256xbf16, #tpu.memory_space<vmem>>, %arg15: memref<1x256xf32, #tpu.memory_space<vmem>>, %arg16: memref<128x128xbf16, #tpu.memory_space<vmem>>, %arg17: memref<1x128xf32, #tpu.memory_space<vmem>>, %arg18: memref<1x128xf32, #tpu.memory_space<vmem>>, %arg19: memref<1x128xf32, #tpu.memory_space<vmem>>, %arg20: memref<128x256xbf16, #tpu.memory_space<vmem>>, %arg21: memref<1x256xf32, #tpu.memory_space<vmem>>, %arg22: memref<256x128xbf16, #tpu.memory_space<vmem>>, %arg23: memref<1x128xf32, #tpu.memory_space<vmem>>, %arg24: memref<1x128xf32, #tpu.memory_space<vmem>>, %arg25: memref<1x128xf32, #tpu.memory_space<vmem>>, %arg26: memref<1x8x128xf32, #tpu.memory_space<vmem>>, %arg27: memref<8x8x8xf32, #tpu.memory_space<vmem>>, %arg28: memref<8x8x8xf32, #tpu.memory_space<vmem>>, %arg29: memref<8x128xf32, #tpu.memory_space<vmem>>) attributes {dimension_semantics = [#tpu.dimension_semantics<parallel>], iteration_bounds = array<i64: 2>, scalar_prefetch = 0 : i64, scratch_operands = 3 : i64, tpu.core_type = #tpu.core_type<tc>, window_params = [{transform_indices = @transform_0, window_bounds = array<i64: 1, 8, 128>}, {transform_indices = @transform_1, window_bounds = array<i64: 1, 8, 128>}, {pipeline_mode = #tpu.pipeline_mode<synchronous>, transform_indices = @transform_2, window_bounds = array<i64: 8, 8>}, {transform_indices = @transform_3, window_bounds = array<i64: 1, 1, 8>}, {transform_indices = @transform_4, window_bounds = array<i64: 1, 1, 8>}, {pipeline_mode = #tpu.pipeline_mode<synchronous>, transform_indices = @transform_5, window_bounds = array<i64: 128, 384>}, {pipeline_mode = #tpu.pipeline_mode<synchronous>, transform_indices = @transform_6, window_bounds = array<i64: 1, 384>}, {pipeline_mode = #tpu.pipeline_mode<synchronous>, transform_indices = @transform_7, window_bounds = array<i64: 128, 128>}, {pipeline_mode = #tpu.pipeline_mode<synchronous>, transform_indices = @transform_8, window_bounds = array<i64: 1, 128>}, {pipeline_mode = #tpu.pipeline_mode<synchronous>, transform_indices = @transform_9, window_bounds = array<i64: 1, 128>}, {pipeline_mode = #tpu.pipeline_mode<synchronous>, transform_indices = @transform_10, window_bounds = array<i64: 1, 128>}, {pipeline_mode = #tpu.pipeline_mode<synchronous>, transform_indices = @transform_11, window_bounds = array<i64: 128, 128>}, {pipeline_mode = #tpu.pipeline_mode<synchronous>, transform_indices = @transform_12, window_bounds = array<i64: 1, 128>}, {pipeline_mode = #tpu.pipeline_mode<synchronous>, transform_indices = @transform_13, window_bounds = array<i64: 128, 256>}, {pipeline_mode = #tpu.pipeline_mode<synchronous>, transform_indices = @transform_14, window_bounds = array<i64: 1, 256>}, {pipeline_mode = #tpu.pipeline_mode<synchronous>, transform_indices = @transform_15, window_bounds = array<i64: 128, 128>}, {pipeline_mode = #tpu.pipeline_mode<synchronous>, transform_indices = @transform_16, window_bounds = array<i64: 1, 128>}, {pipeline_mode = #tpu.pipeline_mode<synchronous>, transform_indices = @transform_17, window_bounds = array<i64: 1, 128>}, {pipeline_mode = #tpu.pipeline_mode<synchronous>, transform_indices = @transform_18, window_bounds = array<i64: 1, 128>}, {pipeline_mode = #tpu.pipeline_mode<synchronous>, transform_indices = @transform_19, window_bounds = array<i64: 128, 256>}, {pipeline_mode = #tpu.pipeline_mode<synchronous>, transform_indices = @transform_20, window_bounds = array<i64: 1, 256>}, {pipeline_mode = #tpu.pipeline_mode<synchronous>, transform_indices = @transform_21, window_bounds = array<i64: 256, 128>}, {pipeline_mode = #tpu.pipeline_mode<synchronous>, transform_indices = @transform_22, window_bounds = array<i64: 1, 128>}, {pipeline_mode = #tpu.pipeline_mode<synchronous>, transform_indices = @transform_23, window_bounds = array<i64: 1, 128>}, {pipeline_mode = #tpu.pipeline_mode<synchronous>, transform_indices = @transform_24, window_bounds = array<i64: 1, 128>}, {transform_indices = @transform_25, window_bounds = array<i64: 1, 8, 128>}]} {
    %c0 = arith.constant 0 : index
    %c0_0 = arith.constant 0 : index
    %c0_1 = arith.constant 0 : index
    %0 = vector.load %arg1[%c0, %c0_0, %c0_1] : memref<1x8x128xf32, #tpu.memory_space<vmem>>, vector<1x8x128xf32>
    %1 = vector.shape_cast %0 : vector<1x8x128xf32> to vector<8x128xf32>
    %c0_2 = arith.constant 0 : index
    %c0_3 = arith.constant 0 : index
    %c0_4 = arith.constant 0 : index
    %2 = vector.load %arg2[%c0_2, %c0_3, %c0_4] : memref<1x8x128xf32, #tpu.memory_space<vmem>>, vector<1x8x128xf32>
    %3 = vector.shape_cast %2 : vector<1x8x128xf32> to vector<8x128xf32>
    %c0_5 = arith.constant 0 : index
    %c0_6 = arith.constant 0 : index
    %4 = vector.load %arg3[%c0_5, %c0_6] : memref<8x8xf32, #tpu.memory_space<vmem>>, vector<8x8xf32>
    %c0_7 = arith.constant 0 : index
    %c0_8 = arith.constant 0 : index
    %c0_9 = arith.constant 0 : index
    %5 = vector.load %arg4[%c0_7, %c0_8, %c0_9] : memref<1x1x8xf32, #tpu.memory_space<vmem>>, vector<1x1x8xf32>
    %6 = vector.shape_cast %5 : vector<1x1x8xf32> to vector<1x8xf32>
    %7 = vector.broadcast %6 : vector<1x8xf32> to vector<8x8xf32>
    %8 = arith.addf %4, %7 : vector<8x8xf32>
    %9 = arith.truncf %1 : vector<8x128xf32> to vector<8x128xbf16>
    %c0_10 = arith.constant 0 : index
    %c0_11 = arith.constant 0 : index
    %10 = vector.load %arg6[%c0_10, %c0_11] : memref<128x384xbf16, #tpu.memory_space<vmem>>, vector<128x384xbf16>
    %cst = arith.constant dense<0.000000e+00> : vector<8x384xf32>
    %11 = tpu.matmul %9, %10, %cst {dimension_numbers = #tpu.dot_dimension_numbers<[1], [0], [0], [1], [0, 0, 1, 1], [], []>} : vector<8x128xbf16>, vector<128x384xbf16>, vector<8x384xf32> -> vector<8x384xf32>
    %c0_12 = arith.constant 0 : index
    %c0_13 = arith.constant 0 : index
    %12 = vector.load %arg7[%c0_12, %c0_13] : memref<1x384xf32, #tpu.memory_space<vmem>>, vector<1x384xf32>
    %13 = vector.broadcast %12 : vector<1x384xf32> to vector<8x384xf32>
    %14 = arith.addf %11, %13 : vector<8x384xf32>
    %15 = vector.extract_strided_slice %14 {offsets = [0, 0], sizes = [8, 128], strides = [1, 1]} : vector<8x384xf32> to vector<8x128xf32>
    %16 = arith.truncf %15 : vector<8x128xf32> to vector<8x128xbf16>
    %17 = vector.extract_strided_slice %14 {offsets = [0, 128], sizes = [8, 128], strides = [1, 1]} : vector<8x384xf32> to vector<8x128xf32>
    %18 = arith.truncf %17 : vector<8x128xf32> to vector<8x128xbf16>
    %19 = vector.extract_strided_slice %14 {offsets = [0, 256], sizes = [8, 128], strides = [1, 1]} : vector<8x384xf32> to vector<8x128xf32>
    %20 = arith.truncf %19 : vector<8x128xf32> to vector<8x128xbf16>
    %21 = vector.extract_strided_slice %16 {offsets = [0, 0], sizes = [8, 16], strides = [1, 1]} : vector<8x128xbf16> to vector<8x16xbf16>
    %22 = vector.extract_strided_slice %18 {offsets = [0, 0], sizes = [8, 16], strides = [1, 1]} : vector<8x128xbf16> to vector<8x16xbf16>
    %cst_14 = arith.constant dense<0.000000e+00> : vector<8x8xf32>
    %23 = tpu.matmul %21, %22, %cst_14 {dimension_numbers = #tpu.dot_dimension_numbers<[1], [1], [0], [0], [0, 0, 1, 0], [], []>} : vector<8x16xbf16>, vector<8x16xbf16>, vector<8x8xf32> -> vector<8x8xf32>
    %c0_15 = arith.constant 0 : index
    %c0_16 = arith.constant 0 : index
    %c0_17 = arith.constant 0 : index
    %24 = vector.load %arg27[%c0_15, %c0_16, %c0_17] : memref<8x8x8xf32, #tpu.memory_space<vmem>>, vector<1x8x8xf32>
    %25 = vector.shape_cast %24 : vector<1x8x8xf32> to vector<8x8xf32>
    %26 = vector.shape_cast %23 : vector<8x8xf32> to vector<1x8x8xf32>
    tpu.vector_store %arg27[%c0_15, %c0_16, %c0_17], %26 {strides = array<i32>} : memref<8x8x8xf32, #tpu.memory_space<vmem>>, vector<1x8x8xf32>,
    %27 = vector.extract_strided_slice %16 {offsets = [0, 16], sizes = [8, 16], strides = [1, 1]} : vector<8x128xbf16> to vector<8x16xbf16>
    %28 = vector.extract_strided_slice %18 {offsets = [0, 16], sizes = [8, 16], strides = [1, 1]} : vector<8x128xbf16> to vector<8x16xbf16>
    %cst_18 = arith.constant dense<0.000000e+00> : vector<8x8xf32>
    %29 = tpu.matmul %27, %28, %cst_18 {dimension_numbers = #tpu.dot_dimension_numbers<[1], [1], [0], [0], [0, 0, 1, 0], [], []>} : vector<8x16xbf16>, vector<8x16xbf16>, vector<8x8xf32> -> vector<8x8xf32>
    %c1 = arith.constant 1 : index
    %c0_19 = arith.constant 0 : index
    %c0_20 = arith.constant 0 : index
    %30 = vector.load %arg27[%c1, %c0_19, %c0_20] : memref<8x8x8xf32, #tpu.memory_space<vmem>>, vector<1x8x8xf32>
    %31 = vector.shape_cast %30 : vector<1x8x8xf32> to vector<8x8xf32>
    %32 = vector.shape_cast %29 : vector<8x8xf32> to vector<1x8x8xf32>
    tpu.vector_store %arg27[%c1, %c0_19, %c0_20], %32 {strides = array<i32>} : memref<8x8x8xf32, #tpu.memory_space<vmem>>, vector<1x8x8xf32>,
    %33 = vector.extract_strided_slice %16 {offsets = [0, 32], sizes = [8, 16], strides = [1, 1]} : vector<8x128xbf16> to vector<8x16xbf16>
    %34 = vector.extract_strided_slice %18 {offsets = [0, 32], sizes = [8, 16], strides = [1, 1]} : vector<8x128xbf16> to vector<8x16xbf16>
    %cst_21 = arith.constant dense<0.000000e+00> : vector<8x8xf32>
    %35 = tpu.matmul %33, %34, %cst_21 {dimension_numbers = #tpu.dot_dimension_numbers<[1], [1], [0], [0], [0, 0, 1, 0], [], []>} : vector<8x16xbf16>, vector<8x16xbf16>, vector<8x8xf32> -> vector<8x8xf32>
    %c2 = arith.constant 2 : index
    %c0_22 = arith.constant 0 : index
    %c0_23 = arith.constant 0 : index
    %36 = vector.load %arg27[%c2, %c0_22, %c0_23] : memref<8x8x8xf32, #tpu.memory_space<vmem>>, vector<1x8x8xf32>
    %37 = vector.shape_cast %36 : vector<1x8x8xf32> to vector<8x8xf32>
    %38 = vector.shape_cast %35 : vector<8x8xf32> to vector<1x8x8xf32>
    tpu.vector_store %arg27[%c2, %c0_22, %c0_23], %38 {strides = array<i32>} : memref<8x8x8xf32, #tpu.memory_space<vmem>>, vector<1x8x8xf32>,
    %39 = vector.extract_strided_slice %16 {offsets = [0, 48], sizes = [8, 16], strides = [1, 1]} : vector<8x128xbf16> to vector<8x16xbf16>
    %40 = vector.extract_strided_slice %18 {offsets = [0, 48], sizes = [8, 16], strides = [1, 1]} : vector<8x128xbf16> to vector<8x16xbf16>
    %cst_24 = arith.constant dense<0.000000e+00> : vector<8x8xf32>
    %41 = tpu.matmul %39, %40, %cst_24 {dimension_numbers = #tpu.dot_dimension_numbers<[1], [1], [0], [0], [0, 0, 1, 0], [], []>} : vector<8x16xbf16>, vector<8x16xbf16>, vector<8x8xf32> -> vector<8x8xf32>
    %c3 = arith.constant 3 : index
    %c0_25 = arith.constant 0 : index
    %c0_26 = arith.constant 0 : index
    %42 = vector.load %arg27[%c3, %c0_25, %c0_26] : memref<8x8x8xf32, #tpu.memory_space<vmem>>, vector<1x8x8xf32>
    %43 = vector.shape_cast %42 : vector<1x8x8xf32> to vector<8x8xf32>
    %44 = vector.shape_cast %41 : vector<8x8xf32> to vector<1x8x8xf32>
    tpu.vector_store %arg27[%c3, %c0_25, %c0_26], %44 {strides = array<i32>} : memref<8x8x8xf32, #tpu.memory_space<vmem>>, vector<1x8x8xf32>,
    %45 = vector.extract_strided_slice %16 {offsets = [0, 64], sizes = [8, 16], strides = [1, 1]} : vector<8x128xbf16> to vector<8x16xbf16>
    %46 = vector.extract_strided_slice %18 {offsets = [0, 64], sizes = [8, 16], strides = [1, 1]} : vector<8x128xbf16> to vector<8x16xbf16>
    %cst_27 = arith.constant dense<0.000000e+00> : vector<8x8xf32>
    %47 = tpu.matmul %45, %46, %cst_27 {dimension_numbers = #tpu.dot_dimension_numbers<[1], [1], [0], [0], [0, 0, 1, 0], [], []>} : vector<8x16xbf16>, vector<8x16xbf16>, vector<8x8xf32> -> vector<8x8xf32>
    %c4 = arith.constant 4 : index
    %c0_28 = arith.constant 0 : index
    %c0_29 = arith.constant 0 : index
    %48 = vector.load %arg27[%c4, %c0_28, %c0_29] : memref<8x8x8xf32, #tpu.memory_space<vmem>>, vector<1x8x8xf32>
    %49 = vector.shape_cast %48 : vector<1x8x8xf32> to vector<8x8xf32>
    %50 = vector.shape_cast %47 : vector<8x8xf32> to vector<1x8x8xf32>
    tpu.vector_store %arg27[%c4, %c0_28, %c0_29], %50 {strides = array<i32>} : memref<8x8x8xf32, #tpu.memory_space<vmem>>, vector<1x8x8xf32>,
    %51 = vector.extract_strided_slice %16 {offsets = [0, 80], sizes = [8, 16], strides = [1, 1]} : vector<8x128xbf16> to vector<8x16xbf16>
    %52 = vector.extract_strided_slice %18 {offsets = [0, 80], sizes = [8, 16], strides = [1, 1]} : vector<8x128xbf16> to vector<8x16xbf16>
    %cst_30 = arith.constant dense<0.000000e+00> : vector<8x8xf32>
    %53 = tpu.matmul %51, %52, %cst_30 {dimension_numbers = #tpu.dot_dimension_numbers<[1], [1], [0], [0], [0, 0, 1, 0], [], []>} : vector<8x16xbf16>, vector<8x16xbf16>, vector<8x8xf32> -> vector<8x8xf32>
    %c5 = arith.constant 5 : index
    %c0_31 = arith.constant 0 : index
    %c0_32 = arith.constant 0 : index
    %54 = vector.load %arg27[%c5, %c0_31, %c0_32] : memref<8x8x8xf32, #tpu.memory_space<vmem>>, vector<1x8x8xf32>
    %55 = vector.shape_cast %54 : vector<1x8x8xf32> to vector<8x8xf32>
    %56 = vector.shape_cast %53 : vector<8x8xf32> to vector<1x8x8xf32>
    tpu.vector_store %arg27[%c5, %c0_31, %c0_32], %56 {strides = array<i32>} : memref<8x8x8xf32, #tpu.memory_space<vmem>>, vector<1x8x8xf32>,
    %57 = vector.extract_strided_slice %16 {offsets = [0, 96], sizes = [8, 16], strides = [1, 1]} : vector<8x128xbf16> to vector<8x16xbf16>
    %58 = vector.extract_strided_slice %18 {offsets = [0, 96], sizes = [8, 16], strides = [1, 1]} : vector<8x128xbf16> to vector<8x16xbf16>
    %cst_33 = arith.constant dense<0.000000e+00> : vector<8x8xf32>
    %59 = tpu.matmul %57, %58, %cst_33 {dimension_numbers = #tpu.dot_dimension_numbers<[1], [1], [0], [0], [0, 0, 1, 0], [], []>} : vector<8x16xbf16>, vector<8x16xbf16>, vector<8x8xf32> -> vector<8x8xf32>
    %c6 = arith.constant 6 : index
    %c0_34 = arith.constant 0 : index
    %c0_35 = arith.constant 0 : index
    %60 = vector.load %arg27[%c6, %c0_34, %c0_35] : memref<8x8x8xf32, #tpu.memory_space<vmem>>, vector<1x8x8xf32>
    %61 = vector.shape_cast %60 : vector<1x8x8xf32> to vector<8x8xf32>
    %62 = vector.shape_cast %59 : vector<8x8xf32> to vector<1x8x8xf32>
    tpu.vector_store %arg27[%c6, %c0_34, %c0_35], %62 {strides = array<i32>} : memref<8x8x8xf32, #tpu.memory_space<vmem>>, vector<1x8x8xf32>,
    %63 = vector.extract_strided_slice %16 {offsets = [0, 112], sizes = [8, 16], strides = [1, 1]} : vector<8x128xbf16> to vector<8x16xbf16>
    %64 = vector.extract_strided_slice %18 {offsets = [0, 112], sizes = [8, 16], strides = [1, 1]} : vector<8x128xbf16> to vector<8x16xbf16>
    %cst_36 = arith.constant dense<0.000000e+00> : vector<8x8xf32>
    %65 = tpu.matmul %63, %64, %cst_36 {dimension_numbers = #tpu.dot_dimension_numbers<[1], [1], [0], [0], [0, 0, 1, 0], [], []>} : vector<8x16xbf16>, vector<8x16xbf16>, vector<8x8xf32> -> vector<8x8xf32>
    %c7 = arith.constant 7 : index
    %c0_37 = arith.constant 0 : index
    %c0_38 = arith.constant 0 : index
    %66 = vector.load %arg27[%c7, %c0_37, %c0_38] : memref<8x8x8xf32, #tpu.memory_space<vmem>>, vector<1x8x8xf32>
    %67 = vector.shape_cast %66 : vector<1x8x8xf32> to vector<8x8xf32>
    %68 = vector.shape_cast %65 : vector<8x8xf32> to vector<1x8x8xf32>
    tpu.vector_store %arg27[%c7, %c0_37, %c0_38], %68 {strides = array<i32>} : memref<8x8x8xf32, #tpu.memory_space<vmem>>, vector<1x8x8xf32>,
    %c0_39 = arith.constant 0 : index
    %c0_40 = arith.constant 0 : index
    %c0_41 = arith.constant 0 : index
    %69 = vector.load %arg27[%c0_39, %c0_40, %c0_41] : memref<8x8x8xf32, #tpu.memory_space<vmem>>, vector<8x8x8xf32>
    %70 = vector.shape_cast %8 : vector<8x8xf32> to vector<1x8x8xf32>
    %71 = vector.broadcast %70 : vector<1x8x8xf32> to vector<8x8x8xf32>
    %72 = arith.addf %69, %71 : vector<8x8x8xf32>
    %cst_42 = arith.constant dense<0xFF800000> : vector<8x8xf32>
    %73 = vector.multi_reduction <maximumf>, %72, %cst_42 [2] : vector<8x8x8xf32> to vector<8x8xf32>
    %74 = vector.shape_cast %73 : vector<8x8xf32> to vector<8x8x1xf32>
    %75 = vector.broadcast %74 : vector<8x8x1xf32> to vector<8x8x8xf32>
    %76 = arith.subf %72, %75 : vector<8x8x8xf32>
    %77 = math.exp %76 : vector<8x8x8xf32>
    %cst_43 = arith.constant dense<0.000000e+00> : vector<8x8xf32>
    %78 = vector.multi_reduction <add>, %77, %cst_43 [2] : vector<8x8x8xf32> to vector<8x8xf32>
    %79 = vector.shape_cast %78 : vector<8x8xf32> to vector<8x8x1xf32>
    %80 = vector.broadcast %79 : vector<8x8x1xf32> to vector<8x8x8xf32>
    %81 = arith.divf %77, %80 : vector<8x8x8xf32>
    %82 = arith.truncf %81 : vector<8x8x8xf32> to vector<8x8x8xbf16>
    %83 = vector.extract_strided_slice %82 {offsets = [0, 0, 0], sizes = [1, 8, 8], strides = [1, 1, 1]} : vector<8x8x8xbf16> to vector<1x8x8xbf16>
    %84 = vector.shape_cast %83 : vector<1x8x8xbf16> to vector<8x8xbf16>
    %85 = vector.extract_strided_slice %20 {offsets = [0, 0], sizes = [8, 16], strides = [1, 1]} : vector<8x128xbf16> to vector<8x16xbf16>
    %cst_44 = arith.constant dense<0.000000e+00> : vector<8x16xf32>
    %86 = tpu.matmul %84, %85, %cst_44 {dimension_numbers = #tpu.dot_dimension_numbers<[1], [0], [0], [1], [0, 0, 1, 1], [], []>} : vector<8x8xbf16>, vector<8x16xbf16>, vector<8x16xf32> -> vector<8x16xf32>
    %c0_45 = arith.constant 0 : index
    %c0_46 = arith.constant 0 : index
    %87 = vector.load %arg29[%c0_45, %c0_46] : memref<8x128xf32, #tpu.memory_space<vmem>>, vector<8x16xf32>
    tpu.vector_store %arg29[%c0_45, %c0_46], %86 {strides = array<i32>} : memref<8x128xf32, #tpu.memory_space<vmem>>, vector<8x16xf32>,
    %88 = vector.extract_strided_slice %82 {offsets = [1, 0, 0], sizes = [1, 8, 8], strides = [1, 1, 1]} : vector<8x8x8xbf16> to vector<1x8x8xbf16>
    %89 = vector.shape_cast %88 : vector<1x8x8xbf16> to vector<8x8xbf16>
    %90 = vector.extract_strided_slice %20 {offsets = [0, 16], sizes = [8, 16], strides = [1, 1]} : vector<8x128xbf16> to vector<8x16xbf16>
    %cst_47 = arith.constant dense<0.000000e+00> : vector<8x16xf32>
    %91 = tpu.matmul %89, %90, %cst_47 {dimension_numbers = #tpu.dot_dimension_numbers<[1], [0], [0], [1], [0, 0, 1, 1], [], []>} : vector<8x8xbf16>, vector<8x16xbf16>, vector<8x16xf32> -> vector<8x16xf32>
    %c0_48 = arith.constant 0 : index
    %c16 = arith.constant 16 : index
    %92 = vector.load %arg29[%c0_48, %c16] : memref<8x128xf32, #tpu.memory_space<vmem>>, vector<8x16xf32>
    tpu.vector_store %arg29[%c0_48, %c16], %91 {strides = array<i32>} : memref<8x128xf32, #tpu.memory_space<vmem>>, vector<8x16xf32>,
    %93 = vector.extract_strided_slice %82 {offsets = [2, 0, 0], sizes = [1, 8, 8], strides = [1, 1, 1]} : vector<8x8x8xbf16> to vector<1x8x8xbf16>
    %94 = vector.shape_cast %93 : vector<1x8x8xbf16> to vector<8x8xbf16>
    %95 = vector.extract_strided_slice %20 {offsets = [0, 32], sizes = [8, 16], strides = [1, 1]} : vector<8x128xbf16> to vector<8x16xbf16>
    %cst_49 = arith.constant dense<0.000000e+00> : vector<8x16xf32>
    %96 = tpu.matmul %94, %95, %cst_49 {dimension_numbers = #tpu.dot_dimension_numbers<[1], [0], [0], [1], [0, 0, 1, 1], [], []>} : vector<8x8xbf16>, vector<8x16xbf16>, vector<8x16xf32> -> vector<8x16xf32>
    %c0_50 = arith.constant 0 : index
    %c32 = arith.constant 32 : index
    %97 = vector.load %arg29[%c0_50, %c32] : memref<8x128xf32, #tpu.memory_space<vmem>>, vector<8x16xf32>
    tpu.vector_store %arg29[%c0_50, %c32], %96 {strides = array<i32>} : memref<8x128xf32, #tpu.memory_space<vmem>>, vector<8x16xf32>,
    %98 = vector.extract_strided_slice %82 {offsets = [3, 0, 0], sizes = [1, 8, 8], strides = [1, 1, 1]} : vector<8x8x8xbf16> to vector<1x8x8xbf16>
    %99 = vector.shape_cast %98 : vector<1x8x8xbf16> to vector<8x8xbf16>
    %100 = vector.extract_strided_slice %20 {offsets = [0, 48], sizes = [8, 16], strides = [1, 1]} : vector<8x128xbf16> to vector<8x16xbf16>
    %cst_51 = arith.constant dense<0.000000e+00> : vector<8x16xf32>
    %101 = tpu.matmul %99, %100, %cst_51 {dimension_numbers = #tpu.dot_dimension_numbers<[1], [0], [0], [1], [0, 0, 1, 1], [], []>} : vector<8x8xbf16>, vector<8x16xbf16>, vector<8x16xf32> -> vector<8x16xf32>
    %c0_52 = arith.constant 0 : index
    %c48 = arith.constant 48 : index
    %102 = vector.load %arg29[%c0_52, %c48] : memref<8x128xf32, #tpu.memory_space<vmem>>, vector<8x16xf32>
    tpu.vector_store %arg29[%c0_52, %c48], %101 {strides = array<i32>} : memref<8x128xf32, #tpu.memory_space<vmem>>, vector<8x16xf32>,
    %103 = vector.extract_strided_slice %82 {offsets = [4, 0, 0], sizes = [1, 8, 8], strides = [1, 1, 1]} : vector<8x8x8xbf16> to vector<1x8x8xbf16>
    %104 = vector.shape_cast %103 : vector<1x8x8xbf16> to vector<8x8xbf16>
    %105 = vector.extract_strided_slice %20 {offsets = [0, 64], sizes = [8, 16], strides = [1, 1]} : vector<8x128xbf16> to vector<8x16xbf16>
    %cst_53 = arith.constant dense<0.000000e+00> : vector<8x16xf32>
    %106 = tpu.matmul %104, %105, %cst_53 {dimension_numbers = #tpu.dot_dimension_numbers<[1], [0], [0], [1], [0, 0, 1, 1], [], []>} : vector<8x8xbf16>, vector<8x16xbf16>, vector<8x16xf32> -> vector<8x16xf32>
    %c0_54 = arith.constant 0 : index
    %c64 = arith.constant 64 : index
    %107 = vector.load %arg29[%c0_54, %c64] : memref<8x128xf32, #tpu.memory_space<vmem>>, vector<8x16xf32>
    tpu.vector_store %arg29[%c0_54, %c64], %106 {strides = array<i32>} : memref<8x128xf32, #tpu.memory_space<vmem>>, vector<8x16xf32>,
    %108 = vector.extract_strided_slice %82 {offsets = [5, 0, 0], sizes = [1, 8, 8], strides = [1, 1, 1]} : vector<8x8x8xbf16> to vector<1x8x8xbf16>
    %109 = vector.shape_cast %108 : vector<1x8x8xbf16> to vector<8x8xbf16>
    %110 = vector.extract_strided_slice %20 {offsets = [0, 80], sizes = [8, 16], strides = [1, 1]} : vector<8x128xbf16> to vector<8x16xbf16>
    %cst_55 = arith.constant dense<0.000000e+00> : vector<8x16xf32>
    %111 = tpu.matmul %109, %110, %cst_55 {dimension_numbers = #tpu.dot_dimension_numbers<[1], [0], [0], [1], [0, 0, 1, 1], [], []>} : vector<8x8xbf16>, vector<8x16xbf16>, vector<8x16xf32> -> vector<8x16xf32>
    %c0_56 = arith.constant 0 : index
    %c80 = arith.constant 80 : index
    %112 = vector.load %arg29[%c0_56, %c80] : memref<8x128xf32, #tpu.memory_space<vmem>>, vector<8x16xf32>
    tpu.vector_store %arg29[%c0_56, %c80], %111 {strides = array<i32>} : memref<8x128xf32, #tpu.memory_space<vmem>>, vector<8x16xf32>,
    %113 = vector.extract_strided_slice %82 {offsets = [6, 0, 0], sizes = [1, 8, 8], strides = [1, 1, 1]} : vector<8x8x8xbf16> to vector<1x8x8xbf16>
    %114 = vector.shape_cast %113 : vector<1x8x8xbf16> to vector<8x8xbf16>
    %115 = vector.extract_strided_slice %20 {offsets = [0, 96], sizes = [8, 16], strides = [1, 1]} : vector<8x128xbf16> to vector<8x16xbf16>
    %cst_57 = arith.constant dense<0.000000e+00> : vector<8x16xf32>
    %116 = tpu.matmul %114, %115, %cst_57 {dimension_numbers = #tpu.dot_dimension_numbers<[1], [0], [0], [1], [0, 0, 1, 1], [], []>} : vector<8x8xbf16>, vector<8x16xbf16>, vector<8x16xf32> -> vector<8x16xf32>
    %c0_58 = arith.constant 0 : index
    %c96 = arith.constant 96 : index
    %117 = vector.load %arg29[%c0_58, %c96] : memref<8x128xf32, #tpu.memory_space<vmem>>, vector<8x16xf32>
    tpu.vector_store %arg29[%c0_58, %c96], %116 {strides = array<i32>} : memref<8x128xf32, #tpu.memory_space<vmem>>, vector<8x16xf32>,
    %118 = vector.extract_strided_slice %82 {offsets = [7, 0, 0], sizes = [1, 8, 8], strides = [1, 1, 1]} : vector<8x8x8xbf16> to vector<1x8x8xbf16>
    %119 = vector.shape_cast %118 : vector<1x8x8xbf16> to vector<8x8xbf16>
    %120 = vector.extract_strided_slice %20 {offsets = [0, 112], sizes = [8, 16], strides = [1, 1]} : vector<8x128xbf16> to vector<8x16xbf16>
    %cst_59 = arith.constant dense<0.000000e+00> : vector<8x16xf32>
    %121 = tpu.matmul %119, %120, %cst_59 {dimension_numbers = #tpu.dot_dimension_numbers<[1], [0], [0], [1], [0, 0, 1, 1], [], []>} : vector<8x8xbf16>, vector<8x16xbf16>, vector<8x16xf32> -> vector<8x16xf32>
    %c0_60 = arith.constant 0 : index
    %c112 = arith.constant 112 : index
    %122 = vector.load %arg29[%c0_60, %c112] : memref<8x128xf32, #tpu.memory_space<vmem>>, vector<8x16xf32>
    tpu.vector_store %arg29[%c0_60, %c112], %121 {strides = array<i32>} : memref<8x128xf32, #tpu.memory_space<vmem>>, vector<8x16xf32>,
    %c0_61 = arith.constant 0 : index
    %c0_62 = arith.constant 0 : index
    %123 = vector.load %arg29[%c0_61, %c0_62] : memref<8x128xf32, #tpu.memory_space<vmem>>, vector<8x128xf32>
    %124 = arith.truncf %123 : vector<8x128xf32> to vector<8x128xbf16>
    %c0_63 = arith.constant 0 : index
    %c0_64 = arith.constant 0 : index
    %125 = vector.load %arg8[%c0_63, %c0_64] : memref<128x128xbf16, #tpu.memory_space<vmem>>, vector<128x128xbf16>
    %cst_65 = arith.constant dense<0.000000e+00> : vector<8x128xf32>
    %126 = tpu.matmul %124, %125, %cst_65 {dimension_numbers = #tpu.dot_dimension_numbers<[1], [0], [0], [1], [0, 0, 1, 1], [], []>} : vector<8x128xbf16>, vector<128x128xbf16>, vector<8x128xf32> -> vector<8x128xf32>
    %c0_66 = arith.constant 0 : index
    %c0_67 = arith.constant 0 : index
    %127 = vector.load %arg9[%c0_66, %c0_67] : memref<1x128xf32, #tpu.memory_space<vmem>>, vector<1x128xf32>
    %128 = vector.broadcast %127 : vector<1x128xf32> to vector<8x128xf32>
    %129 = arith.addf %126, %128 : vector<8x128xf32>
    %130 = arith.addf %129, %1 : vector<8x128xf32>
    %c0_68 = arith.constant 0 : index
    %c0_69 = arith.constant 0 : index
    %131 = vector.load %arg10[%c0_68, %c0_69] : memref<1x128xf32, #tpu.memory_space<vmem>>, vector<1x128xf32>
    %c0_70 = arith.constant 0 : index
    %c0_71 = arith.constant 0 : index
    %132 = vector.load %arg11[%c0_70, %c0_71] : memref<1x128xf32, #tpu.memory_space<vmem>>, vector<1x128xf32>
    %cst_72 = arith.constant dense<0.000000e+00> : vector<8xf32>
    %133 = vector.multi_reduction <add>, %130, %cst_72 [1] : vector<8x128xf32> to vector<8xf32>
    %134 = vector.shape_cast %133 : vector<8xf32> to vector<8x1xf32>
    %cst_73 = arith.constant 1.280000e+02 : f32
    %135 = vector.broadcast %cst_73 : f32 to vector<8x1xf32>
    %136 = arith.divf %134, %135 : vector<8x1xf32>
    %137 = vector.broadcast %136 : vector<8x1xf32> to vector<8x128xf32>
    %138 = arith.subf %130, %137 : vector<8x128xf32>
    %139 = arith.mulf %138, %138 : vector<8x128xf32>
    %cst_74 = arith.constant dense<0.000000e+00> : vector<8xf32>
    %140 = vector.multi_reduction <add>, %139, %cst_74 [1] : vector<8x128xf32> to vector<8xf32>
    %141 = vector.shape_cast %140 : vector<8xf32> to vector<8x1xf32>
    %cst_75 = arith.constant 1.280000e+02 : f32
    %142 = vector.broadcast %cst_75 : f32 to vector<8x1xf32>
    %143 = arith.divf %141, %142 : vector<8x1xf32>
    %144 = vector.broadcast %136 : vector<8x1xf32> to vector<8x128xf32>
    %145 = arith.subf %130, %144 : vector<8x128xf32>
    %cst_76 = arith.constant 9.99999974E-6 : f32
    %146 = vector.broadcast %cst_76 : f32 to vector<8x1xf32>
    %147 = arith.addf %143, %146 : vector<8x1xf32>
    %148 = math.rsqrt %147 : vector<8x1xf32>
    %149 = vector.broadcast %148 : vector<8x1xf32> to vector<8x128xf32>
    %150 = arith.mulf %145, %149 : vector<8x128xf32>
    %151 = vector.broadcast %131 : vector<1x128xf32> to vector<8x128xf32>
    %152 = arith.mulf %150, %151 : vector<8x128xf32>
    %153 = vector.broadcast %132 : vector<1x128xf32> to vector<8x128xf32>
    %154 = arith.addf %152, %153 : vector<8x128xf32>
    %c0_77 = arith.constant 0 : index
    %c0_78 = arith.constant 0 : index
    %c0_79 = arith.constant 0 : index
    %155 = vector.load %arg5[%c0_77, %c0_78, %c0_79] : memref<1x1x8xf32, #tpu.memory_space<vmem>>, vector<1x1x8xf32>
    %156 = vector.shape_cast %155 : vector<1x1x8xf32> to vector<1x8xf32>
    %157 = vector.shape_cast %156 : vector<1x8xf32> to vector<1x8xf32>
    %158 = vector.broadcast %157 : vector<1x8xf32> to vector<8x8xf32>
    %159 = arith.truncf %154 : vector<8x128xf32> to vector<8x128xbf16>
    %c0_80 = arith.constant 0 : index
    %c0_81 = arith.constant 0 : index
    %160 = vector.load %arg12[%c0_80, %c0_81] : memref<128x128xbf16, #tpu.memory_space<vmem>>, vector<128x128xbf16>
    %cst_82 = arith.constant dense<0.000000e+00> : vector<8x128xf32>
    %161 = tpu.matmul %159, %160, %cst_82 {dimension_numbers = #tpu.dot_dimension_numbers<[1], [0], [0], [1], [0, 0, 1, 1], [], []>} : vector<8x128xbf16>, vector<128x128xbf16>, vector<8x128xf32> -> vector<8x128xf32>
    %c0_83 = arith.constant 0 : index
    %c0_84 = arith.constant 0 : index
    %162 = vector.load %arg13[%c0_83, %c0_84] : memref<1x128xf32, #tpu.memory_space<vmem>>, vector<1x128xf32>
    %163 = vector.broadcast %162 : vector<1x128xf32> to vector<8x128xf32>
    %164 = arith.addf %161, %163 : vector<8x128xf32>
    %165 = arith.truncf %164 : vector<8x128xf32> to vector<8x128xbf16>
    %166 = arith.truncf %3 : vector<8x128xf32> to vector<8x128xbf16>
    %c0_85 = arith.constant 0 : index
    %c0_86 = arith.constant 0 : index
    %167 = vector.load %arg14[%c0_85, %c0_86] : memref<128x256xbf16, #tpu.memory_space<vmem>>, vector<128x256xbf16>
    %cst_87 = arith.constant dense<0.000000e+00> : vector<8x256xf32>
    %168 = tpu.matmul %166, %167, %cst_87 {dimension_numbers = #tpu.dot_dimension_numbers<[1], [0], [0], [1], [0, 0, 1, 1], [], []>} : vector<8x128xbf16>, vector<128x256xbf16>, vector<8x256xf32> -> vector<8x256xf32>
    %c0_88 = arith.constant 0 : index
    %c0_89 = arith.constant 0 : index
    %169 = vector.load %arg15[%c0_88, %c0_89] : memref<1x256xf32, #tpu.memory_space<vmem>>, vector<1x256xf32>
    %170 = vector.broadcast %169 : vector<1x256xf32> to vector<8x256xf32>
    %171 = arith.addf %168, %170 : vector<8x256xf32>
    %172 = vector.extract_strided_slice %171 {offsets = [0, 0], sizes = [8, 128], strides = [1, 1]} : vector<8x256xf32> to vector<8x128xf32>
    %173 = arith.truncf %172 : vector<8x128xf32> to vector<8x128xbf16>
    %174 = vector.extract_strided_slice %171 {offsets = [0, 128], sizes = [8, 128], strides = [1, 1]} : vector<8x256xf32> to vector<8x128xf32>
    %175 = arith.truncf %174 : vector<8x128xf32> to vector<8x128xbf16>
    %176 = vector.extract_strided_slice %165 {offsets = [0, 0], sizes = [8, 16], strides = [1, 1]} : vector<8x128xbf16> to vector<8x16xbf16>
    %177 = vector.extract_strided_slice %173 {offsets = [0, 0], sizes = [8, 16], strides = [1, 1]} : vector<8x128xbf16> to vector<8x16xbf16>
    %cst_90 = arith.constant dense<0.000000e+00> : vector<8x8xf32>
    %178 = tpu.matmul %176, %177, %cst_90 {dimension_numbers = #tpu.dot_dimension_numbers<[1], [1], [0], [0], [0, 0, 1, 0], [], []>} : vector<8x16xbf16>, vector<8x16xbf16>, vector<8x8xf32> -> vector<8x8xf32>
    %c0_91 = arith.constant 0 : index
    %c0_92 = arith.constant 0 : index
    %c0_93 = arith.constant 0 : index
    %179 = vector.load %arg28[%c0_91, %c0_92, %c0_93] : memref<8x8x8xf32, #tpu.memory_space<vmem>>, vector<1x8x8xf32>
    %180 = vector.shape_cast %179 : vector<1x8x8xf32> to vector<8x8xf32>
    %181 = vector.shape_cast %178 : vector<8x8xf32> to vector<1x8x8xf32>
    tpu.vector_store %arg28[%c0_91, %c0_92, %c0_93], %181 {strides = array<i32>} : memref<8x8x8xf32, #tpu.memory_space<vmem>>, vector<1x8x8xf32>,
    %182 = vector.extract_strided_slice %165 {offsets = [0, 16], sizes = [8, 16], strides = [1, 1]} : vector<8x128xbf16> to vector<8x16xbf16>
    %183 = vector.extract_strided_slice %173 {offsets = [0, 16], sizes = [8, 16], strides = [1, 1]} : vector<8x128xbf16> to vector<8x16xbf16>
    %cst_94 = arith.constant dense<0.000000e+00> : vector<8x8xf32>
    %184 = tpu.matmul %182, %183, %cst_94 {dimension_numbers = #tpu.dot_dimension_numbers<[1], [1], [0], [0], [0, 0, 1, 0], [], []>} : vector<8x16xbf16>, vector<8x16xbf16>, vector<8x8xf32> -> vector<8x8xf32>
    %c1_95 = arith.constant 1 : index
    %c0_96 = arith.constant 0 : index
    %c0_97 = arith.constant 0 : index
    %185 = vector.load %arg28[%c1_95, %c0_96, %c0_97] : memref<8x8x8xf32, #tpu.memory_space<vmem>>, vector<1x8x8xf32>
    %186 = vector.shape_cast %185 : vector<1x8x8xf32> to vector<8x8xf32>
    %187 = vector.shape_cast %184 : vector<8x8xf32> to vector<1x8x8xf32>
    tpu.vector_store %arg28[%c1_95, %c0_96, %c0_97], %187 {strides = array<i32>} : memref<8x8x8xf32, #tpu.memory_space<vmem>>, vector<1x8x8xf32>,
    %188 = vector.extract_strided_slice %165 {offsets = [0, 32], sizes = [8, 16], strides = [1, 1]} : vector<8x128xbf16> to vector<8x16xbf16>
    %189 = vector.extract_strided_slice %173 {offsets = [0, 32], sizes = [8, 16], strides = [1, 1]} : vector<8x128xbf16> to vector<8x16xbf16>
    %cst_98 = arith.constant dense<0.000000e+00> : vector<8x8xf32>
    %190 = tpu.matmul %188, %189, %cst_98 {dimension_numbers = #tpu.dot_dimension_numbers<[1], [1], [0], [0], [0, 0, 1, 0], [], []>} : vector<8x16xbf16>, vector<8x16xbf16>, vector<8x8xf32> -> vector<8x8xf32>
    %c2_99 = arith.constant 2 : index
    %c0_100 = arith.constant 0 : index
    %c0_101 = arith.constant 0 : index
    %191 = vector.load %arg28[%c2_99, %c0_100, %c0_101] : memref<8x8x8xf32, #tpu.memory_space<vmem>>, vector<1x8x8xf32>
    %192 = vector.shape_cast %191 : vector<1x8x8xf32> to vector<8x8xf32>
    %193 = vector.shape_cast %190 : vector<8x8xf32> to vector<1x8x8xf32>
    tpu.vector_store %arg28[%c2_99, %c0_100, %c0_101], %193 {strides = array<i32>} : memref<8x8x8xf32, #tpu.memory_space<vmem>>, vector<1x8x8xf32>,
    %194 = vector.extract_strided_slice %165 {offsets = [0, 48], sizes = [8, 16], strides = [1, 1]} : vector<8x128xbf16> to vector<8x16xbf16>
    %195 = vector.extract_strided_slice %173 {offsets = [0, 48], sizes = [8, 16], strides = [1, 1]} : vector<8x128xbf16> to vector<8x16xbf16>
    %cst_102 = arith.constant dense<0.000000e+00> : vector<8x8xf32>
    %196 = tpu.matmul %194, %195, %cst_102 {dimension_numbers = #tpu.dot_dimension_numbers<[1], [1], [0], [0], [0, 0, 1, 0], [], []>} : vector<8x16xbf16>, vector<8x16xbf16>, vector<8x8xf32> -> vector<8x8xf32>
    %c3_103 = arith.constant 3 : index
    %c0_104 = arith.constant 0 : index
    %c0_105 = arith.constant 0 : index
    %197 = vector.load %arg28[%c3_103, %c0_104, %c0_105] : memref<8x8x8xf32, #tpu.memory_space<vmem>>, vector<1x8x8xf32>
    %198 = vector.shape_cast %197 : vector<1x8x8xf32> to vector<8x8xf32>
    %199 = vector.shape_cast %196 : vector<8x8xf32> to vector<1x8x8xf32>
    tpu.vector_store %arg28[%c3_103, %c0_104, %c0_105], %199 {strides = array<i32>} : memref<8x8x8xf32, #tpu.memory_space<vmem>>, vector<1x8x8xf32>,
    %200 = vector.extract_strided_slice %165 {offsets = [0, 64], sizes = [8, 16], strides = [1, 1]} : vector<8x128xbf16> to vector<8x16xbf16>
    %201 = vector.extract_strided_slice %173 {offsets = [0, 64], sizes = [8, 16], strides = [1, 1]} : vector<8x128xbf16> to vector<8x16xbf16>
    %cst_106 = arith.constant dense<0.000000e+00> : vector<8x8xf32>
    %202 = tpu.matmul %200, %201, %cst_106 {dimension_numbers = #tpu.dot_dimension_numbers<[1], [1], [0], [0], [0, 0, 1, 0], [], []>} : vector<8x16xbf16>, vector<8x16xbf16>, vector<8x8xf32> -> vector<8x8xf32>
    %c4_107 = arith.constant 4 : index
    %c0_108 = arith.constant 0 : index
    %c0_109 = arith.constant 0 : index
    %203 = vector.load %arg28[%c4_107, %c0_108, %c0_109] : memref<8x8x8xf32, #tpu.memory_space<vmem>>, vector<1x8x8xf32>
    %204 = vector.shape_cast %203 : vector<1x8x8xf32> to vector<8x8xf32>
    %205 = vector.shape_cast %202 : vector<8x8xf32> to vector<1x8x8xf32>
    tpu.vector_store %arg28[%c4_107, %c0_108, %c0_109], %205 {strides = array<i32>} : memref<8x8x8xf32, #tpu.memory_space<vmem>>, vector<1x8x8xf32>,
    %206 = vector.extract_strided_slice %165 {offsets = [0, 80], sizes = [8, 16], strides = [1, 1]} : vector<8x128xbf16> to vector<8x16xbf16>
    %207 = vector.extract_strided_slice %173 {offsets = [0, 80], sizes = [8, 16], strides = [1, 1]} : vector<8x128xbf16> to vector<8x16xbf16>
    %cst_110 = arith.constant dense<0.000000e+00> : vector<8x8xf32>
    %208 = tpu.matmul %206, %207, %cst_110 {dimension_numbers = #tpu.dot_dimension_numbers<[1], [1], [0], [0], [0, 0, 1, 0], [], []>} : vector<8x16xbf16>, vector<8x16xbf16>, vector<8x8xf32> -> vector<8x8xf32>
    %c5_111 = arith.constant 5 : index
    %c0_112 = arith.constant 0 : index
    %c0_113 = arith.constant 0 : index
    %209 = vector.load %arg28[%c5_111, %c0_112, %c0_113] : memref<8x8x8xf32, #tpu.memory_space<vmem>>, vector<1x8x8xf32>
    %210 = vector.shape_cast %209 : vector<1x8x8xf32> to vector<8x8xf32>
    %211 = vector.shape_cast %208 : vector<8x8xf32> to vector<1x8x8xf32>
    tpu.vector_store %arg28[%c5_111, %c0_112, %c0_113], %211 {strides = array<i32>} : memref<8x8x8xf32, #tpu.memory_space<vmem>>, vector<1x8x8xf32>,
    %212 = vector.extract_strided_slice %165 {offsets = [0, 96], sizes = [8, 16], strides = [1, 1]} : vector<8x128xbf16> to vector<8x16xbf16>
    %213 = vector.extract_strided_slice %173 {offsets = [0, 96], sizes = [8, 16], strides = [1, 1]} : vector<8x128xbf16> to vector<8x16xbf16>
    %cst_114 = arith.constant dense<0.000000e+00> : vector<8x8xf32>
    %214 = tpu.matmul %212, %213, %cst_114 {dimension_numbers = #tpu.dot_dimension_numbers<[1], [1], [0], [0], [0, 0, 1, 0], [], []>} : vector<8x16xbf16>, vector<8x16xbf16>, vector<8x8xf32> -> vector<8x8xf32>
    %c6_115 = arith.constant 6 : index
    %c0_116 = arith.constant 0 : index
    %c0_117 = arith.constant 0 : index
    %215 = vector.load %arg28[%c6_115, %c0_116, %c0_117] : memref<8x8x8xf32, #tpu.memory_space<vmem>>, vector<1x8x8xf32>
    %216 = vector.shape_cast %215 : vector<1x8x8xf32> to vector<8x8xf32>
    %217 = vector.shape_cast %214 : vector<8x8xf32> to vector<1x8x8xf32>
    tpu.vector_store %arg28[%c6_115, %c0_116, %c0_117], %217 {strides = array<i32>} : memref<8x8x8xf32, #tpu.memory_space<vmem>>, vector<1x8x8xf32>,
    %218 = vector.extract_strided_slice %165 {offsets = [0, 112], sizes = [8, 16], strides = [1, 1]} : vector<8x128xbf16> to vector<8x16xbf16>
    %219 = vector.extract_strided_slice %173 {offsets = [0, 112], sizes = [8, 16], strides = [1, 1]} : vector<8x128xbf16> to vector<8x16xbf16>
    %cst_118 = arith.constant dense<0.000000e+00> : vector<8x8xf32>
    %220 = tpu.matmul %218, %219, %cst_118 {dimension_numbers = #tpu.dot_dimension_numbers<[1], [1], [0], [0], [0, 0, 1, 0], [], []>} : vector<8x16xbf16>, vector<8x16xbf16>, vector<8x8xf32> -> vector<8x8xf32>
    %c7_119 = arith.constant 7 : index
    %c0_120 = arith.constant 0 : index
    %c0_121 = arith.constant 0 : index
    %221 = vector.load %arg28[%c7_119, %c0_120, %c0_121] : memref<8x8x8xf32, #tpu.memory_space<vmem>>, vector<1x8x8xf32>
    %222 = vector.shape_cast %221 : vector<1x8x8xf32> to vector<8x8xf32>
    %223 = vector.shape_cast %220 : vector<8x8xf32> to vector<1x8x8xf32>
    tpu.vector_store %arg28[%c7_119, %c0_120, %c0_121], %223 {strides = array<i32>} : memref<8x8x8xf32, #tpu.memory_space<vmem>>, vector<1x8x8xf32>,
    %c0_122 = arith.constant 0 : index
    %c0_123 = arith.constant 0 : index
    %c0_124 = arith.constant 0 : index
    %224 = vector.load %arg28[%c0_122, %c0_123, %c0_124] : memref<8x8x8xf32, #tpu.memory_space<vmem>>, vector<8x8x8xf32>
    %225 = vector.shape_cast %158 : vector<8x8xf32> to vector<1x8x8xf32>
    %226 = vector.broadcast %225 : vector<1x8x8xf32> to vector<8x8x8xf32>
    %227 = arith.addf %224, %226 : vector<8x8x8xf32>
    %cst_125 = arith.constant dense<0xFF800000> : vector<8x8xf32>
    %228 = vector.multi_reduction <maximumf>, %227, %cst_125 [2] : vector<8x8x8xf32> to vector<8x8xf32>
    %229 = vector.shape_cast %228 : vector<8x8xf32> to vector<8x8x1xf32>
    %230 = vector.broadcast %229 : vector<8x8x1xf32> to vector<8x8x8xf32>
    %231 = arith.subf %227, %230 : vector<8x8x8xf32>
    %232 = math.exp %231 : vector<8x8x8xf32>
    %cst_126 = arith.constant dense<0.000000e+00> : vector<8x8xf32>
    %233 = vector.multi_reduction <add>, %232, %cst_126 [2] : vector<8x8x8xf32> to vector<8x8xf32>
    %234 = vector.shape_cast %233 : vector<8x8xf32> to vector<8x8x1xf32>
    %235 = vector.broadcast %234 : vector<8x8x1xf32> to vector<8x8x8xf32>
    %236 = arith.divf %232, %235 : vector<8x8x8xf32>
    %237 = arith.truncf %236 : vector<8x8x8xf32> to vector<8x8x8xbf16>
    %238 = vector.extract_strided_slice %237 {offsets = [0, 0, 0], sizes = [1, 8, 8], strides = [1, 1, 1]} : vector<8x8x8xbf16> to vector<1x8x8xbf16>
    %239 = vector.shape_cast %238 : vector<1x8x8xbf16> to vector<8x8xbf16>
    %240 = vector.extract_strided_slice %175 {offsets = [0, 0], sizes = [8, 16], strides = [1, 1]} : vector<8x128xbf16> to vector<8x16xbf16>
    %cst_127 = arith.constant dense<0.000000e+00> : vector<8x16xf32>
    %241 = tpu.matmul %239, %240, %cst_127 {dimension_numbers = #tpu.dot_dimension_numbers<[1], [0], [0], [1], [0, 0, 1, 1], [], []>} : vector<8x8xbf16>, vector<8x16xbf16>, vector<8x16xf32> -> vector<8x16xf32>
    %c0_128 = arith.constant 0 : index
    %c0_129 = arith.constant 0 : index
    %242 = vector.load %arg29[%c0_128, %c0_129] : memref<8x128xf32, #tpu.memory_space<vmem>>, vector<8x16xf32>
    tpu.vector_store %arg29[%c0_128, %c0_129], %241 {strides = array<i32>} : memref<8x128xf32, #tpu.memory_space<vmem>>, vector<8x16xf32>,
    %243 = vector.extract_strided_slice %237 {offsets = [1, 0, 0], sizes = [1, 8, 8], strides = [1, 1, 1]} : vector<8x8x8xbf16> to vector<1x8x8xbf16>
    %244 = vector.shape_cast %243 : vector<1x8x8xbf16> to vector<8x8xbf16>
    %245 = vector.extract_strided_slice %175 {offsets = [0, 16], sizes = [8, 16], strides = [1, 1]} : vector<8x128xbf16> to vector<8x16xbf16>
    %cst_130 = arith.constant dense<0.000000e+00> : vector<8x16xf32>
    %246 = tpu.matmul %244, %245, %cst_130 {dimension_numbers = #tpu.dot_dimension_numbers<[1], [0], [0], [1], [0, 0, 1, 1], [], []>} : vector<8x8xbf16>, vector<8x16xbf16>, vector<8x16xf32> -> vector<8x16xf32>
    %c0_131 = arith.constant 0 : index
    %c16_132 = arith.constant 16 : index
    %247 = vector.load %arg29[%c0_131, %c16_132] : memref<8x128xf32, #tpu.memory_space<vmem>>, vector<8x16xf32>
    tpu.vector_store %arg29[%c0_131, %c16_132], %246 {strides = array<i32>} : memref<8x128xf32, #tpu.memory_space<vmem>>, vector<8x16xf32>,
    %248 = vector.extract_strided_slice %237 {offsets = [2, 0, 0], sizes = [1, 8, 8], strides = [1, 1, 1]} : vector<8x8x8xbf16> to vector<1x8x8xbf16>
    %249 = vector.shape_cast %248 : vector<1x8x8xbf16> to vector<8x8xbf16>
    %250 = vector.extract_strided_slice %175 {offsets = [0, 32], sizes = [8, 16], strides = [1, 1]} : vector<8x128xbf16> to vector<8x16xbf16>
    %cst_133 = arith.constant dense<0.000000e+00> : vector<8x16xf32>
    %251 = tpu.matmul %249, %250, %cst_133 {dimension_numbers = #tpu.dot_dimension_numbers<[1], [0], [0], [1], [0, 0, 1, 1], [], []>} : vector<8x8xbf16>, vector<8x16xbf16>, vector<8x16xf32> -> vector<8x16xf32>
    %c0_134 = arith.constant 0 : index
    %c32_135 = arith.constant 32 : index
    %252 = vector.load %arg29[%c0_134, %c32_135] : memref<8x128xf32, #tpu.memory_space<vmem>>, vector<8x16xf32>
    tpu.vector_store %arg29[%c0_134, %c32_135], %251 {strides = array<i32>} : memref<8x128xf32, #tpu.memory_space<vmem>>, vector<8x16xf32>,
    %253 = vector.extract_strided_slice %237 {offsets = [3, 0, 0], sizes = [1, 8, 8], strides = [1, 1, 1]} : vector<8x8x8xbf16> to vector<1x8x8xbf16>
    %254 = vector.shape_cast %253 : vector<1x8x8xbf16> to vector<8x8xbf16>
    %255 = vector.extract_strided_slice %175 {offsets = [0, 48], sizes = [8, 16], strides = [1, 1]} : vector<8x128xbf16> to vector<8x16xbf16>
    %cst_136 = arith.constant dense<0.000000e+00> : vector<8x16xf32>
    %256 = tpu.matmul %254, %255, %cst_136 {dimension_numbers = #tpu.dot_dimension_numbers<[1], [0], [0], [1], [0, 0, 1, 1], [], []>} : vector<8x8xbf16>, vector<8x16xbf16>, vector<8x16xf32> -> vector<8x16xf32>
    %c0_137 = arith.constant 0 : index
    %c48_138 = arith.constant 48 : index
    %257 = vector.load %arg29[%c0_137, %c48_138] : memref<8x128xf32, #tpu.memory_space<vmem>>, vector<8x16xf32>
    tpu.vector_store %arg29[%c0_137, %c48_138], %256 {strides = array<i32>} : memref<8x128xf32, #tpu.memory_space<vmem>>, vector<8x16xf32>,
    %258 = vector.extract_strided_slice %237 {offsets = [4, 0, 0], sizes = [1, 8, 8], strides = [1, 1, 1]} : vector<8x8x8xbf16> to vector<1x8x8xbf16>
    %259 = vector.shape_cast %258 : vector<1x8x8xbf16> to vector<8x8xbf16>
    %260 = vector.extract_strided_slice %175 {offsets = [0, 64], sizes = [8, 16], strides = [1, 1]} : vector<8x128xbf16> to vector<8x16xbf16>
    %cst_139 = arith.constant dense<0.000000e+00> : vector<8x16xf32>
    %261 = tpu.matmul %259, %260, %cst_139 {dimension_numbers = #tpu.dot_dimension_numbers<[1], [0], [0], [1], [0, 0, 1, 1], [], []>} : vector<8x8xbf16>, vector<8x16xbf16>, vector<8x16xf32> -> vector<8x16xf32>
    %c0_140 = arith.constant 0 : index
    %c64_141 = arith.constant 64 : index
    %262 = vector.load %arg29[%c0_140, %c64_141] : memref<8x128xf32, #tpu.memory_space<vmem>>, vector<8x16xf32>
    tpu.vector_store %arg29[%c0_140, %c64_141], %261 {strides = array<i32>} : memref<8x128xf32, #tpu.memory_space<vmem>>, vector<8x16xf32>,
    %263 = vector.extract_strided_slice %237 {offsets = [5, 0, 0], sizes = [1, 8, 8], strides = [1, 1, 1]} : vector<8x8x8xbf16> to vector<1x8x8xbf16>
    %264 = vector.shape_cast %263 : vector<1x8x8xbf16> to vector<8x8xbf16>
    %265 = vector.extract_strided_slice %175 {offsets = [0, 80], sizes = [8, 16], strides = [1, 1]} : vector<8x128xbf16> to vector<8x16xbf16>
    %cst_142 = arith.constant dense<0.000000e+00> : vector<8x16xf32>
    %266 = tpu.matmul %264, %265, %cst_142 {dimension_numbers = #tpu.dot_dimension_numbers<[1], [0], [0], [1], [0, 0, 1, 1], [], []>} : vector<8x8xbf16>, vector<8x16xbf16>, vector<8x16xf32> -> vector<8x16xf32>
    %c0_143 = arith.constant 0 : index
    %c80_144 = arith.constant 80 : index
    %267 = vector.load %arg29[%c0_143, %c80_144] : memref<8x128xf32, #tpu.memory_space<vmem>>, vector<8x16xf32>
    tpu.vector_store %arg29[%c0_143, %c80_144], %266 {strides = array<i32>} : memref<8x128xf32, #tpu.memory_space<vmem>>, vector<8x16xf32>,
    %268 = vector.extract_strided_slice %237 {offsets = [6, 0, 0], sizes = [1, 8, 8], strides = [1, 1, 1]} : vector<8x8x8xbf16> to vector<1x8x8xbf16>
    %269 = vector.shape_cast %268 : vector<1x8x8xbf16> to vector<8x8xbf16>
    %270 = vector.extract_strided_slice %175 {offsets = [0, 96], sizes = [8, 16], strides = [1, 1]} : vector<8x128xbf16> to vector<8x16xbf16>
    %cst_145 = arith.constant dense<0.000000e+00> : vector<8x16xf32>
    %271 = tpu.matmul %269, %270, %cst_145 {dimension_numbers = #tpu.dot_dimension_numbers<[1], [0], [0], [1], [0, 0, 1, 1], [], []>} : vector<8x8xbf16>, vector<8x16xbf16>, vector<8x16xf32> -> vector<8x16xf32>
    %c0_146 = arith.constant 0 : index
    %c96_147 = arith.constant 96 : index
    %272 = vector.load %arg29[%c0_146, %c96_147] : memref<8x128xf32, #tpu.memory_space<vmem>>, vector<8x16xf32>
    tpu.vector_store %arg29[%c0_146, %c96_147], %271 {strides = array<i32>} : memref<8x128xf32, #tpu.memory_space<vmem>>, vector<8x16xf32>,
    %273 = vector.extract_strided_slice %237 {offsets = [7, 0, 0], sizes = [1, 8, 8], strides = [1, 1, 1]} : vector<8x8x8xbf16> to vector<1x8x8xbf16>
    %274 = vector.shape_cast %273 : vector<1x8x8xbf16> to vector<8x8xbf16>
    %275 = vector.extract_strided_slice %175 {offsets = [0, 112], sizes = [8, 16], strides = [1, 1]} : vector<8x128xbf16> to vector<8x16xbf16>
    %cst_148 = arith.constant dense<0.000000e+00> : vector<8x16xf32>
    %276 = tpu.matmul %274, %275, %cst_148 {dimension_numbers = #tpu.dot_dimension_numbers<[1], [0], [0], [1], [0, 0, 1, 1], [], []>} : vector<8x8xbf16>, vector<8x16xbf16>, vector<8x16xf32> -> vector<8x16xf32>
    %c0_149 = arith.constant 0 : index
    %c112_150 = arith.constant 112 : index
    %277 = vector.load %arg29[%c0_149, %c112_150] : memref<8x128xf32, #tpu.memory_space<vmem>>, vector<8x16xf32>
    tpu.vector_store %arg29[%c0_149, %c112_150], %276 {strides = array<i32>} : memref<8x128xf32, #tpu.memory_space<vmem>>, vector<8x16xf32>,
    %c0_151 = arith.constant 0 : index
    %c0_152 = arith.constant 0 : index
    %278 = vector.load %arg29[%c0_151, %c0_152] : memref<8x128xf32, #tpu.memory_space<vmem>>, vector<8x128xf32>
    %279 = arith.truncf %278 : vector<8x128xf32> to vector<8x128xbf16>
    %c0_153 = arith.constant 0 : index
    %c0_154 = arith.constant 0 : index
    %280 = vector.load %arg16[%c0_153, %c0_154] : memref<128x128xbf16, #tpu.memory_space<vmem>>, vector<128x128xbf16>
    %cst_155 = arith.constant dense<0.000000e+00> : vector<8x128xf32>
    %281 = tpu.matmul %279, %280, %cst_155 {dimension_numbers = #tpu.dot_dimension_numbers<[1], [0], [0], [1], [0, 0, 1, 1], [], []>} : vector<8x128xbf16>, vector<128x128xbf16>, vector<8x128xf32> -> vector<8x128xf32>
    %c0_156 = arith.constant 0 : index
    %c0_157 = arith.constant 0 : index
    %282 = vector.load %arg17[%c0_156, %c0_157] : memref<1x128xf32, #tpu.memory_space<vmem>>, vector<1x128xf32>
    %283 = vector.broadcast %282 : vector<1x128xf32> to vector<8x128xf32>
    %284 = arith.addf %281, %283 : vector<8x128xf32>
    %285 = arith.addf %284, %154 : vector<8x128xf32>
    %c0_158 = arith.constant 0 : index
    %c0_159 = arith.constant 0 : index
    %286 = vector.load %arg18[%c0_158, %c0_159] : memref<1x128xf32, #tpu.memory_space<vmem>>, vector<1x128xf32>
    %c0_160 = arith.constant 0 : index
    %c0_161 = arith.constant 0 : index
    %287 = vector.load %arg19[%c0_160, %c0_161] : memref<1x128xf32, #tpu.memory_space<vmem>>, vector<1x128xf32>
    %cst_162 = arith.constant dense<0.000000e+00> : vector<8xf32>
    %288 = vector.multi_reduction <add>, %285, %cst_162 [1] : vector<8x128xf32> to vector<8xf32>
    %289 = vector.shape_cast %288 : vector<8xf32> to vector<8x1xf32>
    %cst_163 = arith.constant 1.280000e+02 : f32
    %290 = vector.broadcast %cst_163 : f32 to vector<8x1xf32>
    %291 = arith.divf %289, %290 : vector<8x1xf32>
    %292 = vector.broadcast %291 : vector<8x1xf32> to vector<8x128xf32>
    %293 = arith.subf %285, %292 : vector<8x128xf32>
    %294 = arith.mulf %293, %293 : vector<8x128xf32>
    %cst_164 = arith.constant dense<0.000000e+00> : vector<8xf32>
    %295 = vector.multi_reduction <add>, %294, %cst_164 [1] : vector<8x128xf32> to vector<8xf32>
    %296 = vector.shape_cast %295 : vector<8xf32> to vector<8x1xf32>
    %cst_165 = arith.constant 1.280000e+02 : f32
    %297 = vector.broadcast %cst_165 : f32 to vector<8x1xf32>
    %298 = arith.divf %296, %297 : vector<8x1xf32>
    %299 = vector.broadcast %291 : vector<8x1xf32> to vector<8x128xf32>
    %300 = arith.subf %285, %299 : vector<8x128xf32>
    %cst_166 = arith.constant 9.99999974E-6 : f32
    %301 = vector.broadcast %cst_166 : f32 to vector<8x1xf32>
    %302 = arith.addf %298, %301 : vector<8x1xf32>
    %303 = math.rsqrt %302 : vector<8x1xf32>
    %304 = vector.broadcast %303 : vector<8x1xf32> to vector<8x128xf32>
    %305 = arith.mulf %300, %304 : vector<8x128xf32>
    %306 = vector.broadcast %286 : vector<1x128xf32> to vector<8x128xf32>
    %307 = arith.mulf %305, %306 : vector<8x128xf32>
    %308 = vector.broadcast %287 : vector<1x128xf32> to vector<8x128xf32>
    %309 = arith.addf %307, %308 : vector<8x128xf32>
    %310 = arith.truncf %309 : vector<8x128xf32> to vector<8x128xbf16>
    %c0_167 = arith.constant 0 : index
    %c0_168 = arith.constant 0 : index
    %311 = vector.load %arg20[%c0_167, %c0_168] : memref<128x256xbf16, #tpu.memory_space<vmem>>, vector<128x256xbf16>
    %cst_169 = arith.constant dense<0.000000e+00> : vector<8x256xf32>
    %312 = tpu.matmul %310, %311, %cst_169 {dimension_numbers = #tpu.dot_dimension_numbers<[1], [0], [0], [1], [0, 0, 1, 1], [], []>} : vector<8x128xbf16>, vector<128x256xbf16>, vector<8x256xf32> -> vector<8x256xf32>
    %c0_170 = arith.constant 0 : index
    %c0_171 = arith.constant 0 : index
    %313 = vector.load %arg21[%c0_170, %c0_171] : memref<1x256xf32, #tpu.memory_space<vmem>>, vector<1x256xf32>
    %314 = vector.broadcast %313 : vector<1x256xf32> to vector<8x256xf32>
    %315 = arith.addf %312, %314 : vector<8x256xf32>
    %cst_172 = arith.constant 0.000000e+00 : f32
    %316 = vector.broadcast %cst_172 : f32 to vector<8x256xf32>
    %317 = arith.maximumf %315, %316 : vector<8x256xf32>
    %318 = arith.truncf %317 : vector<8x256xf32> to vector<8x256xbf16>
    %c0_173 = arith.constant 0 : index
    %c0_174 = arith.constant 0 : index
    %319 = vector.load %arg22[%c0_173, %c0_174] : memref<256x128xbf16, #tpu.memory_space<vmem>>, vector<256x128xbf16>
    %cst_175 = arith.constant dense<0.000000e+00> : vector<8x128xf32>
    %320 = tpu.matmul %318, %319, %cst_175 {dimension_numbers = #tpu.dot_dimension_numbers<[1], [0], [0], [1], [0, 0, 1, 1], [], []>} : vector<8x256xbf16>, vector<256x128xbf16>, vector<8x128xf32> -> vector<8x128xf32>
    %c0_176 = arith.constant 0 : index
    %c0_177 = arith.constant 0 : index
    %321 = vector.load %arg23[%c0_176, %c0_177] : memref<1x128xf32, #tpu.memory_space<vmem>>, vector<1x128xf32>
    %322 = vector.broadcast %321 : vector<1x128xf32> to vector<8x128xf32>
    %323 = arith.addf %320, %322 : vector<8x128xf32>
    %324 = arith.addf %323, %309 : vector<8x128xf32>
    %c0_178 = arith.constant 0 : index
    %c0_179 = arith.constant 0 : index
    %325 = vector.load %arg24[%c0_178, %c0_179] : memref<1x128xf32, #tpu.memory_space<vmem>>, vector<1x128xf32>
    %c0_180 = arith.constant 0 : index
    %c0_181 = arith.constant 0 : index
    %326 = vector.load %arg25[%c0_180, %c0_181] : memref<1x128xf32, #tpu.memory_space<vmem>>, vector<1x128xf32>
    %cst_182 = arith.constant dense<0.000000e+00> : vector<8xf32>
    %327 = vector.multi_reduction <add>, %324, %cst_182 [1] : vector<8x128xf32> to vector<8xf32>
    %328 = vector.shape_cast %327 : vector<8xf32> to vector<8x1xf32>
    %cst_183 = arith.constant 1.280000e+02 : f32
    %329 = vector.broadcast %cst_183 : f32 to vector<8x1xf32>
    %330 = arith.divf %328, %329 : vector<8x1xf32>
    %331 = vector.broadcast %330 : vector<8x1xf32> to vector<8x128xf32>
    %332 = arith.subf %324, %331 : vector<8x128xf32>
    %333 = arith.mulf %332, %332 : vector<8x128xf32>
    %cst_184 = arith.constant dense<0.000000e+00> : vector<8xf32>
    %334 = vector.multi_reduction <add>, %333, %cst_184 [1] : vector<8x128xf32> to vector<8xf32>
    %335 = vector.shape_cast %334 : vector<8xf32> to vector<8x1xf32>
    %cst_185 = arith.constant 1.280000e+02 : f32
    %336 = vector.broadcast %cst_185 : f32 to vector<8x1xf32>
    %337 = arith.divf %335, %336 : vector<8x1xf32>
    %338 = vector.broadcast %330 : vector<8x1xf32> to vector<8x128xf32>
    %339 = arith.subf %324, %338 : vector<8x128xf32>
    %cst_186 = arith.constant 9.99999974E-6 : f32
    %340 = vector.broadcast %cst_186 : f32 to vector<8x1xf32>
    %341 = arith.addf %337, %340 : vector<8x1xf32>
    %342 = math.rsqrt %341 : vector<8x1xf32>
    %343 = vector.broadcast %342 : vector<8x1xf32> to vector<8x128xf32>
    %344 = arith.mulf %339, %343 : vector<8x128xf32>
    %345 = vector.broadcast %325 : vector<1x128xf32> to vector<8x128xf32>
    %346 = arith.mulf %344, %345 : vector<8x128xf32>
    %347 = vector.broadcast %326 : vector<1x128xf32> to vector<8x128xf32>
    %348 = arith.addf %346, %347 : vector<8x128xf32>
    %c0_187 = arith.constant 0 : index
    %c0_188 = arith.constant 0 : index
    %c0_189 = arith.constant 0 : index
    %349 = vector.load %arg26[%c0_187, %c0_188, %c0_189] : memref<1x8x128xf32, #tpu.memory_space<vmem>>, vector<1x8x128xf32>
    %350 = vector.shape_cast %349 : vector<1x8x128xf32> to vector<8x128xf32>
    %351 = vector.shape_cast %348 : vector<8x128xf32> to vector<1x8x128xf32>
    tpu.vector_store %arg26[%c0_187, %c0_188, %c0_189], %351 {strides = array<i32>} : memref<1x8x128xf32, #tpu.memory_space<vmem>>, vector<1x8x128xf32>,
    return
  }
  func.func @transform_0(%arg0: i32) -> (i32, i32, i32) {
    %c0_i32 = arith.constant 0 : i32
    %c0_i32_0 = arith.constant 0 : i32
    %c0_i32_1 = arith.constant 0 : i32
    return %arg0, %c0_i32, %c0_i32_0 : i32, i32, i32
  }
  func.func @transform_1(%arg0: i32) -> (i32, i32, i32) {
    %c0_i32 = arith.constant 0 : i32
    %c0_i32_0 = arith.constant 0 : i32
    %c0_i32_1 = arith.constant 0 : i32
    return %arg0, %c0_i32, %c0_i32_0 : i32, i32, i32
  }
  func.func @transform_2(%arg0: i32) -> (i32, i32) {
    %c0_i32 = arith.constant 0 : i32
    %c0_i32_0 = arith.constant 0 : i32
    %c0_i32_1 = arith.constant 0 : i32
    return %c0_i32, %c0_i32_0 : i32, i32
  }
  func.func @transform_3(%arg0: i32) -> (i32, i32, i32) {
    %c0_i32 = arith.constant 0 : i32
    %c0_i32_0 = arith.constant 0 : i32
    %c0_i32_1 = arith.constant 0 : i32
    return %arg0, %c0_i32, %c0_i32_0 : i32, i32, i32
  }
  func.func @transform_4(%arg0: i32) -> (i32, i32, i32) {
    %c0_i32 = arith.constant 0 : i32
    %c0_i32_0 = arith.constant 0 : i32
    %c0_i32_1 = arith.constant 0 : i32
    return %arg0, %c0_i32, %c0_i32_0 : i32, i32, i32
  }
  func.func @transform_5(%arg0: i32) -> (i32, i32) {
    %c0_i32 = arith.constant 0 : i32
    %c0_i32_0 = arith.constant 0 : i32
    %c0_i32_1 = arith.constant 0 : i32
    return %c0_i32, %c0_i32_0 : i32, i32
  }
  func.func @transform_6(%arg0: i32) -> (i32, i32) {
    %c0_i32 = arith.constant 0 : i32
    %c0_i32_0 = arith.constant 0 : i32
    %c0_i32_1 = arith.constant 0 : i32
    return %c0_i32, %c0_i32_0 : i32, i32
  }
  func.func @transform_7(%arg0: i32) -> (i32, i32) {
    %c0_i32 = arith.constant 0 : i32
    %c0_i32_0 = arith.constant 0 : i32
    %c0_i32_1 = arith.constant 0 : i32
    return %c0_i32, %c0_i32_0 : i32, i32
  }
  func.func @transform_8(%arg0: i32) -> (i32, i32) {
    %c0_i32 = arith.constant 0 : i32
    %c0_i32_0 = arith.constant 0 : i32
    %c0_i32_1 = arith.constant 0 : i32
    return %c0_i32, %c0_i32_0 : i32, i32
  }
  func.func @transform_9(%arg0: i32) -> (i32, i32) {
    %c0_i32 = arith.constant 0 : i32
    %c0_i32_0 = arith.constant 0 : i32
    %c0_i32_1 = arith.constant 0 : i32
    return %c0_i32, %c0_i32_0 : i32, i32
  }
  func.func @transform_10(%arg0: i32) -> (i32, i32) {
    %c0_i32 = arith.constant 0 : i32
    %c0_i32_0 = arith.constant 0 : i32
    %c0_i32_1 = arith.constant 0 : i32
    return %c0_i32, %c0_i32_0 : i32, i32
  }
  func.func @transform_11(%arg0: i32) -> (i32, i32) {
    %c0_i32 = arith.constant 0 : i32
    %c0_i32_0 = arith.constant 0 : i32
    %c0_i32_1 = arith.constant 0 : i32
    return %c0_i32, %c0_i32_0 : i32, i32
  }
  func.func @transform_12(%arg0: i32) -> (i32, i32) {
    %c0_i32 = arith.constant 0 : i32
    %c0_i32_0 = arith.constant 0 : i32
    %c0_i32_1 = arith.constant 0 : i32
    return %c0_i32, %c0_i32_0 : i32, i32
  }
  func.func @transform_13(%arg0: i32) -> (i32, i32) {
    %c0_i32 = arith.constant 0 : i32
    %c0_i32_0 = arith.constant 0 : i32
    %c0_i32_1 = arith.constant 0 : i32
    return %c0_i32, %c0_i32_0 : i32, i32
  }
  func.func @transform_14(%arg0: i32) -> (i32, i32) {
    %c0_i32 = arith.constant 0 : i32
    %c0_i32_0 = arith.constant 0 : i32
    %c0_i32_1 = arith.constant 0 : i32
    return %c0_i32, %c0_i32_0 : i32, i32
  }
  func.func @transform_15(%arg0: i32) -> (i32, i32) {
    %c0_i32 = arith.constant 0 : i32
    %c0_i32_0 = arith.constant 0 : i32
    %c0_i32_1 = arith.constant 0 : i32
    return %c0_i32, %c0_i32_0 : i32, i32
  }
  func.func @transform_16(%arg0: i32) -> (i32, i32) {
    %c0_i32 = arith.constant 0 : i32
    %c0_i32_0 = arith.constant 0 : i32
    %c0_i32_1 = arith.constant 0 : i32
    return %c0_i32, %c0_i32_0 : i32, i32
  }
  func.func @transform_17(%arg0: i32) -> (i32, i32) {
    %c0_i32 = arith.constant 0 : i32
    %c0_i32_0 = arith.constant 0 : i32
    %c0_i32_1 = arith.constant 0 : i32
    return %c0_i32, %c0_i32_0 : i32, i32
  }
  func.func @transform_18(%arg0: i32) -> (i32, i32) {
    %c0_i32 = arith.constant 0 : i32
    %c0_i32_0 = arith.constant 0 : i32
    %c0_i32_1 = arith.constant 0 : i32
    return %c0_i32, %c0_i32_0 : i32, i32
  }
  func.func @transform_19(%arg0: i32) -> (i32, i32) {
    %c0_i32 = arith.constant 0 : i32
    %c0_i32_0 = arith.constant 0 : i32
    %c0_i32_1 = arith.constant 0 : i32
    return %c0_i32, %c0_i32_0 : i32, i32
  }
  func.func @transform_20(%arg0: i32) -> (i32, i32) {
    %c0_i32 = arith.constant 0 : i32
    %c0_i32_0 = arith.constant 0 : i32
    %c0_i32_1 = arith.constant 0 : i32
    return %c0_i32, %c0_i32_0 : i32, i32
  }
  func.func @transform_21(%arg0: i32) -> (i32, i32) {
    %c0_i32 = arith.constant 0 : i32
    %c0_i32_0 = arith.constant 0 : i32
    %c0_i32_1 = arith.constant 0 : i32
    return %c0_i32, %c0_i32_0 : i32, i32
  }
  func.func @transform_22(%arg0: i32) -> (i32, i32) {
    %c0_i32 = arith.constant 0 : i32
    %c0_i32_0 = arith.constant 0 : i32
    %c0_i32_1 = arith.constant 0 : i32
    return %c0_i32, %c0_i32_0 : i32, i32
  }
  func.func @transform_23(%arg0: i32) -> (i32, i32) {
    %c0_i32 = arith.constant 0 : i32
    %c0_i32_0 = arith.constant 0 : i32
    %c0_i32_1 = arith.constant 0 : i32
    return %c0_i32, %c0_i32_0 : i32, i32
  }
  func.func @transform_24(%arg0: i32) -> (i32, i32) {
    %c0_i32 = arith.constant 0 : i32
    %c0_i32_0 = arith.constant 0 : i32
    %c0_i32_1 = arith.constant 0 : i32
    return %c0_i32, %c0_i32_0 : i32, i32
  }
  func.func @transform_25(%arg0: i32) -> (i32, i32, i32) {
    %c0_i32 = arith.constant 0 : i32
    %c0_i32_0 = arith.constant 0 : i32
    %c0_i32_1 = arith.constant 0 : i32
    return %arg0, %c0_i32, %c0_i32_0 : i32, i32, i32
  }
}

</mosaic_0001>

<bundles_post_ra>
// kernel: decoder_layer_forward.1
= control target key start
LH: loop header
LB: loop body
LE: loop exit
PB: predicated region body
PF: predicated region fallthrough
CT: control target
= control target key end

     0   :  { %s6711_s0 = inlined_call_operand.vmem [shape: f32[2,8,128], index: 0, kind: input, shape index: {}]   ;;  %s6712_s1 = inlined_call_operand.vmem [shape: f32[2,8,128], index: 1, kind: input, shape index: {}]   ;;  %s6713_s2 = inlined_call_operand.vmem [shape: f32[8,8], index: 2, kind: input, shape index: {}]   ;;  %s6714_s3 = inlined_call_operand.vmem [shape: f32[2,1,8], index: 3, kind: input, shape index: {}]   ;;  %s6715_s4 = inlined_call_operand.vmem [shape: f32[2,1,8], index: 4, kind: input, shape index: {}]   ;;  %s6716_s5 = inlined_call_operand.hbm [shape: bf16[128,384], index: 5, kind: input, shape index: {}]   ;;  %s6717_s6 = inlined_call_operand.hbm [shape: f32[1,384], index: 6, kind: input, shape index: {}]   ;;  %s6718_s7 = inlined_call_operand.hbm [shape: bf16[128,128], index: 7, kind: input, shape index: {}]   ;;  %s6719_s8 = inlined_call_operand.hbm [shape: f32[1,128], index: 8, kind: input, shape index: {}]   ;;  %s6720_s9 = inlined_call_operand.hbm [shape: f32[1,128], index: 9, kind: input, shape index: {}]   ;;  %s6721_s10 = inlined_call_operand.hbm [shape: f32[1,128], index: 10, kind: input, shape index: {}]   ;;  %s6722_s11 = inlined_call_operand.hbm [shape: bf16[128,128], index: 11, kind: input, shape index: {}]   ;;  %s6723_s12 = inlined_call_operand.hbm [shape: f32[1,128], index: 12, kind: input, shape index: {}]   ;;  %s6724_s13 = inlined_call_operand.hbm [shape: bf16[128,256], index: 13, kind: input, shape index: {}]   ;;  %s6725_s14 = inlined_call_operand.hbm [shape: f32[1,256], index: 14, kind: input, shape index: {}]   ;;  %s6726_s15 = inlined_call_operand.hbm [shape: bf16[128,128], index: 15, kind: input, shape index: {}]   ;;  %s6727_s16 = inlined_call_operand.hbm [shape: f32[1,128], index: 16, kind: input, shape index: {}]   ;;  %s6728_s17 = inlined_call_operand.vmem [shape: f32[1,128], index: 17, kind: input, shape index: {}]   ;;  %s6729_s18 = inlined_call_operand.hbm [shape: f32[1,128], index: 18, kind: input, shape index: {}]   ;;  %s6730_s19 = inlined_call_operand.hbm [shape: bf16[128,256], index: 19, kind: input, shape index: {}]   ;;  %s6731_s20 = inlined_call_operand.vmem [shape: f32[1,256], index: 20, kind: input, shape index: {}]   ;;  %s6732_s21 = inlined_call_operand.hbm [shape: bf16[256,128], index: 21, kind: input, shape index: {}]   ;;  %s6733_s22 = inlined_call_operand.vmem [shape: f32[1,128], index: 22, kind: input, shape index: {}]   ;;  %s6734_s23 = inlined_call_operand.vmem [shape: f32[1,128], index: 23, kind: input, shape index: {}]   ;;  %s6735_s24 = inlined_call_operand.vmem [shape: f32[1,128], index: 24, kind: input, shape index: {}]   ;;  %s6736_s25 = inlined_call_operand.hbm [shape: f32[2,8,128], index: 25, kind: output, shape index: {}]  }
   0x1   :  { %6752 = sst [smem:[#allocation45_spill]] %s6711_s0 }
   0x2   :  { %6753 = sst [smem:[#allocation46_spill]] %s6712_s1 }
   0x3   :  { %6754 = sst [smem:[#allocation47_spill]] %s6713_s2 }
   0x4   :  { %6755 = sst [smem:[#allocation48_spill]] %s6714_s3 }
   0x5   :  { %6756 = sst [smem:[#allocation49_spill]] %s6715_s4 }
   0x6   :  { %6757 = sst [smem:[#allocation50_spill]] %s6716_s5 }
   0x7   :  { %6758 = sst [smem:[#allocation51_spill]] %s6717_s6 }
   0x8   :  { %6759 = sst [smem:[#allocation52_spill]] %s6718_s7 }
   0x9   :  { %6760 = sst [smem:[#allocation53_spill]] %s6719_s8 }
   0xa   :  { %6761 = sst [smem:[#allocation54_spill]] %s6720_s9 }
   0xb   :  { %6762 = sst [smem:[#allocation55_spill]] %s6721_s10 }
   0xc   :  { %6763 = sst [smem:[#allocation56_spill]] %s6722_s11 }
   0xd   :  { %6764 = sst [smem:[#allocation57_spill]] %s6735_s24 }
   0xe   :  { %6765 = sst [smem:[#allocation58_spill]] %s6736_s25 }
   0xf   :  { %30 = vsyncpa [#allocation6], 0 }
  0x10   :  { %31 = vsyncpa [#allocation9], 0 }
  0x11   :  { %32 = vsyncpa [#allocation12], 0 }
  0x12   :  { %33 = vsyncpa [#allocation15], 0 }
  0x13   :  { %34 = vsyncpa [#allocation18], 0 }
  0x14   :  { %35 = vsyncpa [#allocation21], 0 }
  0x15   :  { %36 = vsyncpa [#allocation24], 0 }
  0x16   :  { %37 = vsyncpa [#allocation27], 0 }
  0x17   :  { %38 = vsyncpa [#allocation7], 0 }
  0x18   :  { %40 = vsyncpa [#allocation7 + $0x1], 0  ;;  %s5958_s29 = smov 0   ;;  %s5960_s2 = smov 0  }
  0x19   :  { %s5962_s6 = smov 0   ;;  %s5964_s30 = smov 0  }
  0x1a LB: > { %6766 = sst [smem:[#allocation39_spill]] %s5782_s29  ;;  %s5979_s7 = sadd.s32 4294967295, %s5794_s30   ;;  %s5794_s30 = sphi %s5964_s30, %s6817_s30   ;;  %s5790_s6 = sphi %s5962_s6, %s6819_s6   ;;  %s5786_s2 = sphi %s5960_s2, %s6821_s2   ;;  %s5782_s29 = sphi %s5958_s29, %s6820_s29  }
  0x1b   : > { %6767 = sst [smem:[#allocation40_spill]] %s5790_s6  ;;  %s4340_s3 = sadd.s32 4294967294, %s5794_s30  }
  0x1c   : > { %6768 = sst [smem:[#allocation41_spill]] %s5794_s30  ;;  %s5983_s26 = sadd.s32 1, %s5794_s30  }
  0x1d   : > { %6769 = sst [smem:[#allocation42_spill]] %s5983_s26  ;;  %s598_s1 = sadd.s32 1, %s5790_s6 }
  0x1e   : > { %s595_s8 = ssub.s32 %s5794_s30, %s5983_s26  ;;  %p608_p0 = scmp.ne.s32.totalorder %s5790_s6, %s5786_s2 }
  0x1f   : > { %p596_p1 = scmp.eq.s32.totalorder %s595_s8, 0  ;;  %p609_p2 = scmp.eq.s32.totalorder %s5979_s7, 1 }
  0x20   : > { %p614_p3 = scmp.ne.s32.totalorder %s5786_s2, %s5782_s29  ;;  %p615_p4 = scmp.eq.s32.totalorder %s4340_s3, 1 }
  0x21   : > { %s5994_s27 = scalar_select %p596_p1, %s5790_s6, %s598_s1  }
  0x22   : > { %p5996_p5 = por %p609_p2, %p608_p0  ;;  %p6000_p6 = por %p615_p4, %p614_p3 }
  0x23   : > { %6770 = sst [smem:[#allocation43_spill]] %s5994_s27  ;;  %p4341_p7 = scmp.ge.s32.totalorder %s5794_s30, 1 }
  0x24   : > { %s6771_s4 = scalar_select %p5996_p5, 1, 0 }
  0x25   : > { %s6772_s28 = scalar_select %p6000_p6, 1, 0 }
  0x26   : > { %p622_p8 = scmp.lt.s32.totalorder %s5794_s30, 3  ;;  %p6743_p9 = scmp.eq.s32.totalorder %s5979_s7, 0 }
  0x27   : > { %6773 = sst [smem:[#allocation44_spill]] %s6772_s28  ;;  %s5796_s5 = smov [#allocation8]  }
  0x28   : > { %p6007_p10 = pnand %p4341_p7, %p622_p8  ;;  %s651_s0 = sshll.u32 %s5796_s5, 4  ;;  %s652_s0 = int_to_ptr.vmem [resolvable:$true] %s651_s0 }
  0x29   : > { %s5797_s3 = smov [#allocation11]   ;;  %s5798_s27 = smov [#allocation14]  }
  0x2a   : > { %s6774_s9 = scalar_select %p6007_p10, 1, 0 }
  0x2b   : > { %p4977_p11 = pneg %p6007_p10  ;;  %s675_s1 = sshll.u32 %s5797_s3, 4  ;;  %s676_s1 = int_to_ptr.vmem [resolvable:$true] %s675_s1 }
  0x2c   : > { %s697_s6 = sshll.u32 %s5798_s27, 4  ;;  %s5323_s5 = scalar_lea.vmem %s652_s0, 48  ;;  %s6019_s6 = int_to_ptr.vmem [resolvable:$true] %s697_s6 }
  0x2d   : > { %p6015_p12 = pnand %p6743_p9, %p4977_p11  ;;  %p5324_p0 = scmp.ne.s32.totalorder %s652_s0, %s5323_s5 }
  0x2e   : > { %s5330_s3 = scalar_lea.vmem %s652_s0, 64  ;;  %p5331_p3 = scmp.lt.s32.totalorder %s652_s0, %s652_s0 }
  0x2f   : > { %p6023_p13 = pneg %p6015_p12  ;;  %p5332_p4 = scmp.lt.s32.totalorder %s5330_s3, %s5323_s5 }
  0x31   : > { %p5326_p1 = pnand %p5324_p0, %p6023_p13  ;;  %p5333_p7 = por %p5332_p4, %p5331_p3 }
  0x33   : > { %p5327_p2 = pneg %p5326_p1 }
  0x35   : > { %p5334_p8 = pnand %p5333_p7, %p5327_p2 }
  0x37   : > { %5337 = shalt.err (!%p5334_p8)
}
  0x38   : > { %s6777_s29 = sld [smem:[#allocation51_spill]]  ;;  %s5349_s30 = scalar_lea.vmem %s676_s1, 16 }
  0x39   : > { %p5350_p11 = scmp.ne.s32.totalorder %s676_s1, %s5349_s30  ;;  %s5356_s25 = scalar_lea.vmem %s676_s1, 32 }
  0x3a   : > { %p5357_p0 = scmp.lt.s32.totalorder %s676_s1, %s676_s1  ;;  %p5358_p1 = scmp.lt.s32.totalorder %s5356_s25, %s5349_s30 }
  0x3b   : > { %p5352_p9 = pnand %p5350_p11, %p6023_p13 }
  0x3c   : > { %p5359_p5 = por %p5358_p1, %p5357_p0 }
  0x3d   : > { %p5353_p6 = pneg %p5352_p9 }
  0x3e   : > { %4983 = dma.hbm_to_vmem [thread:$0]  (!%p6015_p12), %s6777_s29, 48, %s652_s0, [#allocation9]  }
  0x3f   : > { %p5360_p10 = pnand %p5359_p5, %p5353_p6 }
  0x41   : > { %5363 = shalt.err (!%p5360_p10)
}
  0x42   : > { %s6778_s24 = sld [smem:[#allocation53_spill]]  ;;  %s5375_s29 = scalar_lea.vmem %s6019_s6, 16 }
  0x43   : > { %p5376_p2 = scmp.ne.s32.totalorder %s6019_s6, %s5375_s29  ;;  %s5382_s25 = scalar_lea.vmem %s6019_s6, 32 }
  0x44   : > { %p5383_p5 = scmp.lt.s32.totalorder %s6019_s6, %s6019_s6  ;;  %p5384_p6 = scmp.lt.s32.totalorder %s5382_s25, %s5375_s29 }
  0x45   : > { %p5378_p9 = pnand %p5376_p2, %p6023_p13 }
  0x46   : > { %p5385_p10 = por %p5384_p6, %p5383_p5 }
  0x47   : > { %p5379_p3 = pneg %p5378_p9 }
  0x48   : > { %4989 = dma.hbm_to_vmem [thread:$0]  (!%p6015_p12), %s6778_s24, 16, %s676_s1, [#allocation12]  }
  0x49   : > { %p5386_p4 = pnand %p5385_p10, %p5379_p3 }
  0x4b   : > { %5389 = shalt.err (!%p5386_p4)
}
  0x4c   : > { %s6779_s10 = sld [smem:[#allocation55_spill]]  ;;  %s5799_s24 = smov [#allocation17]  }
  0x4d   : > { %s721_s0 = sshll.u32 %s5799_s24, 4  ;;  %s5800_s1 = smov [#allocation20]   ;;  %s722_s0 = int_to_ptr.vmem [resolvable:$true] %s721_s0 }
  0x4e   : > { %s745_s27 = sshll.u32 %s5800_s1, 4  ;;  %s5401_s5 = scalar_lea.vmem %s722_s0, 16  ;;  %s746_s27 = int_to_ptr.vmem [resolvable:$true] %s745_s27 }
  0x4f   : > { %p5402_p7 = scmp.ne.s32.totalorder %s722_s0, %s5401_s5  ;;  %s5408_s3 = scalar_lea.vmem %s722_s0, 32 }
  0x50   : > { %p5409_p0 = scmp.lt.s32.totalorder %s722_s0, %s722_s0  ;;  %p5410_p1 = scmp.lt.s32.totalorder %s5408_s3, %s5401_s5 }
  0x51   : > { %p5404_p8 = pnand %p5402_p7, %p6023_p13 }
  0x52   : > { %4995 = dma.hbm_to_vmem [thread:$0]  (!%p6015_p12), %s6779_s10, 16, %s6019_s6, [#allocation15]  }
  0x53   : > { %p5405_p11 = pneg %p5404_p8  ;;  %p5411_p2 = por %p5410_p1, %p5409_p0 }
  0x55   : > { %p5412_p9 = pnand %p5411_p2, %p5405_p11 }
  0x57   : > { %5415 = shalt.err (!%p5412_p9)
}
  0x58   : > { %5001 = dma.hbm_to_vmem [thread:$0]  (!%p6015_p12), %s6723_s12, 16, %s722_s0, [#allocation18]  }
  0x59   : > { %s5427_s25 = scalar_lea.vmem %s746_s27, 32  ;;  %p5435_p10 = scmp.lt.s32.totalorder %s746_s27, %s746_s27 }
  0x5a   : > { %p5428_p3 = scmp.ne.s32.totalorder %s746_s27, %s5427_s25  ;;  %p5436_p4 = scmp.lt.s32.totalorder %s5427_s25, %s5427_s25 }
  0x5c   : > { %p5430_p5 = pnand %p5428_p3, %p6023_p13  ;;  %p5437_p7 = por %p5436_p4, %p5435_p10 }
  0x5e   : > { %p5431_p6 = pneg %p5430_p5 }
  0x60   : > { %p5438_p8 = pnand %p5437_p7, %p5431_p6 }
  0x62   : > { %5441 = shalt.err (!%p5438_p8)
}
  0x63   : > { %5007 = dma.hbm_to_vmem [thread:$0]  (!%p6015_p12), %s6725_s14, 32, %s746_s27, [#allocation21]  }
  0x64   : > { %s5801_s24 = smov [#allocation23]  }
  0x65   : > { %s769_s0 = sshll.u32 %s5801_s24, 4  ;;  %s770_s0 = int_to_ptr.vmem [resolvable:$true] %s769_s0 }
  0x66   : > { %s5453_s1 = scalar_lea.vmem %s770_s0, 16  ;;  %s5460_s5 = scalar_lea.vmem %s770_s0, 32 }
  0x67   : > { %p5454_p11 = scmp.ne.s32.totalorder %s770_s0, %s5453_s1  ;;  %p5461_p2 = scmp.lt.s32.totalorder %s770_s0, %s770_s0 }
  0x68   : > { %p5462_p9 = scmp.lt.s32.totalorder %s5460_s5, %s5453_s1 }
  0x69   : > { %p5456_p0 = pnand %p5454_p11, %p6023_p13 }
  0x6a   : > { %p5463_p3 = por %p5462_p9, %p5461_p2 }
  0x6b   : > { %p5457_p1 = pneg %p5456_p0 }
  0x6d   : > { %p5464_p5 = pnand %p5463_p3, %p5457_p1 }
  0x6f   : > { %5467 = shalt.err (!%p5464_p5)
}
  0x70   : > { %5013 = dma.hbm_to_vmem [thread:$0]  (!%p6015_p12), %s6727_s16, 16, %s770_s0, [#allocation24]  }
  0x71   : > { %s5802_s27 = smov [#allocation26]   ;;  %s5803_s25 = smov [#allocation5]  }
  0x72   : > { %s793_s6 = sshll.u32 %s5802_s27, 4  ;;  %s637_s30 = sshll.u32 %s5803_s25, 4  ;;  %s794_s6 = int_to_ptr.vmem [resolvable:$true] %s793_s6  ;;  %s638_s30 = int_to_ptr.vmem [resolvable:$true] %s637_s30 }
  0x73   : > { %s5479_s28 = scalar_lea.vmem %s794_s6, 2048  ;;  %p5487_p7 = scmp.lt.s32.totalorder %s794_s6, %s794_s6 }
  0x74   : > { %p5480_p6 = scmp.ne.s32.totalorder %s794_s6, %s5479_s28  ;;  %p5488_p8 = scmp.lt.s32.totalorder %s5479_s28, %s5479_s28 }
  0x76   : > { %p5482_p10 = pnand %p5480_p6, %p6023_p13  ;;  %p5489_p11 = por %p5488_p8, %p5487_p7 }
  0x78   : > { %p5483_p4 = pneg %p5482_p10 }
  0x7a   : > { %p5490_p0 = pnand %p5489_p11, %p5483_p4 }
  0x7c   : > { %5493 = shalt.err (!%p5490_p0)
}
  0x7d   : > { %s6747_s24 = smov 128   ;;  %s6748_s0 = smov 8  }
  0x7e   : > { %5019 = dma.hbm_to_vmem [thread:$0]  (!%p6015_p12), %s6730_s19, 2048, %s794_s6, [#allocation27], %s6747_s24, %s6747_s24, %s6748_s0  }
  0x7f   : > { %s5505_s3 = scalar_lea.vmem %s638_s30, 3072  ;;  %p5513_p3 = scmp.lt.s32.totalorder %s638_s30, %s638_s30 }
  0x80   : > { %p5506_p1 = scmp.ne.s32.totalorder %s638_s30, %s5505_s3  ;;  %p5514_p5 = scmp.lt.s32.totalorder %s5505_s3, %s5505_s3 }
  0x82   : > { %p5508_p2 = pnand %p5506_p1, %p6023_p13  ;;  %p5515_p6 = por %p5514_p5, %p5513_p3 }
  0x84   : > { %p5509_p9 = pneg %p5508_p2 }
  0x86   : > { %p5516_p10 = pnand %p5515_p6, %p5509_p9 }
  0x88   : > { %5519 = shalt.err (!%p5516_p10)
}
  0x89   : > { %s5806_s29 = smov 192   ;;  %s5807_s27 = smov 12  }
  0x8a   : > { %s6780_s10 = sld [smem:[#allocation50_spill]]  ;;  %s5808_s6 = smov [#allocation10]  }
  0x8b   : > { %s661_s1 = sshll.u32 %s5808_s6, 4  ;;  %s662_s1 = int_to_ptr.vmem [resolvable:$true] %s661_s1 }
  0x8c   : > { %s5531_s5 = scalar_lea.vmem %s662_s1, 1024  ;;  %p5539_p11 = scmp.lt.s32.totalorder %s662_s1, %s662_s1 }
  0x8d   : > { %p5532_p4 = scmp.ne.s32.totalorder %s662_s1, %s5531_s5  ;;  %p5540_p0 = scmp.lt.s32.totalorder %s5531_s5, %s5531_s5 }
  0x8f   : > { %p5534_p7 = pnand %p5532_p4, %p6023_p13  ;;  %p5541_p1 = por %p5540_p0, %p5539_p11 }
  0x90   : > { %4980 = dma.hbm_to_vmem [thread:$0]  (!%p6015_p12), %s6780_s10, 3072, %s638_s30, [#allocation6], %s5806_s29, %s5806_s29, %s5807_s27  }
  0x91   : > { %p5535_p8 = pneg %p5534_p7 }
  0x93   : > { %p5542_p2 = pnand %p5541_p1, %p5535_p8 }
  0x95   : > { %5545 = shalt.err (!%p5542_p2)
}
  0x96   : > { %s5809_s3 = smov 64   ;;  %s5810_s24 = smov 4  }
  0x97   : > { %s6781_s29 = sld [smem:[#allocation52_spill]]  ;;  %s5811_s27 = smov [#allocation13]  }
  0x98   : > { %s686_s25 = sshll.u32 %s5811_s27, 4  ;;  %s5812_s28 = smov [#allocation16]   ;;  %s687_s25 = int_to_ptr.vmem [resolvable:$true] %s686_s25 }
  0x99   : > { %s707_s6 = sshll.u32 %s5812_s28, 4  ;;  %s5557_s5 = scalar_lea.vmem %s687_s25, 16  ;;  %s708_s6 = int_to_ptr.vmem [resolvable:$true] %s707_s6 }
  0x9a   : > { %p5558_p9 = scmp.ne.s32.totalorder %s687_s25, %s5557_s5  ;;  %s5564_s0 = scalar_lea.vmem %s687_s25, 32 }
  0x9b   : > { %p5565_p6 = scmp.lt.s32.totalorder %s687_s25, %s687_s25  ;;  %p5566_p10 = scmp.lt.s32.totalorder %s5564_s0, %s5557_s5 }
  0x9c   : > { %p5560_p3 = pnand %p5558_p9, %p6023_p13 }
  0x9d   : > { %4986 = dma.hbm_to_vmem [thread:$0]  (!%p6015_p12), %s6781_s29, 1024, %s662_s1, [#allocation9], %s5809_s3, %s5809_s3, %s5810_s24  }
  0x9e   : > { %p5561_p5 = pneg %p5560_p3  ;;  %p5567_p4 = por %p5566_p10, %p5565_p6 }
  0xa0   : > { %p5568_p7 = pnand %p5567_p4, %p5561_p5 }
  0xa2   : > { %5571 = shalt.err (!%p5568_p7)
}
  0xa3   : > { %s6782_s30 = sld [smem:[#allocation54_spill]]  ;;  %s5583_s29 = scalar_lea.vmem %s708_s6, 1024 }
  0xa4   : > { %p5584_p8 = scmp.ne.s32.totalorder %s708_s6, %s5583_s29  ;;  %p5591_p1 = scmp.lt.s32.totalorder %s708_s6, %s708_s6 }
  0xa5   : > { %p5592_p2 = scmp.lt.s32.totalorder %s5583_s29, %s5583_s29 }
  0xa6   : > { %p5586_p11 = pnand %p5584_p8, %p6023_p13 }
  0xa7   : > { %p5593_p9 = por %p5592_p2, %p5591_p1 }
  0xa8   : > { %p5587_p0 = pneg %p5586_p11 }
  0xa9   : > { %4992 = dma.hbm_to_vmem [thread:$0]  (!%p6015_p12), %s6782_s30, 16, %s687_s25, [#allocation12]  }
  0xaa   : > { %p5594_p3 = pnand %p5593_p9, %p5587_p0 }
  0xac   : > { %5597 = shalt.err (!%p5594_p3)
}
  0xad   : > { %s6783_s11 = sld [smem:[#allocation56_spill]]  ;;  %s5813_s25 = smov [#allocation19]  }
  0xae   : > { %s731_s28 = sshll.u32 %s5813_s25, 4  ;;  %s5814_s5 = smov [#allocation22]   ;;  %s732_s28 = int_to_ptr.vmem [resolvable:$true] %s731_s28 }
  0xaf   : > { %s755_s10 = sshll.u32 %s5814_s5, 4  ;;  %s5609_s1 = scalar_lea.vmem %s732_s28, 2048  ;;  %s756_s10 = int_to_ptr.vmem [resolvable:$true] %s755_s10 }
  0xb0   : > { %p5610_p5 = scmp.ne.s32.totalorder %s732_s28, %s5609_s1  ;;  %p5617_p4 = scmp.lt.s32.totalorder %s732_s28, %s732_s28 }
  0xb1   : > { %p5618_p7 = scmp.lt.s32.totalorder %s5609_s1, %s5609_s1 }
  0xb2   : > { %p5612_p6 = pnand %p5610_p5, %p6023_p13 }
  0xb3   : > { %4998 = dma.hbm_to_vmem [thread:$0]  (!%p6015_p12), %s6783_s11, 1024, %s708_s6, [#allocation15], %s5809_s3, %s5809_s3, %s5810_s24  }
  0xb4   : > { %p5613_p10 = pneg %p5612_p6  ;;  %p5619_p8 = por %p5618_p7, %p5617_p4 }
  0xb6   : > { %p5620_p11 = pnand %p5619_p8, %p5613_p10 }
  0xb8   : > { %5623 = shalt.err (!%p5620_p11)
}
  0xb9   : > { %s6784_s30 = smov 8   ;;  %s6785_s29 = smov 128  }
  0xba   : > { %5004 = dma.hbm_to_vmem [thread:$0]  (!%p6015_p12), %s6724_s13, 2048, %s732_s28, [#allocation18], %s6785_s29, %s6785_s29, %s6784_s30  }
  0xbb   : > { %s5635_s27 = scalar_lea.vmem %s756_s10, 1024  ;;  %p5643_p9 = scmp.lt.s32.totalorder %s756_s10, %s756_s10 }
  0xbc   : > { %p5636_p0 = scmp.ne.s32.totalorder %s756_s10, %s5635_s27  ;;  %p5644_p3 = scmp.lt.s32.totalorder %s5635_s27, %s5635_s27 }
  0xbe   : > { %p5638_p1 = pnand %p5636_p0, %p6023_p13  ;;  %p5645_p5 = por %p5644_p3, %p5643_p9 }
  0xc0   : > { %p5639_p2 = pneg %p5638_p1 }
  0xc2   : > { %p5646_p6 = pnand %p5645_p5, %p5639_p2 }
  0xc4   : > { %5649 = shalt.err (!%p5646_p6)
}
  0xc5   : > { %5010 = dma.hbm_to_vmem [thread:$0]  (!%p6015_p12), %s6726_s15, 1024, %s756_s10, [#allocation21], %s5809_s3, %s5809_s3, %s5810_s24  }
  0xc6   : > { %s5815_s28 = smov [#allocation25]   ;;  %s5816_s30 = smov [#allocation28]  }
  0xc7   : > { %s783_s1 = sshll.u32 %s5815_s28, 4  ;;  %s809_s29 = sshll.u32 %s5816_s30, 4  ;;  %s784_s1 = int_to_ptr.vmem [resolvable:$true] %s783_s1  ;;  %s810_s29 = int_to_ptr.vmem [resolvable:$true] %s809_s29 }
  0xc8   : > { %s5661_s6 = scalar_lea.vmem %s784_s1, 16  ;;  %s5668_s0 = scalar_lea.vmem %s784_s1, 32 }
  0xc9   : > { %p5662_p10 = scmp.ne.s32.totalorder %s784_s1, %s5661_s6  ;;  %p5669_p8 = scmp.lt.s32.totalorder %s784_s1, %s784_s1 }
  0xca   : > { %p5670_p11 = scmp.lt.s32.totalorder %s5668_s0, %s5661_s6 }
  0xcb   : > { %p5664_p4 = pnand %p5662_p10, %p6023_p13 }
  0xcc   : > { %p5671_p0 = por %p5670_p11, %p5669_p8 }
  0xcd   : > { %p5665_p7 = pneg %p5664_p4 }
  0xcf   : > { %p5672_p1 = pnand %p5671_p0, %p5665_p7 }
  0xd1   : > { %5675 = shalt.err (!%p5672_p1)
}
  0xd2   : > { %5016 = dma.hbm_to_vmem [thread:$0]  (!%p6015_p12), %s6729_s18, 16, %s784_s1, [#allocation24]  }
  0xd3   : > { %s5687_s25 = scalar_lea.vmem %s810_s29, 2048  ;;  %p5695_p5 = scmp.lt.s32.totalorder %s810_s29, %s810_s29 }
  0xd4   : > { %p5688_p2 = scmp.ne.s32.totalorder %s810_s29, %s5687_s25  ;;  %p5696_p6 = scmp.lt.s32.totalorder %s5687_s25, %s5687_s25 }
  0xd6   : > { %p5690_p9 = pnand %p5688_p2, %p6023_p13  ;;  %p5697_p10 = por %p5696_p6, %p5695_p5 }
  0xd8   : > { %p5691_p3 = pneg %p5690_p9 }
  0xda   : > { %p5698_p4 = pnand %p5697_p10, %p5691_p3 }
  0xdc   : > { %5701 = shalt.err (!%p5698_p4)
}
  0xdd   : > { %5022 = dma.hbm_to_vmem [thread:$0]  (!%p6015_p12), %s6732_s21, 2048, %s810_s29, [#allocation27], %s5809_s3, %s5809_s3, %s5810_s24  }
  0xde   : > { %p6786_p7 = scmp.ne.s32.totalorder %s6774_s9, 0 }
  0xdf   : > { %p6787_p13 = scmp.eq.s32.totalorder (!%p6786_p7), %s5979_s7, 0 }
  0xe0   : > { %860 = sbr.rel (%p6786_p7) target bundleno = 4478 (0x117e), region = 120 }
  0xe5   : > { %5745 = dma.done.wait (%p6787_p13), [#allocation6], 3072   ;;  %p6788_p8 = pmov %p6787_p13 }
  0xe7   : > { %5747 = vsyncadd (%p6788_p8), [#allocation6], 4294964224  ;;  %p6789_p11 = pmov %p6788_p8 }
  0xe8   : > { %p6790_p0 = pmov %p6788_p8 }
  0xe9   : > { %5749 = dma.done.wait (%p6789_p11), [#allocation9], 1072  }
  0xea   : > { %5751 = vsyncadd (%p6790_p0), [#allocation9], 4294966224  ;;  %p6791_p1 = pmov %p6790_p0 }
  0xeb   : > { %p6792_p12 = pmov %p6790_p0 }
  0xec   : > { %5753 = dma.done.wait (%p6791_p1), [#allocation12], 32  }
  0xed   : > { %5755 = vsyncadd (%p6792_p12), [#allocation12], 4294967264  ;;  %p6793_p2 = pmov %p6790_p0 }
  0xee   : > { %p6794_p9 = pmov %p6790_p0 }
  0xef   : > { %5757 = dma.done.wait (%p6793_p2), [#allocation15], 1040  }
  0xf0   : > { %5759 = vsyncadd (%p6794_p9), [#allocation15], 4294966256  ;;  %p6795_p3 = pmov %p6790_p0 }
  0xf1   : > { %p6796_p5 = pmov %p6790_p0 }
  0xf2   : > { %5761 = dma.done.wait (%p6795_p3), [#allocation18], 2064  }
  0xf3   : > { %5763 = vsyncadd (%p6796_p5), [#allocation18], 4294965232  ;;  %p6797_p6 = pmov %p6790_p0 }
  0xf4   : > { %p6798_p10 = pmov %p6790_p0 }
  0xf5   : > { %5765 = dma.done.wait (%p6797_p6), [#allocation21], 1056  }
  0xf6   : > { %5767 = vsyncadd (%p6798_p10), [#allocation21], 4294966240  ;;  %p6799_p4 = pmov %p6790_p0 }
  0xf7   : > { %p6800_p7 = pmov %p6790_p0 }
  0xf8   : > { %5769 = dma.done.wait (%p6799_p4), [#allocation24], 32  }
  0xf9   : > { %5771 = vsyncadd (%p6800_p7), [#allocation24], 4294967264  ;;  %p6801_p13 = pmov %p6790_p0 }
  0xfa   : > { %p6802_p8 = pmov %p6790_p0 }
  0xfb   : > { %5773 = dma.done.wait (%p6801_p13), [#allocation27], 4096  }
  0xfc   : > { %5775 = vsyncadd (%p6802_p8), [#allocation27], 4294963200  ;;  %v5817_v0 = vmov 0   ;;  %v5818_v1 = vmov 0.0   ;;  %v5121_v2 = vld [vmem:[#allocation5 + $0xac] ss:$12 sps:$4 sm:$0xff]   ;;  %v1054_v28 = vlaneseq }
  0xfd   : > { %1229 = vmatprep.mubr.bf16.mxu0 %v5817_v0  ;;  %4643 = vmatprep.subr.bf16.mxu1 %v5818_v1  ;;  %v5123_v3 = vld [vmem:[#allocation5 + $0xa8] ss:$12 sps:$4 sm:$0xff]   ;;  %v5126_v5 = vld [vmem:[#allocation5 + $0x90] ss:$12 sps:$4 sm:$0xff]   ;;  %p993_p11 = scmp.lt.s32.totalorder %s5979_s7, 1  ;;  %s6803_s3 = sld [smem:[#allocation45_spill]] }
  0xfe   : > { %1197 = vmatprep.subr.bf16.mxu0 %v5121_v2  ;;  %v5124_v4 = vld [vmem:[#allocation5 + $0x94] ss:$12 sps:$4 sm:$0xff]   ;;  %v5127_v6 = vld [vmem:[#allocation5 + $0x7c] ss:$12 sps:$4 sm:$0xff]   ;;  %v5129_v7 = vld [vmem:[#allocation5 + $0x78] ss:$12 sps:$4 sm:$0xff]  }
  0xff   : > { %1198 = vmatpush1.bf16.msra.mxu0 %v5123_v3  ;;  %v5130_v8 = vld [vmem:[#allocation5 + $0x64] ss:$12 sps:$4 sm:$0xff]   ;;  %s6194_s26 = scalar_select %p993_p11, %s5979_s7, 1  ;;  %v5132_v9 = vld [vmem:[#allocation5 + $0x60] ss:$12 sps:$4 sm:$0xff]   ;;  %vm5819_vm0 = vmmov 0  }
 0x100   : > { %1199 = vmatprep.subr.bf16.mxu0 %v5124_v4  ;;  %v5133_v10 = vld [vmem:[#allocation5 + $0x4c] ss:$12 sps:$4 sm:$0xff]   ;;  %v5145_v11 = vld [vmem:[#allocation5 + $0xb0] ss:$12 sps:$4 sm:$0xff]   ;;  %v5135_v13 = vld [vmem:[#allocation5 + $0x48] ss:$12 sps:$4 sm:$0xff]   ;;  %4659 = vmatprep.mubr.msk.bf16.mxu1 %vm5819_vm0, %v5818_v1 }
 0x101   : > { %s6749_s9 = sshll.u32 %s6194_s26, 3  ;;  %4644 = vmatpush3.bf16.msra.mxu1 %v5145_v11  ;;  %v5146_v12 = vld [vmem:[#allocation5 + $0x98] ss:$12 sps:$4 sm:$0xff]   ;;  %v5136_v14 = vld [vmem:[#allocation5 + $0x34] ss:$12 sps:$4 sm:$0xff]   ;;  %v1055_v29 = vshrl.u32 %v1054_v28, 7 }
 0x102   : > { %4645 = vmatprep.subr.bf16.mxu1 %v5818_v1  ;;  %v5138_v15 = vld [vmem:[#allocation5 + $0x30] ss:$12 sps:$4 sm:$0xff]   ;;  %v5147_v17 = vld [vmem:[#allocation5 + $0x80] ss:$12 sps:$4 sm:$0xff]   ;;  %v5148_v18 = vld [vmem:[#allocation5 + $0x68] ss:$12 sps:$4 sm:$0xff]  }
 0x103   : > { %1200 = vmatpush1.bf16.msra.mxu0 %v5126_v5  ;;  %v5139_v16 = vld [vmem:[#allocation5 + $0x1c] ss:$12 sps:$4 sm:$0xff]   ;;  %v5141_v19 = vld [vmem:[#allocation5 + $0x18] ss:$12 sps:$4 sm:$0xff]   ;;  %s6204_s1 = scalar_lea.vmem %s6803_s3, %s6749_s9  ;;  %v5144_v22 = vld [vmem:[#allocation5] ss:$12 sps:$4 sm:$0xff]  }
 0x104   : > { %1201 = vmatprep.subr.bf16.mxu0 %v5127_v6  ;;  %v5142_v20 = vld [vmem:[#allocation5 + $0x4] ss:$12 sps:$4 sm:$0xff]   ;;  %v1008_v23 = vld [vmem:[%s6204_s1] sm:$0xff]  ;;  %v5151_v26 = vld [vmem:[#allocation5 + $0x20] ss:$12 sps:$4 sm:$0xff]   ;;  %v6220_v30 = vsub.s32 1, %v1055_v29 }
 0x105   : > { %4646 = vmatpush3.bf16.msra.mxu1 %v5146_v12  ;;  %v5149_v21 = vld [vmem:[#allocation5 + $0x50] ss:$12 sps:$4 sm:$0xff]   ;;  %v5150_v24 = vld [vmem:[#allocation5 + $0x38] ss:$12 sps:$4 sm:$0xff]   ;;  %v1019_v25 = vpack.c.bf16 %v1008_v23, %v1008_v23  ;;  %v5152_v27 = vld [vmem:[#allocation5 + $0x8] ss:$12 sps:$4 sm:$0xff]  }
 0x106   : > { %4647 = vmatprep.subr.bf16.mxu1 %v5818_v1  ;;  %v6222_v31 = vsub.s32 0, %v1055_v29  ;;  %v1052_v32 = vld [vmem:[#allocation8] sm:$0x7]  ;;  %vm1281_vm1 = vcmask 130048   ;;  %s5820_s30 = smov 96   ;;  %s6750_s29 = smov 112  }
 0x107   : > { %1202 = vmatpush1.bf16.msra.mxu0 %v5129_v7  ;;  %v1061_v33 = vrot.slane %v1052_v32, %v6220_v30  ;;  %s5822_s6 = smov 64   ;;  %s5823_s0 = smov 80   ;;  %v1064_v44 = vsub.s32 2, %v1055_v29  ;;  %vm1811_vm2 = vcmask 1043456   ;;  %vm1328_vm3 = vcmask 64512  }
 0x108   : > { %1203 = vmatprep.subr.bf16.mxu0 %v5130_v8  ;;  %v1057_v35 = vrot.slane %v1052_v32, %v6222_v31  ;;  %s5824_s27 = smov 48   ;;  %s5825_s10 = smov 32   ;;  %vm1909_vm4 = vcmask 261248   ;;  %vm1963_vm5 = vcmask 392448   ;;  %vm2017_vm6 = vcmask 523648  }
 0x109   : > { %4648 = vmatpush3.bf16.msra.mxu1 %v5147_v17  ;;  %s5826_s25 = smov 16   ;;  %v1065_v45 = vrot.slane %v1052_v32, %v1064_v44  ;;  %s6804_s8 = sld [smem:[#allocation48_spill]]  ;;  %vm2071_vm7 = vcmask 654848   ;;  %vm2125_vm8 = vcmask 786048   ;;  %vm2179_vm9 = vcmask 917248  }
 0x10a   : > { %4649 = vmatprep.subr.bf16.mxu1 %v5818_v1  ;;  %s6806_s9 = smov 112   ;;  %vm2233_vm10 = vcmask 1048448   ;;  %s6808_s28 = sld [smem:[#allocation46_spill]] }
 0x10b   : > { %1204 = vmatpush1.bf16.msra.mxu0 %v5132_v9  ;;  %s6810_s3 = sld [smem:[#allocation57_spill]]  ;;  %p6812_p1 = scmp.ne.s32.totalorder %s6771_s4, 0 }
 0x10c   : > { %1205 = vmatprep.subr.bf16.mxu0 %v5133_v10  ;;  %s5827_s5 = smov [#allocation29]  }
 0x10d   : > { %4650 = vmatpush3.bf16.msra.mxu1 %v5148_v18 }
 0x10e   : > { %4651 = vmatprep.subr.bf16.mxu1 %v5818_v1 }
 0x10f   : > { %1206 = vmatpush1.bf16.msra.mxu0 %v5135_v13  ;;  %s1003_s24 = scalar_lea.vmem %s6804_s8, %s6194_s26 }
 0x110   : > { %1207 = vmatprep.subr.bf16.mxu0 %v5136_v14  ;;  %v4377_v14 = vld [vmem:[%s1003_s24] ss:$0 sm:$0xff] }
 0x111   : > { %4652 = vmatpush3.bf16.msra.mxu1 %v5149_v21 }
 0x112   : > { %4653 = vmatprep.subr.bf16.mxu1 %v5818_v1 }
 0x113   : > { %1208 = vmatpush1.bf16.msra.mxu0 %v5138_v15 }
 0x114   : > { %1209 = vmatprep.subr.bf16.mxu0 %v5139_v16 }
 0x115   : > { %4654 = vmatpush3.bf16.msra.mxu1 %v5150_v24 }
 0x116   : > { %4655 = vmatprep.subr.bf16.mxu1 %v5818_v1 }
 0x117   : > { %1210 = vmatpush1.bf16.msra.mxu0 %v5141_v19 }
 0x118   : > { %1211 = vmatprep.subr.bf16.mxu0 %v5142_v20 }
 0x119   : > { %4656 = vmatpush3.bf16.msra.mxu1 %v5151_v26 }
 0x11a   : > { %4657 = vmatprep.subr.bf16.mxu1 %v5818_v1 }
 0x11b   : > { %1212 = vmatpush1.bf16.msra.mxu0 %v5144_v22 }
 0x11c   : > { %4687 = vmatprep.subr.bf16.mxu0 %v5818_v1 }
 0x11d   : > { %4658 = vmatpush3.bf16.msra.mxu1 %v5152_v27 }
 0x11e   : > { %1230 = vmatmul.mubr.bf16.vlgmr.msra.gmra.mxu0 %v1019_v25  ;;  %4663 = vmatprep.subr.bf16.mxu1 %v5818_v1 }
 0x11f   : > { %4689 = vmatprep.mubr.msk.bf16.mxu0 %vm5819_vm0, %v5818_v1 }
 0x120   : > { %4660 = vmatmul.mubr.bf16.vlgmr.msra.gmra.mxu1 %v1019_v25 }
 0x121   : > { %4665 = vmatprep.mubr.msk.bf16.mxu1 %vm5819_vm0, %v5818_v1 }
 0x1de   : > { %v1231_v34 = vpop.f32.mrf.mxu0 }
 0x1df   : > { %v1232_v39 = vadd.f32 %v1231_v34, %v1057_v35 }
 0x1e0   : > { %v1233_v36 = vpop.f32.mrf.mxu0  ;;  %v1272_v46 = vpop.f32.mrf.mxu1 }
 0x1e1   : > { %v1234_v37 = vadd.f32 %v1233_v36, %v1061_v33  ;;  %v1278_v43 = vpack.c.bf16 %v1232_v39, %v1232_v39  ;;  %v1273_v47 = vadd.f32 %v1272_v46, %v1065_v45 }
 0x1e2   : > { %v1235_v38 = vpop.f32.mrf.mxu0  ;;  %v4661_v48 = vpop.f32.mrf.mxu1 }
 0x1e3   : > { %v1279_v40 = vpack.c.bf16 %v1234_v37, %v1234_v37  ;;  %v6245_v49 = vpack.c.bf16 %v1273_v47, %v1273_v47 }
 0x1e4   : > { %v1236_v41 = vpop.f32.mrf.mxu0  ;;  %v1275_v50 = vpop.f32.mrf.mxu1 }
 0x1e5   : > { %1386 = vrot.lane.b32.xlu1 %v1279_v40, %s5820_s30  ;;  %1334 = vrot.lane.b32.xlu0 %v1279_v40, %s6750_s29  ;;  %v1286_v42 = vsel %vm1281_vm1, %v1279_v40, 0  ;;  %v1813_v7 = vsel %vm1811_vm2, %v6245_v49, 0 }
 0x1e6   : > { %4664 = vmatpush3.bf16.xpose.msra.mxu1 %v1286_v42  ;;  %v4662_v51 = vpop.f32.mrf.mxu1 }
 0x1e7   : > { %4669 = vmatprep.subr.bf16.mxu1 %v5818_v1 }
 0x1e9   : > { %1384 = vrot.lane.b32.xlu1 %v1278_v43, %s5820_s30  ;;  %1331 = vrot.lane.b32.xlu0 %v1278_v43, %s6750_s29 }
 0x1ed   : > { %1490 = vrot.lane.b32.xlu1 %v1279_v40, %s5822_s6  ;;  %1438 = vrot.lane.b32.xlu0 %v1279_v40, %s5823_s0 }
 0x1ee   : > { %4666 = vmatmul.mubr.msk.bf16.vlgmr.msra.gmra.mxu1 %vm1281_vm1, %v1278_v43 }
 0x1ef   : > { %4671 = vmatprep.mubr.msk.bf16.mxu1 %vm5819_vm0, %v5818_v1 }
 0x1f1   : > { %1542 = vrot.lane.b32.xlu1 %v1279_v40, %s5824_s27  ;;  %1436 = vrot.lane.b32.xlu0 %v1278_v43, %s5823_s0 }
 0x1f5   : > { %1594 = vrot.lane.b32.xlu1 %v1279_v40, %s5825_s10  ;;  %1488 = vrot.lane.b32.xlu0 %v1278_v43, %s5822_s6 }
 0x1f9   : > { %1646 = vrot.lane.b32.xlu1 %v1279_v40, %s5826_s25  ;;  %1540 = vrot.lane.b32.xlu0 %v1278_v43, %s5824_s27 }
 0x1fd   : > { %1644 = vrot.lane.b32.xlu1 %v1278_v43, %s5826_s25  ;;  %1592 = vrot.lane.b32.xlu0 %v1278_v43, %s5825_s10 }
 0x201   : > { %1857 = vrot.lane.b32.xlu1 %v6245_v49, %s6750_s29  ;;  %s6805_s29 = sld [smem:[#allocation47_spill]] }
 0x207   : > { %v1010_v13 = vld [vmem:[%s6805_s29] sm:$0xff] }
 0x208   : > { %v6295_v17 = vadd.f32 %v4377_v14, %v1010_v13 }
 0x257   : > { %v1387_v52 = vpop.permute.xlu1 %1386  ;;  %v1335_v53 = vpop.permute.xlu0 %1334 }
 0x258   : > { %v1340_v54 = vsel %vm1281_vm1, %v1335_v53, 0  ;;  %v1392_v59 = vsel %vm1281_vm1, %v1387_v52, 0 }
 0x259   : > { %4670 = vmatpush3.bf16.xpose.msra.mxu1 %v1340_v54 }
 0x25a   : > { %4675 = vmatprep.subr.bf16.mxu1 %v5818_v1 }
 0x25b   : > { %v1385_v55 = vpop.permute.xlu1 %1384  ;;  %v1332_v56 = vpop.permute.xlu0 %1331 }
 0x25f   : > { %v1491_v57 = vpop.permute.xlu1 %1490  ;;  %v1439_v58 = vpop.permute.xlu0 %1438 }
 0x260   : > { %v1496_v60 = vsel %vm1281_vm1, %v1491_v57, 0  ;;  %4672 = vmatmul.mubr.msk.bf16.vlgmr.msra.gmra.mxu1 %vm1281_vm1, %v1332_v56  ;;  %v1444_v3 = vsel %vm1281_vm1, %v1439_v58, 0 }
 0x261   : > { %4676 = vmatpush3.bf16.xpose.msra.mxu1 %v1392_v59  ;;  %4688 = vmatpush3.bf16.xpose.msra.mxu0 %v1496_v60 }
 0x262   : > { %4677 = vmatprep.mubr.msk.bf16.mxu1 %vm5819_vm0, %v5818_v1  ;;  %4681 = vmatprep.subr.bf16.mxu1 %v5818_v1 }
 0x263   : > { %v1543_v61 = vpop.permute.xlu1 %1542  ;;  %v1437_v62 = vpop.permute.xlu0 %1436  ;;  %4699 = vmatprep.subr.bf16.mxu0 %v5818_v1 }
 0x264   : > { %v1548_v8 = vsel %vm1281_vm1, %v1543_v61, 0 }
 0x267   : > { %v1595_v63 = vpop.permute.xlu1 %1594  ;;  %v1489_v2 = vpop.permute.xlu0 %1488 }
 0x268   : > { %v1600_v4 = vsel %vm1281_vm1, %v1595_v63, 0  ;;  %4678 = vmatmul.mubr.msk.bf16.vlgmr.msra.gmra.mxu1 %vm1281_vm1, %v1385_v55  ;;  %4690 = vmatmul.mubr.msk.bf16.vlgmr.msra.gmra.mxu0 %vm1281_vm1, %v1489_v2 }
 0x269   : > { %4682 = vmatpush3.bf16.xpose.msra.mxu1 %v1444_v3  ;;  %4700 = vmatpush3.bf16.xpose.msra.mxu0 %v1600_v4 }
 0x26a   : > { %4701 = vmatprep.mubr.msk.bf16.mxu0 %vm5819_vm0, %v5818_v1  ;;  %4683 = vmatprep.mubr.msk.bf16.mxu1 %vm5819_vm0, %v5818_v1 }
 0x26b   : > { %v1541_v5 = vpop.permute.xlu0 %1540  ;;  %4693 = vmatprep.subr.bf16.mxu1 %v5818_v1  ;;  %4711 = vmatprep.subr.bf16.mxu0 %v5818_v1  ;;  %v1647_v9 = vpop.permute.xlu1 %1646 }
 0x26c   : > { %v1652_v10 = vsel %vm1281_vm1, %v1647_v9, 0 }
 0x26f   : > { %v1593_v6 = vpop.permute.xlu0 %1592  ;;  %v1645_v11 = vpop.permute.xlu1 %1644 }
 0x270   : > { %4684 = vmatmul.mubr.msk.bf16.vlgmr.msra.gmra.mxu1 %vm1281_vm1, %v1437_v62  ;;  %4702 = vmatmul.mubr.msk.bf16.vlgmr.msra.gmra.mxu0 %vm1281_vm1, %v1593_v6 }
 0x271   : > { %4694 = vmatpush3.bf16.xpose.msra.mxu1 %v1548_v8  ;;  %4695 = vmatprep.mubr.msk.bf16.mxu1 %vm5819_vm0, %v5818_v1 }
 0x272   : > { %4705 = vmatprep.subr.bf16.mxu1 %v5818_v1  ;;  %4712 = vmatpush3.bf16.msra.mxu0 %v1813_v7 }
 0x273   : > { %4713 = vmatprep.mubr.msk.bf16.mxu0 %vm5819_vm0, %v5818_v1  ;;  %4723 = vmatprep.subr.bf16.mxu0 %v5818_v1  ;;  %v1858_v22 = vpop.permute.xlu1 %1857 }
 0x274   : > { %v1863_v23 = vsel %vm1811_vm2, %v1858_v22, 0 }
 0x278   : > { %4696 = vmatmul.mubr.msk.bf16.vlgmr.msra.gmra.mxu1 %vm1281_vm1, %v1541_v5 }
 0x279   : > { %4706 = vmatpush3.bf16.xpose.msra.mxu1 %v1652_v10  ;;  %4707 = vmatprep.mubr.msk.bf16.mxu1 %vm5819_vm0, %v5818_v1 }
 0x27a   : > { %4717 = vmatprep.subr.bf16.mxu1 %v5818_v1 }
 0x280   : > { %4708 = vmatmul.mubr.msk.bf16.vlgmr.msra.gmra.mxu1 %vm1281_vm1, %v1645_v11 }
 0x281   : > { %4719 = vmatprep.mubr.msk.bf16.mxu1 %vm5819_vm0, %v5818_v1  ;;  %4718 = vmatpush3.bf16.msra.mxu1 %v1863_v23 }
 0x282   : > { %4729 = vmatprep.subr.bf16.mxu1 %v5818_v1 }
 0x2ae   : > { %v1322_v12 = vpop.f32.mrf.mxu1 }
 0x2af   : > { %1329 = vst.msk [vmem:[#allocation2] sm:$0xff] %vm1328_vm3, %v1322_v12 }
 0x2b0   : > { %v4667_v15 = vpop.f32.mrf.mxu1 }
 0x2b2   : > { %v1325_v16 = vpop.f32.mrf.mxu1 }
 0x2b4   : > { %v4668_v18 = vpop.f32.mrf.mxu1 }
 0x2b6   : > { %v1696_v19 = vld [vmem:[#allocation2] sm:$0xff] }
 0x2b7   : > { %v6298_v20 = vadd.f32 %v1696_v19, %v6295_v17 }
 0x2b9   : > { %v1712_v21 = vsel %vm1328_vm3, %v6298_v20, -inf }
 0x2ba   : > { %1713 = vmax.xlane.f32.xlu0 %v1712_v21 }
 0x320   : > { %v1376_v24 = vpop.f32.mrf.mxu1 }
 0x321   : > { %1383 = vst.msk [vmem:[#allocation2 + $0x8] sm:$0xff] %vm1328_vm3, %v1376_v24 }
 0x322   : > { %v4673_v25 = vpop.f32.mrf.mxu1 }
 0x324   : > { %v1379_v26 = vpop.f32.mrf.mxu1 }
 0x326   : > { %v4674_v27 = vpop.f32.mrf.mxu1 }
 0x328   : > { %v1428_v28 = vpop.f32.mrf.mxu1  ;;  %v1532_v29 = vpop.f32.mrf.mxu0  ;;  %v1697_v32 = vld [vmem:[#allocation2 + $0x8] sm:$0xff] }
 0x329   : > { %1435 = vst.msk [vmem:[#allocation2 + $0x10] sm:$0xff] %vm1328_vm3, %v1428_v28  ;;  %1539 = vst.msk [vmem:[#allocation2 + $0x20] sm:$0xff] %vm1328_vm3, %v1532_v29  ;;  %v6308_v33 = vadd.f32 %v1697_v32, %v6295_v17 }
 0x32a   : > { %v4679_v34 = vpop.f32.mrf.mxu1  ;;  %v4691_v35 = vpop.f32.mrf.mxu0 }
 0x32b   : > { %v1715_v36 = vsel %vm1328_vm3, %v6308_v33, -inf }
 0x32c   : > { %v1535_v37 = vpop.f32.mrf.mxu0  ;;  %1716 = vmax.xlane.f32.xlu1 %v1715_v36  ;;  %v1431_v38 = vpop.f32.mrf.mxu1 }
 0x32e   : > { %v4680_v39 = vpop.f32.mrf.mxu1  ;;  %v4692_v40 = vpop.f32.mrf.mxu0 }
 0x330   : > { %v1480_v41 = vpop.f32.mrf.mxu1  ;;  %v1636_v42 = vpop.f32.mrf.mxu0  ;;  %v1700_v43 = vld [vmem:[#allocation2 + $0x20] sm:$0xff]  ;;  %v1698_v44 = vld [vmem:[#allocation2 + $0x10] sm:$0xff] }
 0x331   : > { %1487 = vst.msk [vmem:[#allocation2 + $0x18] sm:$0xff] %vm1328_vm3, %v1480_v41  ;;  %1643 = vst.msk [vmem:[#allocation2 + $0x30] sm:$0xff] %vm1328_vm3, %v1636_v42  ;;  %v1708_v45 = vadd.f32 %v1700_v43, %v6295_v17  ;;  %v1706_v46 = vadd.f32 %v1698_v44, %v6295_v17 }
 0x332   : > { %v4685_v47 = vpop.f32.mrf.mxu1  ;;  %v4703_v48 = vpop.f32.mrf.mxu0 }
 0x333   : > { %v1724_v50 = vsel %vm1328_vm3, %v1708_v45, -inf  ;;  %v1718_v51 = vsel %vm1328_vm3, %v1706_v46, -inf }
 0x334   : > { %v1639_v52 = vpop.f32.mrf.mxu0  ;;  %1725 = vmax.xlane.f32.xlu1 %v1724_v50  ;;  %1719 = vmax.xlane.f32.xlu0 %v1718_v51  ;;  %v1483_v53 = vpop.f32.mrf.mxu1 }
 0x336   : > { %v4686_v54 = vpop.f32.mrf.mxu1  ;;  %v4704_v55 = vpop.f32.mrf.mxu0 }
 0x338   : > { %v1584_v56 = vpop.f32.mrf.mxu1  ;;  %v1702_v57 = vld [vmem:[#allocation2 + $0x30] sm:$0xff]  ;;  %v1699_v58 = vld [vmem:[#allocation2 + $0x18] sm:$0xff] }
 0x339   : > { %1591 = vst.msk [vmem:[#allocation2 + $0x28] sm:$0xff] %vm1328_vm3, %v1584_v56  ;;  %v6320_v59 = vadd.f32 %v1702_v57, %v6295_v17  ;;  %v1707_v60 = vadd.f32 %v1699_v58, %v6295_v17 }
 0x33a   : > { %v4697_v61 = vpop.f32.mrf.mxu1 }
 0x33b   : > { %v1730_v62 = vsel %vm1328_vm3, %v6320_v59, -inf  ;;  %v1721_v63 = vsel %vm1328_vm3, %v1707_v60, -inf }
 0x33c   : > { %1731 = vmax.xlane.f32.xlu1 %v1730_v62  ;;  %1722 = vmax.xlane.f32.xlu0 %v1721_v63  ;;  %v1587_v2 = vpop.f32.mrf.mxu1 }
 0x33e   : > { %v4698_v3 = vpop.f32.mrf.mxu1 }
 0x340   : > { %v1688_v4 = vpop.f32.mrf.mxu1  ;;  %v1701_v5 = vld [vmem:[#allocation2 + $0x28] sm:$0xff] }
 0x341   : > { %1695 = vst.msk [vmem:[#allocation2 + $0x38] sm:$0xff] %vm1328_vm3, %v1688_v4  ;;  %v1709_v6 = vadd.f32 %v1701_v5, %v6295_v17 }
 0x342   : > { %v4709_v7 = vpop.f32.mrf.mxu1 }
 0x343   : > { %v1727_v8 = vsel %vm1328_vm3, %v1709_v6, -inf  ;;  %v1714_v14 = vpop.xlane.xlu0 %1713 }
 0x344   : > { %1728 = vmax.xlane.f32.xlu0 %v1727_v8  ;;  %v1691_v9 = vpop.f32.mrf.mxu1  ;;  %v1736_v15 = vsub.f32 %v6298_v20, %v1714_v14 }
 0x346   : > { %v4710_v10 = vpop.f32.mrf.mxu1  ;;  %v1744_v16 = vmul.f32 1.442695, %v1736_v15 }
 0x348   : > { %v1703_v11 = vld [vmem:[#allocation2 + $0x38] sm:$0xff]  ;;  %5241 = vpow2.f32 %v1744_v16 }
 0x349   : > { %v1711_v12 = vadd.f32 %v1703_v11, %v6295_v17 }
 0x34b   : > { %v1733_v13 = vsel %vm1328_vm3, %v1711_v12, -inf }
 0x34c   : > { %1734 = vmax.xlane.f32.xlu0 %v1733_v13 }
 0x34d   : > { %1965 = vrot.lane.b32.xlu1 %v6245_v49, %s5823_s0 }
 0x355   : > { %v5242_v18 = vpop.eup %5241 }
 0x356   : > { %v1760_v19 = vsel %vm1328_vm3, %v5242_v18, 0.0 }
 0x362   : > { %1911 = vrot.lane.b32.xlu0 %v6245_v49, %s5820_s30 }
 0x371   : > { %1761 = vadd.xlane.f32.xlu1 %v1760_v19 }
 0x3b5   : > { %v1717_v21 = vpop.xlane.xlu1 %1716 }
 0x3b6   : > { %v1737_v17 = vsub.f32 %v6308_v33, %v1717_v21 }
 0x3b8   : > { %v1746_v22 = vmul.f32 1.442695, %v1737_v17 }
 0x3ba   : > { %5243 = vpow2.f32 %v1746_v22 }
 0x3bd   : > { %v1726_v23 = vpop.xlane.xlu1 %1725  ;;  %v1720_v24 = vpop.xlane.xlu0 %1719 }
 0x3be   : > { %v1740_v25 = vsub.f32 %v1708_v45, %v1726_v23  ;;  %v1738_v26 = vsub.f32 %v1706_v46, %v1720_v24 }
 0x3c0   : > { %v1752_v27 = vmul.f32 1.442695, %v1740_v25  ;;  %v1748_v20 = vmul.f32 1.442695, %v1738_v26 }
 0x3c2   : > { %5245 = vpow2.f32 %v1752_v27 }
 0x3c3   : > { %5247 = vpow2.f32 %v1748_v20 }
 0x3c5   : > { %v1723_v28 = vpop.xlane.xlu0 %1722  ;;  %v1732_v41 = vpop.xlane.xlu1 %1731 }
 0x3c6   : > { %v1739_v29 = vsub.f32 %v1707_v60, %v1723_v28  ;;  %v1742_v42 = vsub.f32 %v6320_v59, %v1732_v41 }
 0x3c7   : > { %v5244_v32 = vpop.eup %5243 }
 0x3c8   : > { %v1750_v34 = vmul.f32 1.442695, %v1739_v29  ;;  %v1763_v35 = vsel %vm1328_vm3, %v5244_v32, 0.0  ;;  %v1756_v44 = vmul.f32 1.442695, %v1742_v42 }
 0x3c9   : > { %1764 = vadd.xlane.f32.xlu0 %v1763_v35  ;;  %v1966_v45 = vpop.permute.xlu1 %1965 }
 0x3ca   : > { %5249 = vpow2.f32 %v1750_v34  ;;  %v1971_v9 = vsel %vm1811_vm2, %v1966_v45, 0 }
 0x3cb   : > { %5251 = vpow2.f32 %v1756_v44 }
 0x3cd   : > { %v1729_v43 = vpop.xlane.xlu0 %1728 }
 0x3ce   : > { %v1741_v46 = vsub.f32 %v1709_v6, %v1729_v43 }
 0x3cf   : > { %v6339_v36 = vpop.eup %5245 }
 0x3d0   : > { %v1772_v33 = vsel %vm1328_vm3, %v6339_v36, 0.0  ;;  %v5248_v37 = vpop.eup %5247  ;;  %v1754_v48 = vmul.f32 1.442695, %v1741_v46 }
 0x3d1   : > { %1773 = vadd.xlane.f32.xlu1 %v1772_v33  ;;  %v1766_v38 = vsel %vm1328_vm3, %v5248_v37, 0.0 }
 0x3d5   : > { %1767 = vadd.xlane.f32.xlu1 %v1766_v38  ;;  %v1735_v47 = vpop.xlane.xlu0 %1734 }
 0x3d6   : > { %v1743_v50 = vsub.f32 %v1711_v12, %v1735_v47 }
 0x3d7   : > { %v6344_v39 = vpop.eup %5249 }
 0x3d8   : > { %v1769_v40 = vsel %vm1328_vm3, %v6344_v39, 0.0  ;;  %v1758_v52 = vmul.f32 1.442695, %v1743_v50  ;;  %v6353_v53 = vpop.eup %5251  ;;  %v5154_v50 = vld [vmem:[#allocation10 + $0x30] sm:$0xff]  }
 0x3d9   : > { %1770 = vadd.xlane.f32.xlu0 %v1769_v40  ;;  %v1778_v55 = vsel %vm1328_vm3, %v6353_v53, 0.0  ;;  %v1912_v57 = vpop.permute.xlu0 %1911 }
 0x3da   : > { %v1917_v60 = vsel %vm1811_vm2, %v1912_v57, 0 }
 0x3e6   : > { %2019 = vrot.lane.b32.xlu1 %v6245_v49, %s5822_s6 }
 0x3ef   : > { %2073 = vrot.lane.b32.xlu0 %v6245_v49, %s5824_s27 }
 0x3fa   : > { %v1762_v51 = vpop.xlane.xlu1 %1761 }
 0x3fb   : > { %5253 = vrcp.f32 %v1762_v51 }
 0x3fc   : > { %5255 = vpow2.f32 %v1754_v48  ;;  %v5153_v48 = vld [vmem:[#allocation10 + $0x38] sm:$0xff]  }
 0x3fd   : > { %5257 = vpow2.f32 %v1758_v52 }
 0x408   : > { %v5254_v54 = vpop.eup %5253 }
 0x409   : > { %v1785_v56 = vmul.f32 %v5254_v54, %v5242_v18  ;;  %v6357_v58 = vpop.eup %5255 }
 0x40a   : > { %1779 = vadd.xlane.f32.xlu1 %v1778_v55  ;;  %v1775_v61 = vsel %vm1328_vm3, %v6357_v58, 0.0  ;;  %v6365_v62 = vpop.eup %5257 }
 0x40b   : > { %v1800_v59 = vpack.c.bf16 %v1785_v56, %v1785_v56  ;;  %v1781_v63 = vsel %vm1328_vm3, %v6365_v62, 0.0 }
 0x40d   : > { %4714 = vmatmul.mubr.msk.bf16.vlgmr.msra.gmra.mxu0 %vm1328_vm3, %v1800_v59 }
 0x40e   : > { %4724 = vmatpush3.bf16.msra.mxu0 %v1917_v60  ;;  %4725 = vmatprep.mubr.msk.bf16.mxu0 %vm5819_vm0, %v5818_v1 }
 0x40f   : > { %1776 = vadd.xlane.f32.xlu0 %v1775_v61  ;;  %4735 = vmatprep.subr.bf16.mxu0 %v5818_v1 }
 0x413   : > { %1782 = vadd.xlane.f32.xlu0 %v1781_v63 }
 0x41b   : > { %2127 = vrot.lane.b32.xlu1 %v6245_v49, %s5825_s10 }
 0x429   : > { %2181 = vrot.lane.b32.xlu0 %v6245_v49, %s5826_s25 }
 0x452   : > { %v1765_v2 = vpop.xlane.xlu0 %1764 }
 0x453   : > { %5259 = vrcp.f32 %v1765_v2  ;;  %v5156_v2 = vld [vmem:[#allocation10 + $0x20] sm:$0xff]  }
 0x45a   : > { %v1774_v3 = vpop.xlane.xlu1 %1773 }
 0x45e   : > { %v1768_v4 = vpop.xlane.xlu1 %1767 }
 0x45f   : > { %5261 = vrcp.f32 %v1768_v4  ;;  %v5158_v4 = vld [vmem:[#allocation10 + $0x10] sm:$0xff]  }
 0x460   : > { %v5260_v5 = vpop.eup %5259  ;;  %5263 = vrcp.f32 %v1774_v3  ;;  %v5157_v3 = vld [vmem:[#allocation10 + $0x18] sm:$0xff]  }
 0x461   : > { %v1787_v6 = vmul.f32 %v5260_v5, %v5244_v32 }
 0x462   : > { %v1771_v7 = vpop.xlane.xlu0 %1770  ;;  %v2020_v11 = vpop.permute.xlu1 %2019 }
 0x463   : > { %v1801_v8 = vpack.c.bf16 %v1787_v6, %v1787_v6  ;;  %5265 = vrcp.f32 %v1771_v7  ;;  %v2025_v15 = vsel %vm1811_vm2, %v2020_v11, 0  ;;  %v5159_v6 = vld [vmem:[#allocation10 + $0x8] sm:$0xff]  }
 0x465   : > { %4720 = vmatmul.mubr.msk.bf16.vlgmr.msra.gmra.mxu1 %vm1328_vm3, %v1801_v8  ;;  %v5160_v8 = vld [vmem:[#allocation10] sm:$0xff]  }
 0x466   : > { %4730 = vmatpush3.bf16.msra.mxu1 %v1971_v9  ;;  %4731 = vmatprep.mubr.msk.bf16.mxu1 %vm5819_vm0, %v5818_v1  ;;  %v2074_v18 = vpop.permute.xlu0 %2073 }
 0x467   : > { %4741 = vmatprep.subr.bf16.mxu1 %v5818_v1  ;;  %v2079_v17 = vsel %vm1811_vm2, %v2074_v18, 0 }
 0x46c   : > { %v5262_v49 = vpop.eup %5261 }
 0x46d   : > { %v1789_v10 = vmul.f32 %v5262_v49, %v5248_v37  ;;  %v5264_v13 = vpop.eup %5263 }
 0x46e   : > { %v1793_v19 = vmul.f32 %v5264_v13, %v6339_v36 }
 0x46f   : > { %v1802_v12 = vpack.c.bf16 %v1789_v10, %v1789_v10 }
 0x470   : > { %v5266_v14 = vpop.eup %5265  ;;  %v1804_v22 = vpack.c.bf16 %v1793_v19, %v1793_v19 }
 0x471   : > { %4726 = vmatmul.mubr.msk.bf16.vlgmr.msra.gmra.mxu0 %vm1328_vm3, %v1802_v12  ;;  %v1791_v16 = vmul.f32 %v5266_v14, %v6344_v39 }
 0x472   : > { %4736 = vmatpush3.bf16.msra.mxu0 %v2025_v15  ;;  %4737 = vmatprep.mubr.msk.bf16.mxu0 %vm5819_vm0, %v5818_v1 }
 0x473   : > { %4747 = vmatprep.subr.bf16.mxu0 %v5818_v1  ;;  %v1803_v21 = vpack.c.bf16 %v1791_v16, %v1791_v16 }
 0x475   : > { %4732 = vmatmul.mubr.msk.bf16.vlgmr.msra.gmra.mxu1 %vm1328_vm3, %v1803_v21 }
 0x476   : > { %4742 = vmatpush3.bf16.msra.mxu1 %v2079_v17  ;;  %4743 = vmatprep.mubr.msk.bf16.mxu1 %vm5819_vm0, %v5818_v1 }
 0x477   : > { %4753 = vmatprep.subr.bf16.mxu1 %v5818_v1 }
 0x479   : > { %4738 = vmatmul.mubr.msk.bf16.vlgmr.msra.gmra.mxu0 %vm1328_vm3, %v1804_v22 }
 0x47a   : > { %4749 = vmatprep.mubr.msk.bf16.mxu0 %vm5819_vm0, %v5818_v1 }
 0x493   : > { %v1780_v23 = vpop.xlane.xlu1 %1779 }
 0x494   : > { %5267 = vrcp.f32 %v1780_v23 }
 0x497   : > { %v2128_v24 = vpop.permute.xlu1 %2127 }
 0x498   : > { %v2133_v25 = vsel %vm1811_vm2, %v2128_v24, 0  ;;  %v1777_v26 = vpop.xlane.xlu0 %1776 }
 0x499   : > { %5269 = vrcp.f32 %v1777_v26  ;;  %4748 = vmatpush3.bf16.msra.mxu0 %v2133_v25 }
 0x49a   : > { %4759 = vmatprep.subr.bf16.mxu0 %v5818_v1 }
 0x49c   : > { %v1783_v27 = vpop.xlane.xlu0 %1782 }
 0x49d   : > { %5271 = vrcp.f32 %v1783_v27 }
 0x4a0   : > { %v2182_v35 = vpop.permute.xlu0 %2181 }
 0x4a1   : > { %v5268_v20 = vpop.eup %5267  ;;  %v2187_v37 = vsel %vm1811_vm2, %v2182_v35, 0 }
 0x4a2   : > { %v1797_v28 = vmul.f32 %v5268_v20, %v6353_v53  ;;  %v5155_v53 = vld [vmem:[#allocation10 + $0x28] sm:$0xff]   ;;  %v4418_v20 = vld [vmem:[#allocation11] ss:$0 sm:$0xff] }
 0x4a4   : > { %v1806_v29 = vpack.c.bf16 %v1797_v28, %v1797_v28 }
 0x4a6   : > { %v5270_v32 = vpop.eup %5269  ;;  %4750 = vmatmul.mubr.msk.bf16.vlgmr.msra.gmra.mxu0 %vm1328_vm3, %v1806_v29 }
 0x4a7   : > { %v1795_v34 = vmul.f32 %v5270_v32, %v6357_v58  ;;  %4775 = vmatprep.mubr.msk.bf16.mxu0 %vm5819_vm0, %v5818_v1  ;;  %4760 = vmatpush3.bf16.msra.mxu0 %v5153_v48  ;;  %v5173_v48 = vld [vmem:[#allocation19 + $0x30] ss:$8 sps:$4 sm:$0xff]  }
 0x4a8   : > { %4761 = vmatprep.subr.bf16.mxu0 %v5818_v1 }
 0x4a9   : > { %v1805_v36 = vpack.c.bf16 %v1795_v34, %v1795_v34  ;;  %v5311_v34 = vld [vmem:[%s6204_s1] sm:$0xff]  ;;  %s6807_s1 = sshll.u32 %s6194_s26, 3 }
 0x4aa   : > { %v5272_v33 = vpop.eup %5271  ;;  %s1000_s8 = scalar_lea.vmem %s6808_s28, %s6807_s1  ;;  %s6809_s1 = sld [smem:[#allocation49_spill]] }
 0x4ab   : > { %4744 = vmatmul.mubr.msk.bf16.vlgmr.msra.gmra.mxu1 %vm1328_vm3, %v1805_v36  ;;  %v1799_v38 = vmul.f32 %v5272_v33, %v6365_v62  ;;  %4762 = vmatpush3.bf16.msra.mxu0 %v5154_v50  ;;  %v5179_v50 = vld [vmem:[#allocation19 + $0x24] ss:$8 sps:$4 sm:$0xff]   ;;  %s5706_s28 = sshll.u32 %s5827_s5, 4  ;;  %s5707_s28 = int_to_ptr.vmem [resolvable:$false] %s5706_s28 }
 0x4ac   : > { %4754 = vmatpush3.bf16.msra.mxu1 %v2187_v37  ;;  %4755 = vmatprep.mubr.msk.bf16.mxu1 %vm5819_vm0, %v5818_v1  ;;  %v5161_v37 = vld [vmem:[#allocation19 + $0x70] ss:$8 sps:$4 sm:$0xff]  }
 0x4ad   : > { %4779 = vmatprep.subr.bf16.mxu1 %v5818_v1  ;;  %v1807_v39 = vpack.c.bf16 %v1799_v38, %v1799_v38  ;;  %4763 = vmatprep.subr.bf16.mxu0 %v5818_v1  ;;  %v5163_v38 = vld [vmem:[#allocation19 + $0x74] ss:$8 sps:$4 sm:$0xff]  }
 0x4af   : > { %4764 = vmatpush3.bf16.msra.mxu0 %v5155_v53 }
 0x4b0   : > { %4765 = vmatprep.subr.bf16.mxu0 %v5818_v1  ;;  %s1006_s29 = scalar_lea.vmem %s6809_s1, %s6194_s26  ;;  %s4518_s1 = sshll.u32 %s5979_s7, 7 }
 0x4b1   : > { %s5708_s7 = scalar_lea.vmem %s5707_s28, 256 }
 0x4b3   : > { %4756 = vmatmul.mubr.msk.bf16.vlgmr.msra.gmra.mxu1 %vm1328_vm3, %v1807_v39  ;;  %4766 = vmatpush3.bf16.msra.mxu0 %v5156_v2  ;;  %v5166_v39 = vld [vmem:[#allocation19 + $0x64] ss:$8 sps:$4 sm:$0xff]   ;;  %v5189_v2 = vld [vmem:[#allocation16 + $0x18] sm:$0xff]  }
 0x4b4   : > { %4795 = vmatprep.mubr.msk.bf16.mxu1 %vm5819_vm0, %v5818_v1  ;;  %4767 = vmatprep.subr.bf16.mxu0 %v5818_v1 }
 0x4b7   : > { %4768 = vmatpush3.bf16.msra.mxu0 %v5157_v3  ;;  %v5190_v3 = vld [vmem:[#allocation16 + $0x10] sm:$0xff]  }
 0x4b8   : > { %4769 = vmatprep.subr.bf16.mxu0 %v5818_v1 }
 0x4bb   : > { %4770 = vmatpush3.bf16.msra.mxu0 %v5158_v4  ;;  %v5191_v4 = vld [vmem:[#allocation16 + $0x8] sm:$0xff]  }
 0x4bc   : > { %4771 = vmatprep.subr.bf16.mxu0 %v5818_v1 }
 0x4bf   : > { %4772 = vmatpush3.bf16.msra.mxu0 %v5159_v6 }
 0x4c0   : > { %4773 = vmatprep.subr.bf16.mxu0 %v5818_v1 }
 0x4c3   : > { %4774 = vmatpush3.bf16.msra.mxu0 %v5160_v8 }
 0x4c4   : > { %2600 = vmatprep.subr.bf16.mxu0 %v5163_v38 }
 0x4cd   : > { %v1849_v40 = vpop.f32.mrf.mxu0 }
 0x4ce   : > { %1855 = vst.msk [vmem:[#allocation4] sm:$0xff] %vm1281_vm1, %v1849_v40  ;;  %v5164_v40 = vld [vmem:[#allocation19 + $0x60] ss:$8 sps:$4 sm:$0xff]  }
 0x4cf   : > { %v4715_v41 = vpop.f32.mrf.mxu0 }
 0x4d0   : > { %v5176_v41 = vld [vmem:[#allocation16 + $0x38] sm:$0xff]  }
 0x4d1   : > { %v1852_v42 = vpop.f32.mrf.mxu0  ;;  %4780 = vmatpush3.bf16.msra.mxu1 %v5176_v41 }
 0x4d2   : > { %v5169_v42 = vld [vmem:[#allocation19 + $0x54] ss:$8 sps:$4 sm:$0xff]   ;;  %4781 = vmatprep.subr.bf16.mxu1 %v5818_v1 }
 0x4d3   : > { %v4716_v43 = vpop.f32.mrf.mxu0 }
 0x4d4   : > { %v5180_v43 = vld [vmem:[#allocation16 + $0x30] sm:$0xff]  }
 0x4d5   : > { %4782 = vmatpush3.bf16.msra.mxu1 %v5180_v43 }
 0x4d6   : > { %4783 = vmatprep.subr.bf16.mxu1 %v5818_v1 }
 0x525   : > { %v1899_v44 = vpop.f32.mrf.mxu1 }
 0x526   : > { %1906 = vrot.lane.b32.xlu1 %v1899_v44, %s5826_s25  ;;  %v5167_v44 = vld [vmem:[#allocation19 + $0x50] ss:$8 sps:$4 sm:$0xff]  }
 0x527   : > { %v4721_v45 = vpop.f32.mrf.mxu1 }
 0x528   : > { %v5172_v45 = vld [vmem:[#allocation19 + $0x44] ss:$8 sps:$4 sm:$0xff]  }
 0x529   : > { %v1902_v46 = vpop.f32.mrf.mxu1 }
 0x52a   : > { %v5170_v46 = vld [vmem:[#allocation19 + $0x40] ss:$8 sps:$4 sm:$0xff]  }
 0x52b   : > { %v4722_v47 = vpop.f32.mrf.mxu1 }
 0x52c   : > { %v5175_v47 = vld [vmem:[#allocation19 + $0x34] ss:$8 sps:$4 sm:$0xff]  }
 0x531   : > { %v1953_v51 = vpop.f32.mrf.mxu0 }
 0x532   : > { %1960 = vrot.lane.b32.xlu0 %v1953_v51, %s5825_s10  ;;  %v5177_v51 = vld [vmem:[#allocation19 + $0x20] ss:$8 sps:$4 sm:$0xff]  }
 0x533   : > { %v4727_v52 = vpop.f32.mrf.mxu0 }
 0x535   : > { %v1956_v54 = vpop.f32.mrf.mxu0  ;;  %v2007_v55 = vpop.f32.mrf.mxu1 }
 0x536   : > { %2014 = vrot.lane.b32.xlu1 %v2007_v55, %s5824_s27 }
 0x537   : > { %v4728_v56 = vpop.f32.mrf.mxu0  ;;  %v4733_v57 = vpop.f32.mrf.mxu1 }
 0x538   : > { %v5183_v56 = vld [vmem:[#allocation19 + $0x14] ss:$8 sps:$4 sm:$0xff]   ;;  %v5181_v57 = vld [vmem:[#allocation19 + $0x10] ss:$8 sps:$4 sm:$0xff]  }
 0x539   : > { %v2061_v58 = vpop.f32.mrf.mxu0  ;;  %v2010_v59 = vpop.f32.mrf.mxu1 }
 0x53a   : > { %2068 = vrot.lane.b32.xlu0 %v2061_v58, %s5822_s6  ;;  %v5184_v58 = vld [vmem:[#allocation16 + $0x28] sm:$0xff]  }
 0x53b   : > { %v4739_v60 = vpop.f32.mrf.mxu0  ;;  %v4734_v61 = vpop.f32.mrf.mxu1  ;;  %4784 = vmatpush3.bf16.msra.mxu1 %v5184_v58  ;;  %v5185_v59 = vld [vmem:[#allocation19] ss:$8 sps:$4 sm:$0xff]  }
 0x53c   : > { %v5187_v60 = vld [vmem:[#allocation19 + $0x4] ss:$8 sps:$4 sm:$0xff]   ;;  %4785 = vmatprep.subr.bf16.mxu1 %v5818_v1 }
 0x53d   : > { %v2064_v62 = vpop.f32.mrf.mxu0  ;;  %v5188_v61 = vld [vmem:[#allocation16 + $0x20] sm:$0xff]  }
 0x53e   : > { %v1009_v62 = vld [vmem:[%s1000_s8] sm:$0xff] }
 0x53f   : > { %v4740_v63 = vpop.f32.mrf.mxu0  ;;  %4786 = vmatpush3.bf16.msra.mxu1 %v5188_v61 }
 0x540   : > { %v2491_v63 = vpack.c.bf16 %v1009_v62, %v1009_v62  ;;  %4787 = vmatprep.subr.bf16.mxu1 %v5818_v1 }
 0x543   : > { %4788 = vmatpush3.bf16.msra.mxu1 %v5189_v2  ;;  %v6526_v2 = vld [vmem:[%s1006_s29] ss:$0 sm:$0xff] }
 0x544   : > { %4789 = vmatprep.subr.bf16.mxu1 %v5818_v1 }
 0x547   : > { %4790 = vmatpush3.bf16.msra.mxu1 %v5190_v3 }
 0x548   : > { %4791 = vmatprep.subr.bf16.mxu1 %v5818_v1 }
 0x54b   : > { %4792 = vmatpush3.bf16.msra.mxu1 %v5191_v4 }
 0x54c   : > { %4793 = vmatprep.subr.bf16.mxu1 %v5818_v1 }
 0x566   : > { %v2169_v5 = vpop.f32.mrf.mxu0 }
 0x567   : > { %2176 = vrot.lane.b32.xlu0 %v2169_v5, %s5820_s30  ;;  %v5192_v5 = vld [vmem:[#allocation16] sm:$0xff]  }
 0x568   : > { %v4751_v7 = vpop.f32.mrf.mxu0  ;;  %4794 = vmatpush3.bf16.msra.mxu1 %v5192_v5 }
 0x569   : > { %4799 = vmatprep.subr.bf16.mxu1 %v5818_v1 }
 0x56a   : > { %v2172_v9 = vpop.f32.mrf.mxu0 }
 0x56b   : > { %v2115_v49 = vpop.f32.mrf.mxu1 }
 0x56c   : > { %2122 = vrot.lane.b32.xlu1 %v2115_v49, %s5823_s0  ;;  %v4752_v10 = vpop.f32.mrf.mxu0  ;;  %v4427_v49 = vld [vmem:[#allocation13] ss:$0 sm:$0xff] }
 0x56d   : > { %v4745_v11 = vpop.f32.mrf.mxu1 }
 0x56e   : > { %v4428_v11 = vld [vmem:[#allocation14] ss:$0 sm:$0xff] }
 0x56f   : > { %v2118_v12 = vpop.f32.mrf.mxu1 }
 0x571   : > { %v4746_v13 = vpop.f32.mrf.mxu1 }
 0x573   : > { %v2223_v14 = vpop.f32.mrf.mxu1 }
 0x574   : > { %2230 = vrot.lane.b32.xlu1 %v2223_v14, %s6806_s9 }
 0x575   : > { %v4757_v15 = vpop.f32.mrf.mxu1 }
 0x576   : > { %v2508_v15 = vld [vmem:[#allocation20] sm:$0x3] }
 0x577   : > { %v2226_v16 = vpop.f32.mrf.mxu1 }
 0x578   : > { %v2513_v16 = vrot.slane %v2508_v15, %v6222_v31 }
 0x579   : > { %v4758_v18 = vpop.f32.mrf.mxu1 }
 0x57a   : > { %v2517_v18 = vrot.slane %v2508_v15, %v6220_v30 }
 0x598   : > { %v1907_v19 = vpop.permute.xlu1 %1906 }
 0x599   : > { %1910 = vst.msk [vmem:[#allocation4] sm:$0xff] %vm1909_vm4, %v1907_v19 }
 0x5a4   : > { %v1961_v21 = vpop.permute.xlu0 %1960 }
 0x5a5   : > { %1964 = vst.msk [vmem:[#allocation4] sm:$0xff] %vm1963_vm5, %v1961_v21 }
 0x5a8   : > { %v2015_v17 = vpop.permute.xlu1 %2014 }
 0x5a9   : > { %2018 = vst.msk [vmem:[#allocation4] sm:$0xff] %vm2017_vm6, %v2015_v17 }
 0x5ac   : > { %v2069_v22 = vpop.permute.xlu0 %2068 }
 0x5ad   : > { %2072 = vst.msk [vmem:[#allocation4] sm:$0xff] %vm2071_vm7, %v2069_v22 }
 0x5d9   : > { %v2177_v24 = vpop.permute.xlu0 %2176 }
 0x5de   : > { %v2123_v23 = vpop.permute.xlu1 %2122 }
 0x5df   : > { %2126 = vst.msk [vmem:[#allocation4] sm:$0xff] %vm2125_vm8, %v2123_v23 }
 0x5e0   : > { %2180 = vst.msk [vmem:[#allocation4] sm:$0xff] %vm2179_vm9, %v2177_v24 }
 0x5e6   : > { %v2231_v25 = vpop.permute.xlu1 %2230 }
 0x5e7   : > { %2234 = vst.msk [vmem:[#allocation4] sm:$0xff] %vm2233_vm10, %v2231_v25 }
 0x5ee   : > { %v2235_v26 = vld [vmem:[#allocation4] sm:$0xff] }
 0x5ef   : > { %v2236_v27 = vpack.c.bf16 %v2235_v26, %v2235_v26 }
 0x5f1   : > { %4776 = vmatmul.mubr.bf16.vlgmr.msra.gmra.mxu0 %v2236_v27  ;;  %v4429_v27 = vld [vmem:[#allocation17] ss:$0 sm:$0xff] }
 0x5f2   : > { %2632 = vmatprep.mubr.bf16.mxu0 %v5817_v0  ;;  %2601 = vmatpush1.bf16.msra.mxu0 %v5161_v37 }
 0x5f3   : > { %2602 = vmatprep.subr.bf16.mxu0 %v5166_v39 }
 0x5f6   : > { %2603 = vmatpush1.bf16.msra.mxu0 %v5164_v40 }
 0x5f7   : > { %2604 = vmatprep.subr.bf16.mxu0 %v5169_v42 }
 0x5fa   : > { %2605 = vmatpush1.bf16.msra.mxu0 %v5167_v44 }
 0x5fb   : > { %2606 = vmatprep.subr.bf16.mxu0 %v5172_v45 }
 0x5fe   : > { %2607 = vmatpush1.bf16.msra.mxu0 %v5170_v46 }
 0x5ff   : > { %2608 = vmatprep.subr.bf16.mxu0 %v5175_v47 }
 0x602   : > { %2609 = vmatpush1.bf16.msra.mxu0 %v5173_v48 }
 0x603   : > { %2610 = vmatprep.subr.bf16.mxu0 %v5179_v50 }
 0x606   : > { %2611 = vmatpush1.bf16.msra.mxu0 %v5177_v51 }
 0x607   : > { %2612 = vmatprep.subr.bf16.mxu0 %v5183_v56 }
 0x60a   : > { %2613 = vmatpush1.bf16.msra.mxu0 %v5181_v57 }
 0x60b   : > { %2614 = vmatprep.subr.bf16.mxu0 %v5187_v60 }
 0x60e   : > { %2615 = vmatpush1.bf16.msra.mxu0 %v5185_v59 }
 0x60f   : > { %4823 = vmatprep.subr.bf16.mxu0 %v5818_v1 }
 0x611   : > { %2633 = vmatmul.mubr.bf16.vlgmr.msra.gmra.mxu0 %v2491_v63 }
 0x612   : > { %4825 = vmatprep.mubr.msk.bf16.mxu0 %vm5819_vm0, %v5818_v1 }
 0x6b1   : > { %v2342_v28 = vpop.f32.mrf.mxu0 }
 0x6b2   : > { %v2343_v29 = vadd.f32 %v4418_v20, %v2342_v28 }
 0x6b3   : > { %v4777_v32 = vpop.f32.mrf.mxu0 }
 0x6b4   : > { %v2348_v35 = vadd.f32 %v5311_v34, %v2343_v29 }
 0x6b5   : > { %v2345_v36 = vpop.f32.mrf.mxu0 }
 0x6b6   : > { %2351 = vadd.xlane.f32.xlu0 %v2348_v35 }
 0x6b7   : > { %v4778_v33 = vpop.f32.mrf.mxu0 }
 0x6d1   : > { %v2634_v19 = vpop.f32.mrf.mxu0 }
 0x6d2   : > { %v2635_v21 = vadd.f32 %v2634_v19, %v2513_v16 }
 0x6d3   : > { %v2636_v17 = vpop.f32.mrf.mxu0 }
 0x6d4   : > { %v2641_v22 = vpack.c.bf16 %v2635_v21, %v2635_v21  ;;  %v2637_v23 = vadd.f32 %v2636_v17, %v2517_v18 }
 0x6d5   : > { %v2638_v24 = vpop.f32.mrf.mxu0 }
 0x6d6   : > { %2694 = vrot.lane.b32.xlu0 %v2641_v22, %s6806_s9  ;;  %v2647_v25 = vsel %vm1281_vm1, %v2641_v22, 0  ;;  %v6479_v37 = vpack.c.bf16 %v2637_v23, %v2637_v23 }
 0x6d7   : > { %v2639_v26 = vpop.f32.mrf.mxu0 }
 0x6d8   : > { %v3178_v58 = vsel %vm1811_vm2, %v6479_v37, 0 }
 0x6da   : > { %2746 = vrot.lane.b32.xlu0 %v2641_v22, %s5820_s30 }
 0x6de   : > { %2798 = vrot.lane.b32.xlu0 %v2641_v22, %s5823_s0 }
 0x73f   : > { %v2352_v52 = vpop.xlane.xlu0 %2351 }
 0x740   : > { %v2354_v53 = vmul.f32 0.0078125, %v2352_v52 }
 0x742   : > { %v2355_v54 = vsub.f32 %v2348_v35, %v2354_v53 }
 0x744   : > { %v2356_v55 = vmul.f32 %v2355_v54, %v2355_v54 }
 0x746   : > { %2357 = vadd.xlane.f32.xlu1 %v2356_v55 }
 0x748   : > { %v2695_v34 = vpop.permute.xlu0 %2694 }
 0x749   : > { %v2700_v36 = vsel %vm1281_vm1, %v2695_v34, 0 }
 0x74c   : > { %v2747_v38 = vpop.permute.xlu0 %2746 }
 0x74d   : > { %v2752_v40 = vsel %vm1281_vm1, %v2747_v38, 0 }
 0x750   : > { %v2799_v41 = vpop.permute.xlu0 %2798 }
 0x751   : > { %v2804_v45 = vsel %vm1281_vm1, %v2799_v41, 0 }
 0x7cf   : > { %v2358_v6 = vpop.xlane.xlu1 %2357 }
 0x7d0   : > { %v2359_v7 = vmul.f32 0.0078125, %v2358_v6 }
 0x7d2   : > { %v2360_v8 = vadd.f32 1e-05, %v2359_v7 }
 0x7d4   : > { %5273 = vrsqrt.f32 %v2360_v8 }
 0x7e1   : > { %v5274_v9 = vpop.eup %5273 }
 0x7e2   : > { %v2362_v10 = vmul.f32 %v5274_v9, %v2355_v54 }
 0x7e4   : > { %v2369_v12 = vmul.f32 %v4427_v49, %v2362_v10 }
 0x7e6   : > { %v6450_v13 = vadd.f32 %v4428_v11, %v2369_v12 }
 0x7e8   : > { %v2378_v14 = vpack.c.bf16 %v6450_v13, %v6450_v13 }
 0x7ea   : > { %4796 = vmatmul.mubr.bf16.vlgmr.msra.gmra.mxu1 %v2378_v14 }
 0x7eb   : > { %4801 = vmatprep.mubr.msk.bf16.mxu1 %vm5819_vm0, %v5818_v1  ;;  %4800 = vmatpush3.bf16.xpose.msra.mxu1 %v2647_v25 }
 0x7ec   : > { %4805 = vmatprep.subr.bf16.mxu1 %v5818_v1 }
 0x8aa   : > { %v2484_v20 = vpop.f32.mrf.mxu1 }
 0x8ab   : > { %v2485_v28 = vadd.f32 %v4429_v27, %v2484_v20 }
 0x8ac   : > { %v4797_v29 = vpop.f32.mrf.mxu1 }
 0x8ad   : > { %v2490_v32 = vpack.c.bf16 %v2485_v28, %v2485_v28 }
 0x8ae   : > { %v2487_v35 = vpop.f32.mrf.mxu1 }
 0x8af   : > { %2796 = vrot.lane.b32.xlu0 %v2490_v32, %s5823_s0  ;;  %2691 = vrot.lane.b32.xlu1 %v2490_v32, %s6806_s9 }
 0x8b0   : > { %4802 = vmatmul.mubr.msk.bf16.vlgmr.msra.gmra.mxu1 %vm1281_vm1, %v2490_v32  ;;  %v4798_v33 = vpop.f32.mrf.mxu1 }
 0x8b1   : > { %4806 = vmatpush3.bf16.xpose.msra.mxu1 %v2700_v36  ;;  %4807 = vmatprep.mubr.msk.bf16.mxu1 %vm5819_vm0, %v5818_v1 }
 0x8b2   : > { %4811 = vmatprep.subr.bf16.mxu1 %v5818_v1 }
 0x8b3   : > { %2848 = vrot.lane.b32.xlu0 %v2490_v32, %s5822_s6  ;;  %2744 = vrot.lane.b32.xlu1 %v2490_v32, %s5820_s30 }
 0x8b7   : > { %2900 = vrot.lane.b32.xlu0 %v2490_v32, %s5824_s27  ;;  %2850 = vrot.lane.b32.xlu1 %v2641_v22, %s5822_s6 }
 0x8bb   : > { %2952 = vrot.lane.b32.xlu0 %v2490_v32, %s5825_s10  ;;  %2902 = vrot.lane.b32.xlu1 %v2641_v22, %s5824_s27 }
 0x8bf   : > { %2954 = vrot.lane.b32.xlu1 %v2641_v22, %s5825_s10 }
 0x8c3   : > { %3006 = vrot.lane.b32.xlu1 %v2641_v22, %s5826_s25 }
 0x8c7   : > { %3004 = vrot.lane.b32.xlu1 %v2490_v32, %s5826_s25 }
 0x8cb   : > { %3222 = vrot.lane.b32.xlu1 %v6479_v37, %s6806_s9 }
 0x921   : > { %v2692_v39 = vpop.permute.xlu1 %2691  ;;  %v2797_v43 = vpop.permute.xlu0 %2796 }
 0x922   : > { %4808 = vmatmul.mubr.msk.bf16.vlgmr.msra.gmra.mxu1 %vm1281_vm1, %v2692_v39 }
 0x923   : > { %4812 = vmatpush3.bf16.xpose.msra.mxu1 %v2752_v40  ;;  %4813 = vmatprep.mubr.msk.bf16.mxu1 %vm5819_vm0, %v5818_v1 }
 0x924   : > { %4817 = vmatprep.subr.bf16.mxu1 %v5818_v1 }
 0x925   : > { %v2745_v42 = vpop.permute.xlu1 %2744  ;;  %v2849_v47 = vpop.permute.xlu0 %2848 }
 0x929   : > { %v2851_v44 = vpop.permute.xlu1 %2850  ;;  %v2901_v53 = vpop.permute.xlu0 %2900 }
 0x92a   : > { %v2856_v46 = vsel %vm1281_vm1, %v2851_v44, 0  ;;  %4814 = vmatmul.mubr.msk.bf16.vlgmr.msra.gmra.mxu1 %vm1281_vm1, %v2745_v42 }
 0x92b   : > { %4818 = vmatpush3.bf16.xpose.msra.mxu1 %v2804_v45  ;;  %4824 = vmatpush3.bf16.xpose.msra.mxu0 %v2856_v46 }
 0x92c   : > { %4819 = vmatprep.mubr.msk.bf16.mxu1 %vm5819_vm0, %v5818_v1  ;;  %4829 = vmatprep.subr.bf16.mxu1 %v5818_v1 }
 0x92d   : > { %v2903_v48 = vpop.permute.xlu1 %2902  ;;  %4835 = vmatprep.subr.bf16.mxu0 %v5818_v1  ;;  %v2953_v55 = vpop.permute.xlu0 %2952 }
 0x92e   : > { %v2908_v51 = vsel %vm1281_vm1, %v2903_v48, 0 }
 0x931   : > { %v2955_v50 = vpop.permute.xlu1 %2954 }
 0x932   : > { %v2960_v52 = vsel %vm1281_vm1, %v2955_v50, 0  ;;  %4820 = vmatmul.mubr.msk.bf16.vlgmr.msra.gmra.mxu1 %vm1281_vm1, %v2797_v43  ;;  %4826 = vmatmul.mubr.msk.bf16.vlgmr.msra.gmra.mxu0 %vm1281_vm1, %v2849_v47 }
 0x933   : > { %4830 = vmatpush3.bf16.xpose.msra.mxu1 %v2908_v51  ;;  %4836 = vmatpush3.bf16.xpose.msra.mxu0 %v2960_v52 }
 0x934   : > { %4837 = vmatprep.mubr.msk.bf16.mxu0 %vm5819_vm0, %v5818_v1  ;;  %4831 = vmatprep.mubr.msk.bf16.mxu1 %vm5819_vm0, %v5818_v1 }
 0x935   : > { %v3007_v54 = vpop.permute.xlu1 %3006  ;;  %4841 = vmatprep.subr.bf16.mxu1 %v5818_v1  ;;  %4847 = vmatprep.subr.bf16.mxu0 %v5818_v1 }
 0x936   : > { %v3012_v57 = vsel %vm1281_vm1, %v3007_v54, 0 }
 0x939   : > { %v3005_v56 = vpop.permute.xlu1 %3004 }
 0x93a   : > { %4832 = vmatmul.mubr.msk.bf16.vlgmr.msra.gmra.mxu1 %vm1281_vm1, %v2901_v53  ;;  %4838 = vmatmul.mubr.msk.bf16.vlgmr.msra.gmra.mxu0 %vm1281_vm1, %v2953_v55 }
 0x93b   : > { %4842 = vmatpush3.bf16.xpose.msra.mxu1 %v3012_v57  ;;  %4848 = vmatpush3.bf16.msra.mxu0 %v3178_v58 }
 0x93c   : > { %4843 = vmatprep.mubr.msk.bf16.mxu1 %vm5819_vm0, %v5818_v1  ;;  %4853 = vmatprep.subr.bf16.mxu1 %v5818_v1 }
 0x93d   : > { %4849 = vmatprep.mubr.msk.bf16.mxu0 %vm5819_vm0, %v5818_v1  ;;  %4859 = vmatprep.subr.bf16.mxu0 %v5818_v1  ;;  %v3223_v59 = vpop.permute.xlu1 %3222 }
 0x93e   : > { %v3228_v60 = vsel %vm1811_vm2, %v3223_v59, 0 }
 0x942   : > { %4844 = vmatmul.mubr.msk.bf16.vlgmr.msra.gmra.mxu1 %vm1281_vm1, %v3005_v56 }
 0x943   : > { %4854 = vmatpush3.bf16.msra.mxu1 %v3228_v60  ;;  %4855 = vmatprep.mubr.msk.bf16.mxu1 %vm5819_vm0, %v5818_v1 }
 0x944   : > { %4865 = vmatprep.subr.bf16.mxu1 %v5818_v1 }
 0x970   : > { %v2683_v61 = vpop.f32.mrf.mxu1 }
 0x971   : > { %2689 = vst.msk [vmem:[#allocation3] sm:$0xff] %vm1328_vm3, %v2683_v61 }
 0x972   : > { %v4803_v62 = vpop.f32.mrf.mxu1 }
 0x974   : > { %v2686_v63 = vpop.f32.mrf.mxu1 }
 0x976   : > { %v4804_v3 = vpop.f32.mrf.mxu1 }
 0x978   : > { %v3056_v4 = vld [vmem:[#allocation3] sm:$0xff] }
 0x979   : > { %v6529_v5 = vadd.f32 %v6526_v2, %v3056_v4 }
 0x97b   : > { %v3078_v6 = vsel %vm1328_vm3, %v6529_v5, -inf }
 0x97c   : > { %3079 = vmax.xlane.f32.xlu0 %v3078_v6 }
 0x9e2   : > { %v2736_v7 = vpop.f32.mrf.mxu1 }
 0x9e3   : > { %2743 = vst.msk [vmem:[#allocation3 + $0x8] sm:$0xff] %vm1328_vm3, %v2736_v7 }
 0x9e4   : > { %v4809_v8 = vpop.f32.mrf.mxu1 }
 0x9e6   : > { %v2739_v9 = vpop.f32.mrf.mxu1 }
 0x9e8   : > { %v4810_v49 = vpop.f32.mrf.mxu1 }
 0x9ea   : > { %v2788_v10 = vpop.f32.mrf.mxu1  ;;  %v3057_v11 = vld [vmem:[#allocation3 + $0x8] sm:$0xff] }
 0x9eb   : > { %2795 = vst.msk [vmem:[#allocation3 + $0x10] sm:$0xff] %vm1328_vm3, %v2788_v10  ;;  %v6536_v12 = vadd.f32 %v6526_v2, %v3057_v11 }
 0x9ec   : > { %v4815_v14 = vpop.f32.mrf.mxu1 }
 0x9ed   : > { %v3081_v15 = vsel %vm1328_vm3, %v6536_v12, -inf }
 0x9ee   : > { %3082 = vmax.xlane.f32.xlu1 %v3081_v15  ;;  %v2791_v16 = vpop.f32.mrf.mxu1 }
 0x9f0   : > { %v4816_v18 = vpop.f32.mrf.mxu1 }
 0x9f2   : > { %v2840_v19 = vpop.f32.mrf.mxu1  ;;  %v2892_v21 = vpop.f32.mrf.mxu0  ;;  %v3058_v17 = vld [vmem:[#allocation3 + $0x10] sm:$0xff] }
 0x9f3   : > { %2847 = vst.msk [vmem:[#allocation3 + $0x18] sm:$0xff] %vm1328_vm3, %v2840_v19  ;;  %2899 = vst.msk [vmem:[#allocation3 + $0x20] sm:$0xff] %vm1328_vm3, %v2892_v21  ;;  %v6543_v22 = vadd.f32 %v6526_v2, %v3058_v17 }
 0x9f4   : > { %v4821_v23 = vpop.f32.mrf.mxu1  ;;  %v4827_v24 = vpop.f32.mrf.mxu0 }
 0x9f5   : > { %v3084_v25 = vsel %vm1328_vm3, %v6543_v22, -inf }
 0x9f6   : > { %v2895_v26 = vpop.f32.mrf.mxu0  ;;  %3085 = vmax.xlane.f32.xlu0 %v3084_v25  ;;  %v2843_v27 = vpop.f32.mrf.mxu1 }
 0x9f8   : > { %v4822_v20 = vpop.f32.mrf.mxu1  ;;  %v4828_v28 = vpop.f32.mrf.mxu0 }
 0x9fa   : > { %v2944_v29 = vpop.f32.mrf.mxu1  ;;  %v2996_v32 = vpop.f32.mrf.mxu0  ;;  %v3060_v34 = vld [vmem:[#allocation3 + $0x20] sm:$0xff]  ;;  %v3059_v35 = vld [vmem:[#allocation3 + $0x18] sm:$0xff] }
 0x9fb   : > { %2951 = vst.msk [vmem:[#allocation3 + $0x28] sm:$0xff] %vm1328_vm3, %v2944_v29  ;;  %3003 = vst.msk [vmem:[#allocation3 + $0x30] sm:$0xff] %vm1328_vm3, %v2996_v32  ;;  %v3074_v36 = vadd.f32 %v6526_v2, %v3060_v34  ;;  %v3073_v33 = vadd.f32 %v6526_v2, %v3059_v35 }
 0x9fc   : > { %v4833_v38 = vpop.f32.mrf.mxu1  ;;  %v4839_v39 = vpop.f32.mrf.mxu0 }
 0x9fd   : > { %v3090_v40 = vsel %vm1328_vm3, %v3074_v36, -inf  ;;  %v3087_v41 = vsel %vm1328_vm3, %v3073_v33, -inf }
 0x9fe   : > { %v2999_v42 = vpop.f32.mrf.mxu0  ;;  %3091 = vmax.xlane.f32.xlu1 %v3090_v40  ;;  %3088 = vmax.xlane.f32.xlu0 %v3087_v41  ;;  %v2947_v43 = vpop.f32.mrf.mxu1 }
 0xa00   : > { %v4834_v44 = vpop.f32.mrf.mxu1  ;;  %v4840_v45 = vpop.f32.mrf.mxu0 }
 0xa02   : > { %v3048_v46 = vpop.f32.mrf.mxu1  ;;  %v3062_v47 = vld [vmem:[#allocation3 + $0x30] sm:$0xff]  ;;  %v3061_v48 = vld [vmem:[#allocation3 + $0x28] sm:$0xff] }
 0xa03   : > { %3055 = vst.msk [vmem:[#allocation3 + $0x38] sm:$0xff] %vm1328_vm3, %v3048_v46  ;;  %v3076_v50 = vadd.f32 %v6526_v2, %v3062_v47  ;;  %v3075_v51 = vadd.f32 %v6526_v2, %v3061_v48 }
 0xa04   : > { %v4845_v52 = vpop.f32.mrf.mxu1 }
 0xa05   : > { %v3096_v53 = vsel %vm1328_vm3, %v3076_v50, -inf  ;;  %v3093_v54 = vsel %vm1328_vm3, %v3075_v51, -inf  ;;  %v3080_v60 = vpop.xlane.xlu0 %3079 }
 0xa06   : > { %3097 = vmax.xlane.f32.xlu1 %v3096_v53  ;;  %3094 = vmax.xlane.f32.xlu0 %v3093_v54  ;;  %v3051_v55 = vpop.f32.mrf.mxu1  ;;  %v3102_v61 = vsub.f32 %v6529_v5, %v3080_v60 }
 0xa08   : > { %v4846_v56 = vpop.f32.mrf.mxu1  ;;  %v3110_v62 = vmul.f32 1.442695, %v3102_v61 }
 0xa0a   : > { %v3063_v57 = vld [vmem:[#allocation3 + $0x38] sm:$0xff]  ;;  %5275 = vpow2.f32 %v3110_v62 }
 0xa0b   : > { %v3077_v58 = vadd.f32 %v6526_v2, %v3063_v57 }
 0xa0d   : > { %v3099_v59 = vsel %vm1328_vm3, %v3077_v58, -inf }
 0xa0e   : > { %3100 = vmax.xlane.f32.xlu0 %v3099_v59 }
 0xa17   : > { %3328 = vrot.lane.b32.xlu1 %v6479_v37, %s5823_s0  ;;  %v5276_v63 = vpop.eup %5275 }
 0xa18   : > { %v3126_v3 = vsel %vm1328_vm3, %v5276_v63, 0.0 }
 0xa24   : > { %3275 = vrot.lane.b32.xlu0 %v6479_v37, %s5820_s30 }
 0xa3b   : > { %3127 = vadd.xlane.f32.xlu1 %v3126_v3 }
 0xa77   : > { %v3083_v4 = vpop.xlane.xlu1 %3082 }
 0xa78   : > { %v3103_v2 = vsub.f32 %v6536_v12, %v3083_v4 }
 0xa7a   : > { %v3112_v6 = vmul.f32 1.442695, %v3103_v2 }
 0xa7c   : > { %5277 = vpow2.f32 %v3112_v6 }
 0xa7f   : > { %v3086_v7 = vpop.xlane.xlu0 %3085 }
 0xa80   : > { %v3104_v8 = vsub.f32 %v6543_v22, %v3086_v7 }
 0xa82   : > { %v3114_v14 = vmul.f32 1.442695, %v3104_v8 }
 0xa87   : > { %v3092_v9 = vpop.xlane.xlu1 %3091  ;;  %v3089_v49 = vpop.xlane.xlu0 %3088 }
 0xa88   : > { %v3106_v5 = vsub.f32 %v3074_v36, %v3092_v9  ;;  %v3105_v10 = vsub.f32 %v3073_v33, %v3089_v49 }
 0xa89   : > { %v5278_v11 = vpop.eup %5277 }
 0xa8a   : > { %v3118_v15 = vmul.f32 1.442695, %v3106_v5  ;;  %v3116_v16 = vmul.f32 1.442695, %v3105_v10  ;;  %v3129_v18 = vsel %vm1328_vm3, %v5278_v11, 0.0 }
 0xa8b   : > { %3130 = vadd.xlane.f32.xlu0 %v3129_v18 }
 0xa8c   : > { %5279 = vpow2.f32 %v3118_v15 }
 0xa8d   : > { %5281 = vpow2.f32 %v3116_v16 }
 0xa8e   : > { %5283 = vpow2.f32 %v3114_v14 }
 0xa8f   : > { %v3095_v24 = vpop.xlane.xlu0 %3094  ;;  %v3098_v25 = vpop.xlane.xlu1 %3097 }
 0xa90   : > { %v3107_v26 = vsub.f32 %v3075_v51, %v3095_v24  ;;  %v3108_v20 = vsub.f32 %v3076_v50, %v3098_v25 }
 0xa92   : > { %v3120_v28 = vmul.f32 1.442695, %v3107_v26  ;;  %v3122_v32 = vmul.f32 1.442695, %v3108_v20 }
 0xa93   : > { %v3329_v34 = vpop.permute.xlu1 %3328 }
 0xa94   : > { %5285 = vpow2.f32 %v3120_v28  ;;  %v3334_v55 = vsel %vm1811_vm2, %v3329_v34, 0  ;;  %v5193_v34 = vld [vmem:[#allocation22 + $0x38] sm:$0xff]  }
 0xa95   : > { %5287 = vpow2.f32 %v3122_v32 }
 0xa97   : > { %v3101_v27 = vpop.xlane.xlu0 %3100 }
 0xa98   : > { %v3109_v29 = vsub.f32 %v3077_v58, %v3101_v27 }
 0xa99   : > { %v6569_v12 = vpop.eup %5279 }
 0xa9a   : > { %v5282_v19 = vpop.eup %5281  ;;  %v3138_v21 = vsel %vm1328_vm3, %v6569_v12, 0.0  ;;  %v3124_v35 = vmul.f32 1.442695, %v3109_v29 }
 0xa9b   : > { %v6573_v17 = vpop.eup %5283  ;;  %3139 = vadd.xlane.f32.xlu1 %v3138_v21  ;;  %v3135_v22 = vsel %vm1328_vm3, %v5282_v19, 0.0  ;;  %v3276_v44 = vpop.permute.xlu0 %3275 }
 0xa9c   : > { %3136 = vadd.xlane.f32.xlu0 %v3135_v22  ;;  %v3132_v23 = vsel %vm1328_vm3, %v6573_v17, 0.0  ;;  %5289 = vpow2.f32 %v3124_v35  ;;  %v3281_v47 = vsel %vm1811_vm2, %v3276_v44, 0  ;;  %v5196_v44 = vld [vmem:[#allocation22 + $0x20] sm:$0xff]  }
 0xa9f   : > { %3133 = vadd.xlane.f32.xlu1 %v3132_v23 }
 0xaa1   : > { %v6582_v33 = vpop.eup %5285 }
 0xaa2   : > { %v6584_v38 = vpop.eup %5287  ;;  %v3141_v39 = vsel %vm1328_vm3, %v6582_v33, 0.0 }
 0xaa3   : > { %v3144_v42 = vsel %vm1328_vm3, %v6584_v38, 0.0 }
 0xaa9   : > { %v6588_v40 = vpop.eup %5289 }
 0xaaa   : > { %v3147_v45 = vsel %vm1328_vm3, %v6588_v40, 0.0 }
 0xab0   : > { %3381 = vrot.lane.b32.xlu1 %v6479_v37, %s5822_s6 }
 0xab2   : > { %3434 = vrot.lane.b32.xlu0 %v6479_v37, %s5824_s27 }
 0xac4   : > { %v3128_v36 = vpop.xlane.xlu1 %3127 }
 0xac5   : > { %5291 = vrcp.f32 %v3128_v36  ;;  %v5194_v36 = vld [vmem:[#allocation22 + $0x30] sm:$0xff]  }
 0xad1   : > { %3142 = vadd.xlane.f32.xlu0 %v3141_v39 }
 0xad2   : > { %v5292_v41 = vpop.eup %5291 }
 0xad3   : > { %v3151_v43 = vmul.f32 %v5292_v41, %v5276_v63 }
 0xad4   : > { %3145 = vadd.xlane.f32.xlu1 %v3144_v42 }
 0xad5   : > { %3148 = vadd.xlane.f32.xlu0 %v3147_v45  ;;  %v3166_v46 = vpack.c.bf16 %v3151_v43, %v3151_v43 }
 0xad7   : > { %4850 = vmatmul.mubr.msk.bf16.vlgmr.msra.gmra.mxu0 %vm1328_vm3, %v3166_v46 }
 0xad8   : > { %4860 = vmatpush3.bf16.msra.mxu0 %v3281_v47  ;;  %4861 = vmatprep.mubr.msk.bf16.mxu0 %vm5819_vm0, %v5818_v1 }
 0xad9   : > { %4871 = vmatprep.subr.bf16.mxu0 %v5818_v1 }
 0xae5   : > { %3487 = vrot.lane.b32.xlu1 %v6479_v37, %s5825_s10 }
 0xaeb   : > { %3540 = vrot.lane.b32.xlu0 %v6479_v37, %s5826_s25 }
 0xb14   : > { %v3131_v48 = vpop.xlane.xlu0 %3130 }
 0xb15   : > { %5293 = vrcp.f32 %v3131_v48 }
 0xb22   : > { %v5294_v50 = vpop.eup %5293 }
 0xb23   : > { %v3153_v51 = vmul.f32 %v5294_v50, %v5278_v11  ;;  %v5197_v50 = vld [vmem:[#allocation22 + $0x18] sm:$0xff]  }
 0xb24   : > { %v3140_v52 = vpop.xlane.xlu1 %3139 }
 0xb25   : > { %v3137_v53 = vpop.xlane.xlu0 %3136  ;;  %v3167_v54 = vpack.c.bf16 %v3153_v51, %v3153_v51  ;;  %v5198_v51 = vld [vmem:[#allocation22 + $0x10] sm:$0xff]  }
 0xb26   : > { %5295 = vrcp.f32 %v3137_v53  ;;  %v5200_v53 = vld [vmem:[#allocation22] sm:$0xff]  }
 0xb27   : > { %4856 = vmatmul.mubr.msk.bf16.vlgmr.msra.gmra.mxu1 %vm1328_vm3, %v3167_v54 }
 0xb28   : > { %4866 = vmatpush3.bf16.msra.mxu1 %v3334_v55  ;;  %v3134_v56 = vpop.xlane.xlu1 %3133  ;;  %4867 = vmatprep.mubr.msk.bf16.mxu1 %vm5819_vm0, %v5818_v1 }
 0xb29   : > { %5297 = vrcp.f32 %v3134_v56  ;;  %4877 = vmatprep.subr.bf16.mxu1 %v5818_v1  ;;  %v3435_v58 = vpop.permute.xlu0 %3434 }
 0xb2a   : > { %5299 = vrcp.f32 %v3140_v52  ;;  %v3440_v62 = vsel %vm1811_vm2, %v3435_v58, 0  ;;  %v5199_v52 = vld [vmem:[#allocation22 + $0x8] sm:$0xff]  }
 0xb2c   : > { %v3382_v63 = vpop.permute.xlu1 %3381 }
 0xb2d   : > { %v3387_v2 = vsel %vm1811_vm2, %v3382_v63, 0 }
 0xb33   : > { %v5296_v37 = vpop.eup %5295 }
 0xb34   : > { %v3157_v57 = vmul.f32 %v5296_v37, %v5282_v19 }
 0xb36   : > { %v5298_v59 = vpop.eup %5297  ;;  %v3169_v60 = vpack.c.bf16 %v3157_v57, %v3157_v57 }
 0xb37   : > { %v3155_v61 = vmul.f32 %v5298_v59, %v6573_v17  ;;  %v5300_v4 = vpop.eup %5299 }
 0xb38   : > { %4868 = vmatmul.mubr.msk.bf16.vlgmr.msra.gmra.mxu1 %vm1328_vm3, %v3169_v60  ;;  %v3159_v6 = vmul.f32 %v5300_v4, %v6569_v12 }
 0xb39   : > { %4878 = vmatpush3.bf16.msra.mxu1 %v3440_v62  ;;  %v3168_v3 = vpack.c.bf16 %v3155_v61, %v3155_v61  ;;  %4879 = vmatprep.mubr.msk.bf16.mxu1 %vm5819_vm0, %v5818_v1 }
 0xb3a   : > { %4889 = vmatprep.subr.bf16.mxu1 %v5818_v1  ;;  %v3170_v7 = vpack.c.bf16 %v3159_v6, %v3159_v6 }
 0xb3b   : > { %4862 = vmatmul.mubr.msk.bf16.vlgmr.msra.gmra.mxu0 %vm1328_vm3, %v3168_v3 }
 0xb3c   : > { %4872 = vmatpush3.bf16.msra.mxu0 %v3387_v2  ;;  %4873 = vmatprep.mubr.msk.bf16.mxu0 %vm5819_vm0, %v5818_v1 }
 0xb3d   : > { %4883 = vmatprep.subr.bf16.mxu0 %v5818_v1 }
 0xb43   : > { %4874 = vmatmul.mubr.msk.bf16.vlgmr.msra.gmra.mxu0 %vm1328_vm3, %v3170_v7 }
 0xb44   : > { %4885 = vmatprep.mubr.msk.bf16.mxu0 %vm5819_vm0, %v5818_v1 }
 0xb5a   : > { %v3143_v8 = vpop.xlane.xlu0 %3142 }
 0xb5b   : > { %5301 = vrcp.f32 %v3143_v8 }
 0xb5d   : > { %v3146_v9 = vpop.xlane.xlu1 %3145 }
 0xb5e   : > { %5303 = vrcp.f32 %v3146_v9  ;;  %v3149_v49 = vpop.xlane.xlu0 %3148 }
 0xb5f   : > { %5305 = vrcp.f32 %v3149_v49 }
 0xb61   : > { %v3488_v5 = vpop.permute.xlu1 %3487 }
 0xb62   : > { %v3493_v10 = vsel %vm1811_vm2, %v3488_v5, 0  ;;  %v3541_v15 = vpop.permute.xlu0 %3540 }
 0xb63   : > { %4884 = vmatpush3.bf16.msra.mxu0 %v3493_v10  ;;  %v3546_v21 = vsel %vm1811_vm2, %v3541_v15, 0  ;;  %v4471_v10 = vld [vmem:[#allocation23] ss:$0 sm:$0xff] }
 0xb64   : > { %4895 = vmatprep.subr.bf16.mxu0 %v5818_v1 }
 0xb68   : > { %v5302_v11 = vpop.eup %5301 }
 0xb69   : > { %v3161_v14 = vmul.f32 %v5302_v11, %v6582_v33 }
 0xb6b   : > { %v5304_v16 = vpop.eup %5303  ;;  %v3171_v18 = vpack.c.bf16 %v3161_v14, %v3161_v14 }
 0xb6c   : > { %v5306_v12 = vpop.eup %5305  ;;  %v3163_v19 = vmul.f32 %v5304_v16, %v6584_v38 }
 0xb6d   : > { %4880 = vmatmul.mubr.msk.bf16.vlgmr.msra.gmra.mxu1 %vm1328_vm3, %v3171_v18  ;;  %v3165_v22 = vmul.f32 %v5306_v12, %v6588_v40  ;;  %v5195_v40 = vld [vmem:[#allocation22 + $0x28] sm:$0xff]  }
 0xb6e   : > { %4890 = vmatpush3.bf16.msra.mxu1 %v3546_v21  ;;  %v3172_v17 = vpack.c.bf16 %v3163_v19, %v3163_v19  ;;  %4891 = vmatprep.mubr.msk.bf16.mxu1 %vm5819_vm0, %v5818_v1  ;;  %v5201_v19 = vld [vmem:[#allocation26 + $0x70] ss:$8 sps:$4 sm:$0xff]   ;;  %v5203_v21 = vld [vmem:[#allocation26 + $0x74] ss:$8 sps:$4 sm:$0xff]  }
 0xb6f   : > { %v3173_v23 = vpack.c.bf16 %v3165_v22, %v3165_v22  ;;  %3843 = vmatprep.subr.bf16.mxu1 %v5203_v21  ;;  %v5204_v22 = vld [vmem:[#allocation26 + $0x60] ss:$8 sps:$4 sm:$0xff]  }
 0xb70   : > { %4886 = vmatmul.mubr.msk.bf16.vlgmr.msra.gmra.mxu0 %vm1328_vm3, %v3172_v17  ;;  %v5206_v17 = vld [vmem:[#allocation26 + $0x64] ss:$8 sps:$4 sm:$0xff]  }
 0xb71   : > { %4911 = vmatprep.mubr.msk.bf16.mxu0 %vm5819_vm0, %v5818_v1  ;;  %4896 = vmatpush3.bf16.msra.mxu0 %v5193_v34  ;;  %v5218_v34 = vld [vmem:[#allocation26 + $0x24] ss:$8 sps:$4 sm:$0xff]  }
 0xb72   : > { %4897 = vmatprep.subr.bf16.mxu0 %v5818_v1 }
 0xb75   : > { %4892 = vmatmul.mubr.msk.bf16.vlgmr.msra.gmra.mxu1 %vm1328_vm3, %v3173_v23  ;;  %4898 = vmatpush3.bf16.msra.mxu0 %v5194_v36  ;;  %v5221_v36 = vld [vmem:[#allocation26 + $0x14] ss:$8 sps:$4 sm:$0xff]  }
 0xb76   : > { %3875 = vmatprep.mubr.bf16.mxu1 %v5817_v0  ;;  %4899 = vmatprep.subr.bf16.mxu0 %v5818_v1 }
 0xb77   : > { %3844 = vmatpush1.bf16.msra.mxu1 %v5201_v19 }
 0xb78   : > { %3845 = vmatprep.subr.bf16.mxu1 %v5206_v17 }
 0xb79   : > { %4900 = vmatpush3.bf16.msra.mxu0 %v5195_v40  ;;  %v5226_v40 = vld [vmem:[#allocation28 + $0x38] sm:$0xff]  }
 0xb7a   : > { %4901 = vmatprep.subr.bf16.mxu0 %v5818_v1 }
 0xb7b   : > { %3846 = vmatpush1.bf16.msra.mxu1 %v5204_v22 }
 0xb7d   : > { %4902 = vmatpush3.bf16.msra.mxu0 %v5196_v44  ;;  %v5230_v44 = vld [vmem:[#allocation28 + $0x28] sm:$0xff]  }
 0xb7e   : > { %4903 = vmatprep.subr.bf16.mxu0 %v5818_v1 }
 0xb81   : > { %4904 = vmatpush3.bf16.msra.mxu0 %v5197_v50  ;;  %v5235_v50 = vld [vmem:[#allocation28 + $0x50] sm:$0xff]  }
 0xb82   : > { %4905 = vmatprep.subr.bf16.mxu0 %v5818_v1 }
 0xb85   : > { %4906 = vmatpush3.bf16.msra.mxu0 %v5198_v51  ;;  %v5236_v51 = vld [vmem:[#allocation28 + $0x10] sm:$0xff]  }
 0xb86   : > { %4907 = vmatprep.subr.bf16.mxu0 %v5818_v1 }
 0xb89   : > { %4908 = vmatpush3.bf16.msra.mxu0 %v5199_v52 }
 0xb8a   : > { %4909 = vmatprep.subr.bf16.mxu0 %v5818_v1 }
 0xb8d   : > { %4910 = vmatpush3.bf16.msra.mxu0 %v5200_v53 }
 0xb97   : > { %v3214_v24 = vpop.f32.mrf.mxu0 }
 0xb98   : > { %3220 = vst.msk [vmem:[#allocation4] sm:$0xff] %vm1281_vm1, %v3214_v24 }
 0xb99   : > { %v4851_v25 = vpop.f32.mrf.mxu0 }
 0xb9b   : > { %v3217_v26 = vpop.f32.mrf.mxu0 }
 0xb9d   : > { %v4852_v27 = vpop.f32.mrf.mxu0 }
 0xb9e   : > { %v5209_v27 = vld [vmem:[#allocation26 + $0x54] ss:$8 sps:$4 sm:$0xff]  }
 0xb9f   : > { %3847 = vmatprep.subr.bf16.mxu1 %v5209_v27 }
 0xbe7   : > { %v3264_v20 = vpop.f32.mrf.mxu1 }
 0xbe8   : > { %3271 = vrot.lane.b32.xlu1 %v3264_v20, %s5826_s25  ;;  %v5207_v20 = vld [vmem:[#allocation26 + $0x50] ss:$8 sps:$4 sm:$0xff]   ;;  %s990_s25 = sand.u32 1, %s5786_s2  }
 0xbe9   : > { %v4857_v28 = vpop.f32.mrf.mxu1  ;;  %3848 = vmatpush1.bf16.msra.mxu1 %v5207_v20 }
 0xbea   : > { %v5212_v28 = vld [vmem:[#allocation26 + $0x44] ss:$8 sps:$4 sm:$0xff]  }
 0xbeb   : > { %v3267_v29 = vpop.f32.mrf.mxu1  ;;  %3849 = vmatprep.subr.bf16.mxu1 %v5212_v28  ;;  %v4515_v28 = vld [vmem:[%s6734_s23] ss:$0 sm:$0xff] }
 0xbec   : > { %v5215_v29 = vld [vmem:[#allocation26 + $0x34] ss:$8 sps:$4 sm:$0xff]  }
 0xbed   : > { %v4858_v32 = vpop.f32.mrf.mxu1 }
 0xbee   : > { %v5213_v32 = vld [vmem:[#allocation26 + $0x30] ss:$8 sps:$4 sm:$0xff]  }
 0xbf8   : > { %v3370_v35 = vpop.f32.mrf.mxu1 }
 0xbf9   : > { %3377 = vrot.lane.b32.xlu1 %v3370_v35, %s5824_s27  ;;  %v5216_v35 = vld [vmem:[#allocation26 + $0x20] ss:$8 sps:$4 sm:$0xff]  }
 0xbfa   : > { %v4869_v33 = vpop.f32.mrf.mxu1 }
 0xbfb   : > { %v3317_v0 = vpop.f32.mrf.mxu0  ;;  %v5219_v33 = vld [vmem:[#allocation26 + $0x10] ss:$8 sps:$4 sm:$0xff]  }
 0xbfc   : > { %v3373_v38 = vpop.f32.mrf.mxu1  ;;  %3324 = vrot.lane.b32.xlu0 %v3317_v0, %s5825_s10  ;;  %v5224_v0 = vld [vmem:[#allocation26 + $0x4] ss:$8 sps:$4 sm:$0xff]   ;;  %s4093_s10 = scalar_lea.sflag [#allocation7], %s990_s25 }
 0xbfd   : > { %v4863_v39 = vpop.f32.mrf.mxu0  ;;  %v5222_v38 = vld [vmem:[#allocation26] ss:$8 sps:$4 sm:$0xff]  }
 0xbfe   : > { %v4870_v41 = vpop.f32.mrf.mxu1  ;;  %v5225_v39 = vld [vmem:[#allocation28 + $0x78] sm:$0xff]  }
 0xbff   : > { %v3320_v42 = vpop.f32.mrf.mxu0  ;;  %v5227_v41 = vld [vmem:[#allocation28 + $0x70] sm:$0xff]   ;;  %4621 = vmatprep.subr.bf16.mxu0 %v5225_v39 }
 0xc00   : > { %v5228_v42 = vld [vmem:[#allocation28 + $0x30] sm:$0xff]  }
 0xc01   : > { %v4864_v43 = vpop.f32.mrf.mxu0 }
 0xc02   : > { %v5229_v43 = vld [vmem:[#allocation28 + $0x68] sm:$0xff]  }
 0xc03   : > { %v3423_v45 = vpop.f32.mrf.mxu0 }
 0xc04   : > { %3430 = vrot.lane.b32.xlu0 %v3423_v45, %s5822_s6  ;;  %v5231_v45 = vld [vmem:[#allocation28 + $0x60] sm:$0xff]  }
 0xc05   : > { %v4875_v46 = vpop.f32.mrf.mxu0 }
 0xc06   : > { %v5232_v46 = vld [vmem:[#allocation28 + $0x20] sm:$0xff]  }
 0xc07   : > { %v3426_v47 = vpop.f32.mrf.mxu0 }
 0xc08   : > { %v5233_v47 = vld [vmem:[#allocation28 + $0x58] sm:$0xff]  }
 0xc09   : > { %v4876_v48 = vpop.f32.mrf.mxu0 }
 0xc0a   : > { %v5234_v48 = vld [vmem:[#allocation28 + $0x18] sm:$0xff]  }
 0xc2d   : > { %v3476_v54 = vpop.f32.mrf.mxu1 }
 0xc2e   : > { %3483 = vrot.lane.b32.xlu1 %v3476_v54, %s5823_s0  ;;  %s6811_s0 = sld [smem:[#allocation58_spill]] }
 0xc2f   : > { %v4881_v55 = vpop.f32.mrf.mxu1 }
 0xc30   : > { %v3529_v56 = vpop.f32.mrf.mxu0 }
 0xc31   : > { %v3479_v37 = vpop.f32.mrf.mxu1  ;;  %3536 = vrot.lane.b32.xlu0 %v3529_v56, %s5820_s30  ;;  %v4480_v56 = vld [vmem:[%s6728_s17] ss:$0 sm:$0xff] }
 0xc32   : > { %v4887_v57 = vpop.f32.mrf.mxu0 }
 0xc33   : > { %v4882_v58 = vpop.f32.mrf.mxu1  ;;  %v4481_v57 = vld [vmem:[#allocation25] ss:$0 sm:$0xff] }
 0xc34   : > { %v3532_v59 = vpop.f32.mrf.mxu0  ;;  %s4104_s27 = scalar_lea.hbm %s6811_s0, %s4518_s1 }
 0xc35   : > { %v3582_v60 = vpop.f32.mrf.mxu1 }
 0xc36   : > { %3589 = vrot.lane.b32.xlu1 %v3582_v60, %s6806_s9  ;;  %v4888_v61 = vpop.f32.mrf.mxu0  ;;  %s4374_s9 = sshll.u32 %s990_s25, 3 }
 0xc37   : > { %v4893_v62 = vpop.f32.mrf.mxu1  ;;  %v5237_v61 = vld [vmem:[#allocation28 + $0x48] sm:$0xff]   ;;  %s992_s29 = scalar_lea.vmem [#allocation29], %s4374_s9 }
 0xc38   : > { %v5238_v62 = vld [vmem:[#allocation28 + $0x8] sm:$0xff]   ;;  %s4106_s26 = sshll.u32 %s992_s29, 4  ;;  %s4107_s26 = int_to_ptr.vmem [resolvable:$true] %s4106_s26 }
 0xc39   : > { %v3585_v63 = vpop.f32.mrf.mxu1  ;;  %s5702_s11 = scalar_lea.vmem %s4107_s26, 128  ;;  %p5709_p9 = scmp.lt.s32.totalorder %s4107_s26, %s5707_s28 }
 0xc3a   : > { %v5239_v63 = vld [vmem:[#allocation28 + $0x40] sm:$0xff]   ;;  %p5703_p0 = scmp.ne.s32.totalorder %s4107_s26, %s5702_s11  ;;  %p5710_p3 = scmp.lt.s32.totalorder %s5708_s7, %s5702_s11 }
 0xc3b   : > { %v4894_v3 = vpop.f32.mrf.mxu1 }
 0xc3c   : > { %v5240_v3 = vld [vmem:[#allocation28] sm:$0xff]   ;;  %p5704_p12 = pnand %p5703_p0, %p6812_p1  ;;  %p5711_p5 = por %p5710_p3, %p5709_p9 }
 0xc3e   : > { %p5705_p2 = pneg %p5704_p12 }
 0xc40   : > { %p5712_p6 = pnand %p5711_p5, %p5705_p2 }
 0xc5a   : > { %v3272_v1 = vpop.permute.xlu1 %3271 }
 0xc5b   : > { %3274 = vst.msk [vmem:[#allocation4] sm:$0xff] %vm1909_vm4, %v3272_v1  ;;  %v3751_v1 = vld [vmem:[%s6731_s20] sm:$0x3] }
 0xc6b   : > { %v3378_v2 = vpop.permute.xlu1 %3377 }
 0xc6e   : > { %v3325_v4 = vpop.permute.xlu0 %3324 }
 0xc6f   : > { %3327 = vst.msk [vmem:[#allocation4] sm:$0xff] %vm1963_vm5, %v3325_v4  ;;  %v3756_v4 = vrot.slane %v3751_v1, %v6222_v31 }
 0xc70   : > { %3380 = vst.msk [vmem:[#allocation4] sm:$0xff] %vm2017_vm6, %v3378_v2  ;;  %v3760_v2 = vrot.slane %v3751_v1, %v6220_v30 }
 0xc76   : > { %v3431_v6 = vpop.permute.xlu0 %3430 }
 0xc77   : > { %3433 = vst.msk [vmem:[#allocation4] sm:$0xff] %vm2071_vm7, %v3431_v6 }
 0xca0   : > { %v3484_v7 = vpop.permute.xlu1 %3483 }
 0xca1   : > { %3486 = vst.msk [vmem:[#allocation4] sm:$0xff] %vm2125_vm8, %v3484_v7 }
 0xca3   : > { %v3537_v8 = vpop.permute.xlu0 %3536 }
 0xca4   : > { %3539 = vst.msk [vmem:[#allocation4] sm:$0xff] %vm2179_vm9, %v3537_v8 }
 0xca8   : > { %v3590_v9 = vpop.permute.xlu1 %3589 }
 0xca9   : > { %3592 = vst.msk [vmem:[#allocation4] sm:$0xff] %vm2233_vm10, %v3590_v9 }
 0xcb0   : > { %v3593_v49 = vld [vmem:[#allocation4] sm:$0xff] }
 0xcb1   : > { %v3594_v5 = vpack.c.bf16 %v3593_v49, %v3593_v49 }
 0xcb3   : > { %4912 = vmatmul.mubr.bf16.vlgmr.msra.gmra.mxu0 %v3594_v5 }
 0xcb4   : > { %4622 = vmatpush3.bf16.msra.mxu0 %v5226_v40 }
 0xcb5   : > { %4623 = vmatprep.subr.bf16.mxu0 %v5227_v41 }
 0xcb8   : > { %4624 = vmatpush3.bf16.msra.mxu0 %v5228_v42 }
 0xcb9   : > { %4625 = vmatprep.subr.bf16.mxu0 %v5229_v43 }
 0xcbc   : > { %4626 = vmatpush3.bf16.msra.mxu0 %v5230_v44 }
 0xcbd   : > { %4627 = vmatprep.subr.bf16.mxu0 %v5231_v45 }
 0xcc0   : > { %4628 = vmatpush3.bf16.msra.mxu0 %v5232_v46 }
 0xcc1   : > { %4629 = vmatprep.subr.bf16.mxu0 %v5233_v47 }
 0xcc4   : > { %4630 = vmatpush3.bf16.msra.mxu0 %v5234_v48 }
 0xcc5   : > { %4631 = vmatprep.subr.bf16.mxu0 %v5235_v50 }
 0xcc8   : > { %4632 = vmatpush3.bf16.msra.mxu0 %v5236_v51 }
 0xcc9   : > { %4633 = vmatprep.subr.bf16.mxu0 %v5237_v61 }
 0xccc   : > { %4634 = vmatpush3.bf16.msra.mxu0 %v5238_v62 }
 0xccd   : > { %4635 = vmatprep.subr.bf16.mxu0 %v5239_v63 }
 0xcd0   : > { %4636 = vmatpush3.bf16.msra.mxu0 %v5240_v3 }
 0xd73   : > { %v3700_v11 = vpop.f32.mrf.mxu0 }
 0xd74   : > { %v3701_v14 = vadd.f32 %v4471_v10, %v3700_v11 }
 0xd75   : > { %v4913_v15 = vpop.f32.mrf.mxu0 }
 0xd76   : > { %v3706_v16 = vadd.f32 %v3701_v14, %v6450_v13  ;;  %v5210_v13 = vld [vmem:[#allocation26 + $0x40] ss:$8 sps:$4 sm:$0xff]  }
 0xd77   : > { %v3703_v18 = vpop.f32.mrf.mxu0  ;;  %3850 = vmatpush1.bf16.msra.mxu1 %v5210_v13 }
 0xd78   : > { %3709 = vadd.xlane.f32.xlu0 %v3706_v16  ;;  %3851 = vmatprep.subr.bf16.mxu1 %v5215_v29  ;;  %v4498_v18 = vld [vmem:[%s6733_s22] ss:$0 sm:$0xff] }
 0xd79   : > { %v4914_v12 = vpop.f32.mrf.mxu0 }
 0xd7b   : > { %3852 = vmatpush1.bf16.msra.mxu1 %v5213_v32  ;;  %v4516_v32 = vld [vmem:[%s6810_s3] ss:$0 sm:$0xff] }
 0xd7c   : > { %3853 = vmatprep.subr.bf16.mxu1 %v5218_v34 }
 0xd7f   : > { %3854 = vmatpush1.bf16.msra.mxu1 %v5216_v35 }
 0xd80   : > { %3855 = vmatprep.subr.bf16.mxu1 %v5221_v36 }
 0xd83   : > { %3856 = vmatpush1.bf16.msra.mxu1 %v5219_v33 }
 0xd84   : > { %3857 = vmatprep.subr.bf16.mxu1 %v5224_v0 }
 0xd87   : > { %3858 = vmatpush1.bf16.msra.mxu1 %v5222_v38 }
 0xe01   : > { %v3710_v23 = vpop.xlane.xlu0 %3709 }
 0xe02   : > { %v3711_v24 = vmul.f32 0.0078125, %v3710_v23 }
 0xe04   : > { %v3712_v25 = vsub.f32 %v3706_v16, %v3711_v24 }
 0xe06   : > { %v3713_v26 = vmul.f32 %v3712_v25, %v3712_v25 }
 0xe08   : > { %3714 = vadd.xlane.f32.xlu1 %v3713_v26 }
 0xe91   : > { %v3715_v52 = vpop.xlane.xlu1 %3714 }
 0xe92   : > { %v3716_v53 = vmul.f32 0.0078125, %v3715_v52 }
 0xe94   : > { %v3717_v54 = vadd.f32 1e-05, %v3716_v53 }
 0xe96   : > { %5307 = vrsqrt.f32 %v3717_v54 }
 0xea3   : > { %v5308_v55 = vpop.eup %5307 }
 0xea4   : > { %v3719_v37 = vmul.f32 %v5308_v55, %v3712_v25 }
 0xea6   : > { %v3726_v58 = vmul.f32 %v4480_v56, %v3719_v37 }
 0xea8   : > { %v3733_v59 = vadd.f32 %v4481_v57, %v3726_v58 }
 0xeaa   : > { %v3734_v60 = vpack.c.bf16 %v3733_v59, %v3733_v59 }
 0xeac   : > { %3876 = vmatmul.mubr.bf16.vlgmr.msra.gmra.mxu1 %v3734_v60 }
 0xf6c   : > { %v3877_v6 = vpop.f32.mrf.mxu1 }
 0xf6d   : > { %v3878_v7 = vadd.f32 %v3877_v6, %v3756_v4 }
 0xf6e   : > { %v3879_v8 = vpop.f32.mrf.mxu1 }
 0xf6f   : > { %v3880_v9 = vadd.f32 %v3879_v8, %v3760_v2  ;;  %v3884_v49 = vmax.f32 %v3878_v7, 0.0 }
 0xf70   : > { %v3881_v5 = vpop.f32.mrf.mxu1 }
 0xf71   : > { %v3885_v10 = vmax.f32 %v3880_v9, 0.0  ;;  %v3886_v15 = vpack.c.bf16 %v3884_v49, %v3884_v49 }
 0xf72   : > { %v3882_v11 = vpop.f32.mrf.mxu1 }
 0xf73   : > { %v3887_v14 = vpack.c.bf16 %v3885_v10, %v3885_v10 }
 0xf75   : > { %4055 = vmatprep.mubr.bf16.mxu0 %v3887_v14 }
 0xf76   : > { %4056 = vmatmul.mubr.bf16.vlgmr.msra.gmra.mxu0 %v3886_v15 }
0x1036   : > { %v4637_v16 = vpop.f32.mrf.mxu0 }
0x1038   : > { %v4638_v31 = vpop.f32.mrf.mxu0 }
0x1039   : > { %v4639_v30 = vadd.f32 %v4638_v31, %v4637_v16 }
0x103a   : > { %v4640_v12 = vpop.f32.mrf.mxu0 }
0x103b   : > { %v4058_v19 = vadd.f32 %v4639_v30, %v4498_v18 }
0x103c   : > { %v4641_v21 = vpop.f32.mrf.mxu0 }
0x103d   : > { %v4063_v17 = vadd.f32 %v4058_v19, %v3733_v59 }
0x103f   : > { %4066 = vadd.xlane.f32.xlu0 %v4063_v17 }
0x10c8   : > { %v4067_v22 = vpop.xlane.xlu0 %4066 }
0x10c9   : > { %v4068_v23 = vmul.f32 0.0078125, %v4067_v22 }
0x10cb   : > { %v4069_v24 = vsub.f32 %v4063_v17, %v4068_v23 }
0x10cd   : > { %v4070_v25 = vmul.f32 %v4069_v24, %v4069_v24 }
0x10cf   : > { %4071 = vadd.xlane.f32.xlu0 %v4070_v25 }
0x1158   : > { %v4072_v26 = vpop.xlane.xlu0 %4071 }
0x1159   : > { %v4073_v27 = vmul.f32 0.0078125, %v4072_v26 }
0x115b   : > { %v4074_v20 = vadd.f32 1e-05, %v4073_v27 }
0x115d   : > { %5309 = vrsqrt.f32 %v4074_v20 }
0x116a   : > { %v5310_v13 = vpop.eup %5309 }
0x116b   : > { %v4076_v29 = vmul.f32 %v5310_v13, %v4069_v24 }
0x116d   : > { %v4083_v34 = vmul.f32 %v4515_v28, %v4076_v29 }
0x116f   : > { %v4090_v35 = vadd.f32 %v4516_v32, %v4083_v34 }
0x1171   : > { %4091 = vst [vmem:[%s992_s29] sm:$0xff] %v4090_v35 }
0x1172   : > { %5715 = shalt.err (!%p5712_p6)
}
0x1173   : > { %s5716_s9 = scalar_lea.hbm %s4104_s27, 128  ;;  %s5720_s24 = scalar_lea.hbm %s6811_s0, 256 }
0x1174   : > { %p5717_p10 = scmp.ne.s32.totalorder %s4104_s27, %s5716_s9  ;;  %p5721_p13 = scmp.lt.s32.totalorder %s4104_s27, %s6811_s0 }
0x1175   : > { %p5722_p8 = scmp.lt.s32.totalorder %s5720_s24, %s5716_s9 }
0x1176   : > { %p5718_p4 = pnand %p5717_p10, %p6812_p1 }
0x1177   : > { %p5723_p11 = por %p5722_p8, %p5721_p13 }
0x1178   : > { %p5719_p7 = pneg %p5718_p4 }
0x117a   : > { %p5724_p0 = pnand %p5723_p11, %p5719_p7 }
0x117c   : > { %5727 = shalt.err (!%p5724_p0)
}
0x117d   : > { %4975 = dma.vmem_to_hbm [thread:$0]  (%p6812_p1), %s4107_s26, 128, %s4104_s27, %s4093_s10  }
0x117e PF: > { %s6813_s11 = sld [smem:[#allocation41_spill]] }
0x117f   : > { %s6814_s29 = sld [smem:[#allocation39_spill]] }
0x1180   : > { %s6815_s30 = sld [smem:[#allocation44_spill]] }
0x1184   : > { %p5057_p12 = scmp.ge.s32.totalorder %s6813_s11, 2 }
0x1185   : > { %s4118_s6 = sand.u32 1, %s6814_s29  }
0x1186   : > { %p6816_p2 = scmp.ne.s32.totalorder %s6815_s30, 0  ;;  %s4119_s5 = scalar_lea.sflag [#allocation7], %s4118_s6 }
0x1188   : > { %p5024_p9 = pnand %p5057_p12, %p6816_p2 }
0x118a   : > { %p5025_p3 = pneg %p5024_p9 }
0x118c   : > { %5777 = dma.done.wait (%p5025_p3), %s4119_s5, 128  }
0x118d   : > { %5779 = vsyncadd (%p5025_p3), %s4119_s5, 4294967168  ;;  %s6817_s30 = sld [smem:[#allocation42_spill]]  ;;  %s6820_s29 = smov %s5786_s2 }
0x118e   : > { %s6818_s28 = sld [smem:[#allocation40_spill]] }
0x118f   : > { %s6819_s6 = sld [smem:[#allocation43_spill]] }
0x1193   : > { %p43_p5 = scmp.ge.s32.totalorder %s6817_s30, 4  }
0x1194   : > { %s6821_s2 = smov %s6818_s28 }
0x1195   :  { %45 = sbr.rel (!%p43_p5) target bundleno = 26 (0x1a), region = 239 }
0x119a   :  { %4124 = vsyncpa [#allocation6], 1 }
0x119b   :  { %4126 = vsyncpa [#allocation6 + $0x1], 1 }
0x119c   :  { %4127 = vsyncpa [#allocation9], 1 }
0x119d   :  { %4128 = vsyncpa [#allocation12], 1 }
0x119e   :  { %4129 = vsyncpa [#allocation15], 1 }
0x119f   :  { %4130 = vsyncpa [#allocation18], 1 }
0x11a0   :  { %4131 = vsyncpa [#allocation21], 1 }
0x11a1   :  { %4132 = vsyncpa [#allocation24], 1 }
0x11a2   :  { %4133 = vsyncpa [#allocation27], 1 }
0x11a3   :  { %4134 = vsyncpa [#allocation7], 1 }
0x11a4   :  { %4136 = vsyncpa [#allocation7 + $0x1], 1 }

</bundles_post_ra>
